<compile_context>
chip_gen: v7x
topology: tpu7x:2x2x1
jax: 0.10.0
libtpu: 0.0.40
codegen_flags: <defaults>
</compile_context>

<pallas_src>
from functools import partial

import jax
import jax.numpy as jnp
from jax import lax
from jax.experimental import pallas as pl
from jax.experimental.pallas import tpu as pltpu


def _round_up(n, m):
    return ((n + m - 1) // m) * m


def _full_spec(shape):
    """Whole-array-in-VMEM BlockSpec (no grid => index_map takes no args)."""
    zeros = (0,) * len(shape)
    return pl.BlockSpec(shape, lambda: zeros)


# ----------------------------------------------------------------------------
# Fused kernel: n_layers LSTM layers + dueling head, one invocation.
# Gate layout inside the kernel: [i | f | o | g], each gate padded to G lanes
# (G a multiple of 128).  Padded lanes are exactly zero by construction.
# ----------------------------------------------------------------------------
def _make_fused_kernel(n_layers, T, B, G, n_actions):
    def kernel(*refs):
        x_ref = refs[0]                                   # (T*B, D) rows ordered (t, b)
        layer_refs = refs[1:1 + 3 * n_layers]             # (wih, whh, b) per layer
        (w2_ref, b2_ref, w3_ref, b3_ref,                  # fused dueling-head weights
         q_ref,                                           # (B, QW) padded output slab
         gx_scr,                                          # (T*B, 4G) hoisted gate pre-acts
         hseq_scr) = refs[1 + 3 * n_layers:]              # (T*B, G) inter-layer sequence

        def mm(a, w_ref):
            w = w_ref[...]
            return jnp.dot(a.astype(w.dtype), w, preferred_element_type=jnp.float32)

        h_last = None
        for l in range(n_layers):
            wih_ref = layer_refs[3 * l + 0]
            whh_ref = layer_refs[3 * l + 1]
            b_ref = layer_refs[3 * l + 2]

            # --- Hoisted input projection: one batched MXU matmul over all T*B rows.
            seq_in = x_ref[...] if l == 0 else hseq_scr[...]
            gx_scr[...] = mm(seq_in, wih_ref) + b_ref[...]

            whh = whh_ref[...]                            # load recurrent weights once
            write_seq = l != n_layers - 1                 # last layer: only final h needed

            h = jnp.zeros((B, G), jnp.float32)
            c = jnp.zeros((B, G), jnp.float32)
            # T is small and static: fully unroll with static row offsets.
            for t in range(T):
                row = t * B
                gates = gx_scr[row:row + B, :] + jnp.dot(
                    h.astype(whh.dtype), whh, preferred_element_type=jnp.float32)
                # Gate order [i|f|o|g]: sigmoid over 3G lanes, tanh over G lanes.
                ifo = jax.nn.sigmoid(gates[:, :3 * G])
                g_g = jnp.tanh(gates[:, 3 * G:])
                i_g = ifo[:, 0 * G:1 * G]                 # lane-tile-aligned views
                f_g = ifo[:, 1 * G:2 * G]
                o_g = ifo[:, 2 * G:3 * G]
                c = f_g * c + i_g * g_g
                h = o_g * jnp.tanh(c)
                if write_seq:
                    hseq_scr[row:row + B, :] = h          # stays in VMEM for next layer
            h_last = h

        # --- Dueling head, fused on the final hidden state (never leaves VMEM).
        z = jnp.maximum(mm(h_last, w2_ref) + b2_ref[...], 0.0)   # (B, ZW) = [v1|a1|0]
        va = mm(z, w3_ref) + b3_ref[...]                         # (B, QW) = [v|a|0...]
        v = va[:, 0:1]
        # Padded columns of va are exactly 0, so sum(a) = sum(va) - sum(v).
        # PyTorch semantics: a.mean() averages over batch AND actions.
        mean_a = (jnp.sum(va) - jnp.sum(v)) / (B * n_actions)
        # Slab columns 1..n_actions hold q = v + a - mean(a); others are junk
        # (sliced off in the wrapper).  Full-width, unmasked store.
        q_ref[...] = (va + v - mean_a).astype(q_ref.dtype)

    return kernel


# ----------------------------------------------------------------------------
# One-time parameter preprocessing (outside the per-call jit):
#   * gate reorder [i|f|g|o] -> [i|f|o|g], each gate zero-padded to G lanes
#   * fused head weights [wv2|wa2], block-diagonal [wv3 0; 0 wa3]
#   * head output padded to a 128-lane slab [v | a | 0...]
#   * MXU operands cast to `matmul_dtype`, biases kept f32
# ----------------------------------------------------------------------------
def preprocess_params(params, matmul_dtype=jnp.bfloat16):
    H = params["lstm"][0]["whh"].shape[0]
    G = _round_up(H, 128)
    L2 = params["wv2"].shape[1]
    A = params["wa3"].shape[1]
    ZW = _round_up(2 * L2, 128)
    QW = _round_up(1 + A, 128)

    def reorder(w):  # columns [i|f|g|o] -> tuple (i, f, o, g)
        return (w[..., 0 * H:1 * H], w[..., 1 * H:2 * H],
                w[..., 3 * H:4 * H], w[..., 2 * H:3 * H])

    prep = {"lstm": []}
    for li, layer in enumerate(params["lstm"]):
        wih, whh, b = layer["wih"], layer["whh"], layer["b"]
        d_in = wih.shape[0]
        d_in_p = d_in if li == 0 else G   # layer>0 consumes the padded hidden

        def build(w, rows_out):
            out = jnp.zeros((rows_out, 4 * G), jnp.float32)
            for k, p in enumerate(reorder(w)):
                out = out.at[:p.shape[0], k * G:k * G + H].set(p)
            return out

        wih_p = build(wih, d_in_p)
        whh_p = build(whh, G)
        b_p = jnp.zeros((1, 4 * G), jnp.float32)
        for k, p in enumerate(reorder(b)):
            b_p = b_p.at[:, k * G:k * G + H].set(p)

        prep["lstm"].append({"wih": wih_p.astype(matmul_dtype),
                             "whh": whh_p.astype(matmul_dtype),
                             "b": b_p})

    w2 = jnp.zeros((G, ZW), jnp.float32)
    w2 = w2.at[:H, 0:L2].set(params["wv2"]).at[:H, L2:2 * L2].set(params["wa2"])
    b2 = jnp.zeros((1, ZW), jnp.float32)
    b2 = b2.at[:, 0:L2].set(params["bv2"]).at[:, L2:2 * L2].set(params["ba2"])
    w3 = jnp.zeros((ZW, QW), jnp.float32)
    w3 = w3.at[0:L2, 0:1].set(params["wv3"]).at[L2:2 * L2, 1:1 + A].set(params["wa3"])
    b3 = jnp.zeros((1, QW), jnp.float32)
    b3 = b3.at[:, 0:1].set(params["bv3"]).at[:, 1:1 + A].set(params["ba3"])

    prep["w2"] = w2.astype(matmul_dtype)
    prep["b2"] = b2
    prep["w3"] = w3.astype(matmul_dtype)
    prep["b3"] = b3
    return prep


# ----------------------------------------------------------------------------
# Forward wrapper (training path: hidden initialized to zeros).
# ----------------------------------------------------------------------------
@partial(jax.jit, static_argnames=("n_actions",))
def lstm_dddqn_forward(state, prep, *, n_actions):
    B, T, D = state.shape
    layers = prep["lstm"]
    n_layers = len(layers)
    G = layers[0]["whh"].shape[0]
    QW = prep["w3"].shape[1]
    mmdt = layers[0]["whh"].dtype

    # batch_first -> time-major flat rows (t, b); cast MXU operand to bf16/f32.
    x_tm = jnp.swapaxes(state, 0, 1).reshape(T * B, D).astype(mmdt)

    args = [x_tm]
    for layer in layers:
        args += [layer["wih"], layer["whh"], layer["b"]]
    args += [prep["w2"], prep["b2"], prep["w3"], prep["b3"]]

    kernel = _make_fused_kernel(n_layers, T, B, G, n_actions)

    # Explicit VMEM budget: resident args + scratch + output, with headroom.
    arg_bytes = sum(int(a.size) * a.dtype.itemsize for a in args)
    scratch_bytes = T * B * 4 * G * 4 + T * B * G * 4
    out_bytes = B * QW * 4
    vmem_limit = min(int(1.5 * (arg_bytes + scratch_bytes + out_bytes)) + (16 << 20),
                     96 << 20)

    slab = pl.pallas_call(
        kernel,
        out_shape=jax.ShapeDtypeStruct((B, QW), jnp.float32),
        in_specs=[_full_spec(a.shape) for a in args],
        out_specs=_full_spec((B, QW)),
        scratch_shapes=[
            pltpu.VMEM((T * B, 4 * G), jnp.float32),   # hoisted gate pre-activations
            pltpu.VMEM((T * B, G), jnp.float32),       # inter-layer hidden sequence
        ],
        compiler_params=pltpu.CompilerParams(vmem_limit_bytes=vmem_limit),
    )(*args)

    return slab[:, 1:1 + n_actions]


# ----------------------------------------------------------------------------
# Pure-JAX reference (correctness check only) — uses the raw, unpadded params.
# ----------------------------------------------------------------------------
def reference_forward(state, params):
    seq = state
    B = state.shape[0]
    for layer in params["lstm"]:
        wih, whh, b = layer["wih"], layer["whh"], layer["b"]
        H = whh.shape[0]

        def step(carry, x_t):
            h, c = carry
            gates = x_t @ wih + h @ whh + b[0]
            i, f, g, o = jnp.split(gates, 4, axis=-1)
            i, f, o = jax.nn.sigmoid(i), jax.nn.sigmoid(f), jax.nn.sigmoid(o)
            g = jnp.tanh(g)
            c = f * c + i * g
            h = o * jnp.tanh(c)
            return (h, c), h

        init = (jnp.zeros((B, H), jnp.float32), jnp.zeros((B, H), jnp.float32))
        _, hs = lax.scan(step, init, jnp.swapaxes(seq, 0, 1))
        seq = jnp.swapaxes(hs, 0, 1)
    out = seq[:, -1, :]
    v = jax.nn.relu(out @ params["wv2"] + params["bv2"][0]) @ params["wv3"] + params["bv3"][0]
    a = jax.nn.relu(out @ params["wa2"] + params["ba2"][0]) @ params["wa3"] + params["ba3"][0]
    return v + (a - jnp.mean(a))


# ----------------------------------------------------------------------------
# Deterministic parameter init (synthetic; shapes follow the nn.Module, linear
# weights pre-transposed to (in, out), LSTM gate order [i|f|g|o]).
# ----------------------------------------------------------------------------
def init_params(key, input_dims, l1_dims, l2_dims, n_layers, n_actions):
    def uni(k, shape, scale):
        return jax.random.uniform(k, shape, jnp.float32, -scale, scale)

    params = {"lstm": []}
    s = 1.0 / jnp.sqrt(l1_dims)
    keys = jax.random.split(key, 4 * n_layers + 8)
    ki = 0
    d_in = input_dims
    for _ in range(n_layers):
        wih = uni(keys[ki], (d_in, 4 * l1_dims), s); ki += 1      # weight_ih.T
        whh = uni(keys[ki], (l1_dims, 4 * l1_dims), s); ki += 1   # weight_hh.T
        b_ih = uni(keys[ki], (1, 4 * l1_dims), s); ki += 1
        b_hh = uni(keys[ki], (1, 4 * l1_dims), s); ki += 1
        params["lstm"].append({"wih": wih, "whh": whh, "b": b_ih + b_hh})
        d_in = l1_dims

    s2 = 1.0 / jnp.sqrt(l1_dims)
    params["wv2"] = uni(keys[ki], (l1_dims, l2_dims), s2); ki += 1
    params["bv2"] = uni(keys[ki], (1, l2_dims), s2); ki += 1
    params["wa2"] = uni(keys[ki], (l1_dims, l2_dims), s2); ki += 1
    params["ba2"] = uni(keys[ki], (1, l2_dims), s2); ki += 1
    s3 = 1.0 / jnp.sqrt(l2_dims)
    params["wv3"] = uni(keys[ki], (l2_dims, 1), s3); ki += 1
    params["bv3"] = uni(keys[ki], (1, 1), s3); ki += 1
    params["wa3"] = uni(keys[ki], (l2_dims, n_actions), s3); ki += 1
    params["ba3"] = uni(keys[ki], (1, n_actions), s3); ki += 1
    return params


if __name__ == "__main__":
    B, T = 2, 8
    input_dims, l1_dims, l2_dims, n_layers, n_actions = 16, 32, 32, 2, 4

    key = jax.random.PRNGKey(0)
    k_param, k_state = jax.random.split(key)
    params = init_params(k_param, input_dims, l1_dims, l2_dims, n_layers, n_actions)
    state = jax.random.normal(k_state, (B, T, input_dims), jnp.float32)

    q_ref = reference_forward(state, params)

    # f32 MXU operands: exact-math path, tight tolerance.
    prep_f32 = preprocess_params(params, matmul_dtype=jnp.float32)
    q32 = jax.block_until_ready(lstm_dddqn_forward(state, prep_f32, n_actions=n_actions))
    assert q32.shape == (B, n_actions)
    assert jnp.allclose(q32, q_ref, atol=1e-4, rtol=1e-5), (q32, q_ref)

    # bf16 MXU operands (default fast path, esp. v6e/v7x): loose tolerance.
    prep_bf16 = preprocess_params(params, matmul_dtype=jnp.bfloat16)
    qbf = jax.block_until_ready(lstm_dddqn_forward(state, prep_bf16, n_actions=n_actions))
    assert qbf.shape == (B, n_actions)
    assert jnp.allclose(qbf, q_ref, atol=5e-2, rtol=5e-2), (qbf, q_ref)

    print("KERNEL_OK")
</pallas_src>

<mosaic_0001>
module attributes {stable_mosaic.version = 11 : i64} {
  func.func @kernel(%arg0: memref<16x16xf32, #tpu.memory_space<vmem>>, %arg1: memref<16x512xf32, #tpu.memory_space<vmem>>, %arg2: memref<128x512xf32, #tpu.memory_space<vmem>>, %arg3: memref<1x512xf32, #tpu.memory_space<vmem>>, %arg4: memref<128x512xf32, #tpu.memory_space<vmem>>, %arg5: memref<128x512xf32, #tpu.memory_space<vmem>>, %arg6: memref<1x512xf32, #tpu.memory_space<vmem>>, %arg7: memref<128x128xf32, #tpu.memory_space<vmem>>, %arg8: memref<1x128xf32, #tpu.memory_space<vmem>>, %arg9: memref<128x128xf32, #tpu.memory_space<vmem>>, %arg10: memref<1x128xf32, #tpu.memory_space<vmem>>, %arg11: memref<2x128xf32, #tpu.memory_space<vmem>>, %arg12: memref<16x512xf32, #tpu.memory_space<vmem>>, %arg13: memref<16x128xf32, #tpu.memory_space<vmem>>) attributes {dimension_semantics = [], scalar_prefetch = 0 : i64, scratch_operands = 2 : i64, tpu.core_type = #tpu.core_type<tc>} {
    %c0 = arith.constant 0 : index
    %c0_0 = arith.constant 0 : index
    %0 = vector.load %arg0[%c0, %c0_0] : memref<16x16xf32, #tpu.memory_space<vmem>>, vector<16x16xf32>
    %c0_1 = arith.constant 0 : index
    %c0_2 = arith.constant 0 : index
    %1 = vector.load %arg1[%c0_1, %c0_2] : memref<16x512xf32, #tpu.memory_space<vmem>>, vector<16x512xf32>
    %cst = arith.constant dense<0.000000e+00> : vector<16x512xf32>
    %2 = tpu.matmul %0, %1, %cst {dimension_numbers = #tpu.dot_dimension_numbers<[1], [0], [0], [1], [0, 0, 1, 1], [], []>} : vector<16x16xf32>, vector<16x512xf32>, vector<16x512xf32> -> vector<16x512xf32>
    %c0_3 = arith.constant 0 : index
    %c0_4 = arith.constant 0 : index
    %3 = vector.load %arg3[%c0_3, %c0_4] : memref<1x512xf32, #tpu.memory_space<vmem>>, vector<1x512xf32>
    %4 = vector.broadcast %3 : vector<1x512xf32> to vector<16x512xf32>
    %5 = arith.addf %2, %4 : vector<16x512xf32>
    %c0_5 = arith.constant 0 : index
    %c0_6 = arith.constant 0 : index
    %6 = vector.load %arg12[%c0_5, %c0_6] : memref<16x512xf32, #tpu.memory_space<vmem>>, vector<16x512xf32>
    tpu.vector_store %arg12[%c0_5, %c0_6], %5 {strides = array<i32>} : memref<16x512xf32, #tpu.memory_space<vmem>>, vector<16x512xf32>,
    %c0_7 = arith.constant 0 : index
    %c0_8 = arith.constant 0 : index
    %7 = vector.load %arg2[%c0_7, %c0_8] : memref<128x512xf32, #tpu.memory_space<vmem>>, vector<128x512xf32>
    %cst_9 = arith.constant 0.000000e+00 : f32
    %8 = vector.broadcast %cst_9 : f32 to vector<2x128xf32>
    %cst_10 = arith.constant 0.000000e+00 : f32
    %9 = vector.broadcast %cst_10 : f32 to vector<2x128xf32>
    %c0_11 = arith.constant 0 : index
    %c0_12 = arith.constant 0 : index
    %10 = vector.load %arg12[%c0_11, %c0_12] : memref<16x512xf32, #tpu.memory_space<vmem>>, vector<2x512xf32>
    %cst_13 = arith.constant dense<0.000000e+00> : vector<2x512xf32>
    %11 = tpu.matmul %8, %7, %cst_13 {dimension_numbers = #tpu.dot_dimension_numbers<[1], [0], [0], [1], [0, 0, 1, 1], [], []>} : vector<2x128xf32>, vector<128x512xf32>, vector<2x512xf32> -> vector<2x512xf32>
    %12 = arith.addf %10, %11 : vector<2x512xf32>
    %13 = vector.extract_strided_slice %12 {offsets = [0, 0], sizes = [2, 384], strides = [1, 1]} : vector<2x512xf32> to vector<2x384xf32>
    %14 = arith.negf %13 : vector<2x384xf32>
    %15 = math.exp %14 : vector<2x384xf32>
    %cst_14 = arith.constant 1.000000e+00 : f32
    %16 = vector.broadcast %cst_14 : f32 to vector<2x384xf32>
    %17 = arith.addf %16, %15 : vector<2x384xf32>
    %18 = arith.divf %16, %17 : vector<2x384xf32>
    %19 = vector.extract_strided_slice %12 {offsets = [0, 384], sizes = [2, 128], strides = [1, 1]} : vector<2x512xf32> to vector<2x128xf32>
    %20 = math.tanh %19 : vector<2x128xf32>
    %21 = vector.extract_strided_slice %18 {offsets = [0, 0], sizes = [2, 128], strides = [1, 1]} : vector<2x384xf32> to vector<2x128xf32>
    %22 = vector.extract_strided_slice %18 {offsets = [0, 128], sizes = [2, 128], strides = [1, 1]} : vector<2x384xf32> to vector<2x128xf32>
    %23 = vector.extract_strided_slice %18 {offsets = [0, 256], sizes = [2, 128], strides = [1, 1]} : vector<2x384xf32> to vector<2x128xf32>
    %24 = arith.mulf %22, %9 : vector<2x128xf32>
    %25 = arith.mulf %21, %20 : vector<2x128xf32>
    %26 = arith.addf %24, %25 : vector<2x128xf32>
    %27 = math.tanh %26 : vector<2x128xf32>
    %28 = arith.mulf %23, %27 : vector<2x128xf32>
    %c0_15 = arith.constant 0 : index
    %c0_16 = arith.constant 0 : index
    %29 = vector.load %arg13[%c0_15, %c0_16] : memref<16x128xf32, #tpu.memory_space<vmem>>, vector<2x128xf32>
    tpu.vector_store %arg13[%c0_15, %c0_16], %28 {strides = array<i32>} : memref<16x128xf32, #tpu.memory_space<vmem>>, vector<2x128xf32>,
    %c2 = arith.constant 2 : index
    %c0_17 = arith.constant 0 : index
    %30 = vector.load %arg12[%c2, %c0_17] : memref<16x512xf32, #tpu.memory_space<vmem>>, vector<2x512xf32>
    %cst_18 = arith.constant dense<0.000000e+00> : vector<2x512xf32>
    %31 = tpu.matmul %28, %7, %cst_18 {dimension_numbers = #tpu.dot_dimension_numbers<[1], [0], [0], [1], [0, 0, 1, 1], [], []>} : vector<2x128xf32>, vector<128x512xf32>, vector<2x512xf32> -> vector<2x512xf32>
    %32 = arith.addf %30, %31 : vector<2x512xf32>
    %33 = vector.extract_strided_slice %32 {offsets = [0, 0], sizes = [2, 384], strides = [1, 1]} : vector<2x512xf32> to vector<2x384xf32>
    %34 = arith.negf %33 : vector<2x384xf32>
    %35 = math.exp %34 : vector<2x384xf32>
    %cst_19 = arith.constant 1.000000e+00 : f32
    %36 = vector.broadcast %cst_19 : f32 to vector<2x384xf32>
    %37 = arith.addf %36, %35 : vector<2x384xf32>
    %38 = arith.divf %36, %37 : vector<2x384xf32>
    %39 = vector.extract_strided_slice %32 {offsets = [0, 384], sizes = [2, 128], strides = [1, 1]} : vector<2x512xf32> to vector<2x128xf32>
    %40 = math.tanh %39 : vector<2x128xf32>
    %41 = vector.extract_strided_slice %38 {offsets = [0, 0], sizes = [2, 128], strides = [1, 1]} : vector<2x384xf32> to vector<2x128xf32>
    %42 = vector.extract_strided_slice %38 {offsets = [0, 128], sizes = [2, 128], strides = [1, 1]} : vector<2x384xf32> to vector<2x128xf32>
    %43 = vector.extract_strided_slice %38 {offsets = [0, 256], sizes = [2, 128], strides = [1, 1]} : vector<2x384xf32> to vector<2x128xf32>
    %44 = arith.mulf %42, %26 : vector<2x128xf32>
    %45 = arith.mulf %41, %40 : vector<2x128xf32>
    %46 = arith.addf %44, %45 : vector<2x128xf32>
    %47 = math.tanh %46 : vector<2x128xf32>
    %48 = arith.mulf %43, %47 : vector<2x128xf32>
    %c2_20 = arith.constant 2 : index
    %c0_21 = arith.constant 0 : index
    %49 = vector.load %arg13[%c2_20, %c0_21] : memref<16x128xf32, #tpu.memory_space<vmem>>, vector<2x128xf32>
    tpu.vector_store %arg13[%c2_20, %c0_21], %48 {strides = array<i32>} : memref<16x128xf32, #tpu.memory_space<vmem>>, vector<2x128xf32>,
    %c4 = arith.constant 4 : index
    %c0_22 = arith.constant 0 : index
    %50 = vector.load %arg12[%c4, %c0_22] : memref<16x512xf32, #tpu.memory_space<vmem>>, vector<2x512xf32>
    %cst_23 = arith.constant dense<0.000000e+00> : vector<2x512xf32>
    %51 = tpu.matmul %48, %7, %cst_23 {dimension_numbers = #tpu.dot_dimension_numbers<[1], [0], [0], [1], [0, 0, 1, 1], [], []>} : vector<2x128xf32>, vector<128x512xf32>, vector<2x512xf32> -> vector<2x512xf32>
    %52 = arith.addf %50, %51 : vector<2x512xf32>
    %53 = vector.extract_strided_slice %52 {offsets = [0, 0], sizes = [2, 384], strides = [1, 1]} : vector<2x512xf32> to vector<2x384xf32>
    %54 = arith.negf %53 : vector<2x384xf32>
    %55 = math.exp %54 : vector<2x384xf32>
    %cst_24 = arith.constant 1.000000e+00 : f32
    %56 = vector.broadcast %cst_24 : f32 to vector<2x384xf32>
    %57 = arith.addf %56, %55 : vector<2x384xf32>
    %58 = arith.divf %56, %57 : vector<2x384xf32>
    %59 = vector.extract_strided_slice %52 {offsets = [0, 384], sizes = [2, 128], strides = [1, 1]} : vector<2x512xf32> to vector<2x128xf32>
    %60 = math.tanh %59 : vector<2x128xf32>
    %61 = vector.extract_strided_slice %58 {offsets = [0, 0], sizes = [2, 128], strides = [1, 1]} : vector<2x384xf32> to vector<2x128xf32>
    %62 = vector.extract_strided_slice %58 {offsets = [0, 128], sizes = [2, 128], strides = [1, 1]} : vector<2x384xf32> to vector<2x128xf32>
    %63 = vector.extract_strided_slice %58 {offsets = [0, 256], sizes = [2, 128], strides = [1, 1]} : vector<2x384xf32> to vector<2x128xf32>
    %64 = arith.mulf %62, %46 : vector<2x128xf32>
    %65 = arith.mulf %61, %60 : vector<2x128xf32>
    %66 = arith.addf %64, %65 : vector<2x128xf32>
    %67 = math.tanh %66 : vector<2x128xf32>
    %68 = arith.mulf %63, %67 : vector<2x128xf32>
    %c4_25 = arith.constant 4 : index
    %c0_26 = arith.constant 0 : index
    %69 = vector.load %arg13[%c4_25, %c0_26] : memref<16x128xf32, #tpu.memory_space<vmem>>, vector<2x128xf32>
    tpu.vector_store %arg13[%c4_25, %c0_26], %68 {strides = array<i32>} : memref<16x128xf32, #tpu.memory_space<vmem>>, vector<2x128xf32>,
    %c6 = arith.constant 6 : index
    %c0_27 = arith.constant 0 : index
    %70 = vector.load %arg12[%c6, %c0_27] : memref<16x512xf32, #tpu.memory_space<vmem>>, vector<2x512xf32>
    %cst_28 = arith.constant dense<0.000000e+00> : vector<2x512xf32>
    %71 = tpu.matmul %68, %7, %cst_28 {dimension_numbers = #tpu.dot_dimension_numbers<[1], [0], [0], [1], [0, 0, 1, 1], [], []>} : vector<2x128xf32>, vector<128x512xf32>, vector<2x512xf32> -> vector<2x512xf32>
    %72 = arith.addf %70, %71 : vector<2x512xf32>
    %73 = vector.extract_strided_slice %72 {offsets = [0, 0], sizes = [2, 384], strides = [1, 1]} : vector<2x512xf32> to vector<2x384xf32>
    %74 = arith.negf %73 : vector<2x384xf32>
    %75 = math.exp %74 : vector<2x384xf32>
    %cst_29 = arith.constant 1.000000e+00 : f32
    %76 = vector.broadcast %cst_29 : f32 to vector<2x384xf32>
    %77 = arith.addf %76, %75 : vector<2x384xf32>
    %78 = arith.divf %76, %77 : vector<2x384xf32>
    %79 = vector.extract_strided_slice %72 {offsets = [0, 384], sizes = [2, 128], strides = [1, 1]} : vector<2x512xf32> to vector<2x128xf32>
    %80 = math.tanh %79 : vector<2x128xf32>
    %81 = vector.extract_strided_slice %78 {offsets = [0, 0], sizes = [2, 128], strides = [1, 1]} : vector<2x384xf32> to vector<2x128xf32>
    %82 = vector.extract_strided_slice %78 {offsets = [0, 128], sizes = [2, 128], strides = [1, 1]} : vector<2x384xf32> to vector<2x128xf32>
    %83 = vector.extract_strided_slice %78 {offsets = [0, 256], sizes = [2, 128], strides = [1, 1]} : vector<2x384xf32> to vector<2x128xf32>
    %84 = arith.mulf %82, %66 : vector<2x128xf32>
    %85 = arith.mulf %81, %80 : vector<2x128xf32>
    %86 = arith.addf %84, %85 : vector<2x128xf32>
    %87 = math.tanh %86 : vector<2x128xf32>
    %88 = arith.mulf %83, %87 : vector<2x128xf32>
    %c6_30 = arith.constant 6 : index
    %c0_31 = arith.constant 0 : index
    %89 = vector.load %arg13[%c6_30, %c0_31] : memref<16x128xf32, #tpu.memory_space<vmem>>, vector<2x128xf32>
    tpu.vector_store %arg13[%c6_30, %c0_31], %88 {strides = array<i32>} : memref<16x128xf32, #tpu.memory_space<vmem>>, vector<2x128xf32>,
    %c8 = arith.constant 8 : index
    %c0_32 = arith.constant 0 : index
    %90 = vector.load %arg12[%c8, %c0_32] : memref<16x512xf32, #tpu.memory_space<vmem>>, vector<2x512xf32>
    %cst_33 = arith.constant dense<0.000000e+00> : vector<2x512xf32>
    %91 = tpu.matmul %88, %7, %cst_33 {dimension_numbers = #tpu.dot_dimension_numbers<[1], [0], [0], [1], [0, 0, 1, 1], [], []>} : vector<2x128xf32>, vector<128x512xf32>, vector<2x512xf32> -> vector<2x512xf32>
    %92 = arith.addf %90, %91 : vector<2x512xf32>
    %93 = vector.extract_strided_slice %92 {offsets = [0, 0], sizes = [2, 384], strides = [1, 1]} : vector<2x512xf32> to vector<2x384xf32>
    %94 = arith.negf %93 : vector<2x384xf32>
    %95 = math.exp %94 : vector<2x384xf32>
    %cst_34 = arith.constant 1.000000e+00 : f32
    %96 = vector.broadcast %cst_34 : f32 to vector<2x384xf32>
    %97 = arith.addf %96, %95 : vector<2x384xf32>
    %98 = arith.divf %96, %97 : vector<2x384xf32>
    %99 = vector.extract_strided_slice %92 {offsets = [0, 384], sizes = [2, 128], strides = [1, 1]} : vector<2x512xf32> to vector<2x128xf32>
    %100 = math.tanh %99 : vector<2x128xf32>
    %101 = vector.extract_strided_slice %98 {offsets = [0, 0], sizes = [2, 128], strides = [1, 1]} : vector<2x384xf32> to vector<2x128xf32>
    %102 = vector.extract_strided_slice %98 {offsets = [0, 128], sizes = [2, 128], strides = [1, 1]} : vector<2x384xf32> to vector<2x128xf32>
    %103 = vector.extract_strided_slice %98 {offsets = [0, 256], sizes = [2, 128], strides = [1, 1]} : vector<2x384xf32> to vector<2x128xf32>
    %104 = arith.mulf %102, %86 : vector<2x128xf32>
    %105 = arith.mulf %101, %100 : vector<2x128xf32>
    %106 = arith.addf %104, %105 : vector<2x128xf32>
    %107 = math.tanh %106 : vector<2x128xf32>
    %108 = arith.mulf %103, %107 : vector<2x128xf32>
    %c8_35 = arith.constant 8 : index
    %c0_36 = arith.constant 0 : index
    %109 = vector.load %arg13[%c8_35, %c0_36] : memref<16x128xf32, #tpu.memory_space<vmem>>, vector<2x128xf32>
    tpu.vector_store %arg13[%c8_35, %c0_36], %108 {strides = array<i32>} : memref<16x128xf32, #tpu.memory_space<vmem>>, vector<2x128xf32>,
    %c10 = arith.constant 10 : index
    %c0_37 = arith.constant 0 : index
    %110 = vector.load %arg12[%c10, %c0_37] : memref<16x512xf32, #tpu.memory_space<vmem>>, vector<2x512xf32>
    %cst_38 = arith.constant dense<0.000000e+00> : vector<2x512xf32>
    %111 = tpu.matmul %108, %7, %cst_38 {dimension_numbers = #tpu.dot_dimension_numbers<[1], [0], [0], [1], [0, 0, 1, 1], [], []>} : vector<2x128xf32>, vector<128x512xf32>, vector<2x512xf32> -> vector<2x512xf32>
    %112 = arith.addf %110, %111 : vector<2x512xf32>
    %113 = vector.extract_strided_slice %112 {offsets = [0, 0], sizes = [2, 384], strides = [1, 1]} : vector<2x512xf32> to vector<2x384xf32>
    %114 = arith.negf %113 : vector<2x384xf32>
    %115 = math.exp %114 : vector<2x384xf32>
    %cst_39 = arith.constant 1.000000e+00 : f32
    %116 = vector.broadcast %cst_39 : f32 to vector<2x384xf32>
    %117 = arith.addf %116, %115 : vector<2x384xf32>
    %118 = arith.divf %116, %117 : vector<2x384xf32>
    %119 = vector.extract_strided_slice %112 {offsets = [0, 384], sizes = [2, 128], strides = [1, 1]} : vector<2x512xf32> to vector<2x128xf32>
    %120 = math.tanh %119 : vector<2x128xf32>
    %121 = vector.extract_strided_slice %118 {offsets = [0, 0], sizes = [2, 128], strides = [1, 1]} : vector<2x384xf32> to vector<2x128xf32>
    %122 = vector.extract_strided_slice %118 {offsets = [0, 128], sizes = [2, 128], strides = [1, 1]} : vector<2x384xf32> to vector<2x128xf32>
    %123 = vector.extract_strided_slice %118 {offsets = [0, 256], sizes = [2, 128], strides = [1, 1]} : vector<2x384xf32> to vector<2x128xf32>
    %124 = arith.mulf %122, %106 : vector<2x128xf32>
    %125 = arith.mulf %121, %120 : vector<2x128xf32>
    %126 = arith.addf %124, %125 : vector<2x128xf32>
    %127 = math.tanh %126 : vector<2x128xf32>
    %128 = arith.mulf %123, %127 : vector<2x128xf32>
    %c10_40 = arith.constant 10 : index
    %c0_41 = arith.constant 0 : index
    %129 = vector.load %arg13[%c10_40, %c0_41] : memref<16x128xf32, #tpu.memory_space<vmem>>, vector<2x128xf32>
    tpu.vector_store %arg13[%c10_40, %c0_41], %128 {strides = array<i32>} : memref<16x128xf32, #tpu.memory_space<vmem>>, vector<2x128xf32>,
    %c12 = arith.constant 12 : index
    %c0_42 = arith.constant 0 : index
    %130 = vector.load %arg12[%c12, %c0_42] : memref<16x512xf32, #tpu.memory_space<vmem>>, vector<2x512xf32>
    %cst_43 = arith.constant dense<0.000000e+00> : vector<2x512xf32>
    %131 = tpu.matmul %128, %7, %cst_43 {dimension_numbers = #tpu.dot_dimension_numbers<[1], [0], [0], [1], [0, 0, 1, 1], [], []>} : vector<2x128xf32>, vector<128x512xf32>, vector<2x512xf32> -> vector<2x512xf32>
    %132 = arith.addf %130, %131 : vector<2x512xf32>
    %133 = vector.extract_strided_slice %132 {offsets = [0, 0], sizes = [2, 384], strides = [1, 1]} : vector<2x512xf32> to vector<2x384xf32>
    %134 = arith.negf %133 : vector<2x384xf32>
    %135 = math.exp %134 : vector<2x384xf32>
    %cst_44 = arith.constant 1.000000e+00 : f32
    %136 = vector.broadcast %cst_44 : f32 to vector<2x384xf32>
    %137 = arith.addf %136, %135 : vector<2x384xf32>
    %138 = arith.divf %136, %137 : vector<2x384xf32>
    %139 = vector.extract_strided_slice %132 {offsets = [0, 384], sizes = [2, 128], strides = [1, 1]} : vector<2x512xf32> to vector<2x128xf32>
    %140 = math.tanh %139 : vector<2x128xf32>
    %141 = vector.extract_strided_slice %138 {offsets = [0, 0], sizes = [2, 128], strides = [1, 1]} : vector<2x384xf32> to vector<2x128xf32>
    %142 = vector.extract_strided_slice %138 {offsets = [0, 128], sizes = [2, 128], strides = [1, 1]} : vector<2x384xf32> to vector<2x128xf32>
    %143 = vector.extract_strided_slice %138 {offsets = [0, 256], sizes = [2, 128], strides = [1, 1]} : vector<2x384xf32> to vector<2x128xf32>
    %144 = arith.mulf %142, %126 : vector<2x128xf32>
    %145 = arith.mulf %141, %140 : vector<2x128xf32>
    %146 = arith.addf %144, %145 : vector<2x128xf32>
    %147 = math.tanh %146 : vector<2x128xf32>
    %148 = arith.mulf %143, %147 : vector<2x128xf32>
    %c12_45 = arith.constant 12 : index
    %c0_46 = arith.constant 0 : index
    %149 = vector.load %arg13[%c12_45, %c0_46] : memref<16x128xf32, #tpu.memory_space<vmem>>, vector<2x128xf32>
    tpu.vector_store %arg13[%c12_45, %c0_46], %148 {strides = array<i32>} : memref<16x128xf32, #tpu.memory_space<vmem>>, vector<2x128xf32>,
    %c14 = arith.constant 14 : index
    %c0_47 = arith.constant 0 : index
    %150 = vector.load %arg12[%c14, %c0_47] : memref<16x512xf32, #tpu.memory_space<vmem>>, vector<2x512xf32>
    %cst_48 = arith.constant dense<0.000000e+00> : vector<2x512xf32>
    %151 = tpu.matmul %148, %7, %cst_48 {dimension_numbers = #tpu.dot_dimension_numbers<[1], [0], [0], [1], [0, 0, 1, 1], [], []>} : vector<2x128xf32>, vector<128x512xf32>, vector<2x512xf32> -> vector<2x512xf32>
    %152 = arith.addf %150, %151 : vector<2x512xf32>
    %153 = vector.extract_strided_slice %152 {offsets = [0, 0], sizes = [2, 384], strides = [1, 1]} : vector<2x512xf32> to vector<2x384xf32>
    %154 = arith.negf %153 : vector<2x384xf32>
    %155 = math.exp %154 : vector<2x384xf32>
    %cst_49 = arith.constant 1.000000e+00 : f32
    %156 = vector.broadcast %cst_49 : f32 to vector<2x384xf32>
    %157 = arith.addf %156, %155 : vector<2x384xf32>
    %158 = arith.divf %156, %157 : vector<2x384xf32>
    %159 = vector.extract_strided_slice %152 {offsets = [0, 384], sizes = [2, 128], strides = [1, 1]} : vector<2x512xf32> to vector<2x128xf32>
    %160 = math.tanh %159 : vector<2x128xf32>
    %161 = vector.extract_strided_slice %158 {offsets = [0, 0], sizes = [2, 128], strides = [1, 1]} : vector<2x384xf32> to vector<2x128xf32>
    %162 = vector.extract_strided_slice %158 {offsets = [0, 128], sizes = [2, 128], strides = [1, 1]} : vector<2x384xf32> to vector<2x128xf32>
    %163 = vector.extract_strided_slice %158 {offsets = [0, 256], sizes = [2, 128], strides = [1, 1]} : vector<2x384xf32> to vector<2x128xf32>
    %164 = arith.mulf %162, %146 : vector<2x128xf32>
    %165 = arith.mulf %161, %160 : vector<2x128xf32>
    %166 = arith.addf %164, %165 : vector<2x128xf32>
    %167 = math.tanh %166 : vector<2x128xf32>
    %168 = arith.mulf %163, %167 : vector<2x128xf32>
    %c14_50 = arith.constant 14 : index
    %c0_51 = arith.constant 0 : index
    %169 = vector.load %arg13[%c14_50, %c0_51] : memref<16x128xf32, #tpu.memory_space<vmem>>, vector<2x128xf32>
    tpu.vector_store %arg13[%c14_50, %c0_51], %168 {strides = array<i32>} : memref<16x128xf32, #tpu.memory_space<vmem>>, vector<2x128xf32>,
    %c0_52 = arith.constant 0 : index
    %c0_53 = arith.constant 0 : index
    %170 = vector.load %arg13[%c0_52, %c0_53] : memref<16x128xf32, #tpu.memory_space<vmem>>, vector<16x128xf32>
    %c0_54 = arith.constant 0 : index
    %c0_55 = arith.constant 0 : index
    %171 = vector.load %arg4[%c0_54, %c0_55] : memref<128x512xf32, #tpu.memory_space<vmem>>, vector<128x512xf32>
    %cst_56 = arith.constant dense<0.000000e+00> : vector<16x512xf32>
    %172 = tpu.matmul %170, %171, %cst_56 {dimension_numbers = #tpu.dot_dimension_numbers<[1], [0], [0], [1], [0, 0, 1, 1], [], []>} : vector<16x128xf32>, vector<128x512xf32>, vector<16x512xf32> -> vector<16x512xf32>
    %c0_57 = arith.constant 0 : index
    %c0_58 = arith.constant 0 : index
    %173 = vector.load %arg6[%c0_57, %c0_58] : memref<1x512xf32, #tpu.memory_space<vmem>>, vector<1x512xf32>
    %174 = vector.broadcast %173 : vector<1x512xf32> to vector<16x512xf32>
    %175 = arith.addf %172, %174 : vector<16x512xf32>
    %c0_59 = arith.constant 0 : index
    %c0_60 = arith.constant 0 : index
    %176 = vector.load %arg12[%c0_59, %c0_60] : memref<16x512xf32, #tpu.memory_space<vmem>>, vector<16x512xf32>
    tpu.vector_store %arg12[%c0_59, %c0_60], %175 {strides = array<i32>} : memref<16x512xf32, #tpu.memory_space<vmem>>, vector<16x512xf32>,
    %c0_61 = arith.constant 0 : index
    %c0_62 = arith.constant 0 : index
    %177 = vector.load %arg5[%c0_61, %c0_62] : memref<128x512xf32, #tpu.memory_space<vmem>>, vector<128x512xf32>
    %cst_63 = arith.constant 0.000000e+00 : f32
    %178 = vector.broadcast %cst_63 : f32 to vector<2x128xf32>
    %cst_64 = arith.constant 0.000000e+00 : f32
    %179 = vector.broadcast %cst_64 : f32 to vector<2x128xf32>
    %c0_65 = arith.constant 0 : index
    %c0_66 = arith.constant 0 : index
    %180 = vector.load %arg12[%c0_65, %c0_66] : memref<16x512xf32, #tpu.memory_space<vmem>>, vector<2x512xf32>
    %cst_67 = arith.constant dense<0.000000e+00> : vector<2x512xf32>
    %181 = tpu.matmul %178, %177, %cst_67 {dimension_numbers = #tpu.dot_dimension_numbers<[1], [0], [0], [1], [0, 0, 1, 1], [], []>} : vector<2x128xf32>, vector<128x512xf32>, vector<2x512xf32> -> vector<2x512xf32>
    %182 = arith.addf %180, %181 : vector<2x512xf32>
    %183 = vector.extract_strided_slice %182 {offsets = [0, 0], sizes = [2, 384], strides = [1, 1]} : vector<2x512xf32> to vector<2x384xf32>
    %184 = arith.negf %183 : vector<2x384xf32>
    %185 = math.exp %184 : vector<2x384xf32>
    %cst_68 = arith.constant 1.000000e+00 : f32
    %186 = vector.broadcast %cst_68 : f32 to vector<2x384xf32>
    %187 = arith.addf %186, %185 : vector<2x384xf32>
    %188 = arith.divf %186, %187 : vector<2x384xf32>
    %189 = vector.extract_strided_slice %182 {offsets = [0, 384], sizes = [2, 128], strides = [1, 1]} : vector<2x512xf32> to vector<2x128xf32>
    %190 = math.tanh %189 : vector<2x128xf32>
    %191 = vector.extract_strided_slice %188 {offsets = [0, 0], sizes = [2, 128], strides = [1, 1]} : vector<2x384xf32> to vector<2x128xf32>
    %192 = vector.extract_strided_slice %188 {offsets = [0, 128], sizes = [2, 128], strides = [1, 1]} : vector<2x384xf32> to vector<2x128xf32>
    %193 = vector.extract_strided_slice %188 {offsets = [0, 256], sizes = [2, 128], strides = [1, 1]} : vector<2x384xf32> to vector<2x128xf32>
    %194 = arith.mulf %192, %179 : vector<2x128xf32>
    %195 = arith.mulf %191, %190 : vector<2x128xf32>
    %196 = arith.addf %194, %195 : vector<2x128xf32>
    %197 = math.tanh %196 : vector<2x128xf32>
    %198 = arith.mulf %193, %197 : vector<2x128xf32>
    %c2_69 = arith.constant 2 : index
    %c0_70 = arith.constant 0 : index
    %199 = vector.load %arg12[%c2_69, %c0_70] : memref<16x512xf32, #tpu.memory_space<vmem>>, vector<2x512xf32>
    %cst_71 = arith.constant dense<0.000000e+00> : vector<2x512xf32>
    %200 = tpu.matmul %198, %177, %cst_71 {dimension_numbers = #tpu.dot_dimension_numbers<[1], [0], [0], [1], [0, 0, 1, 1], [], []>} : vector<2x128xf32>, vector<128x512xf32>, vector<2x512xf32> -> vector<2x512xf32>
    %201 = arith.addf %199, %200 : vector<2x512xf32>
    %202 = vector.extract_strided_slice %201 {offsets = [0, 0], sizes = [2, 384], strides = [1, 1]} : vector<2x512xf32> to vector<2x384xf32>
    %203 = arith.negf %202 : vector<2x384xf32>
    %204 = math.exp %203 : vector<2x384xf32>
    %cst_72 = arith.constant 1.000000e+00 : f32
    %205 = vector.broadcast %cst_72 : f32 to vector<2x384xf32>
    %206 = arith.addf %205, %204 : vector<2x384xf32>
    %207 = arith.divf %205, %206 : vector<2x384xf32>
    %208 = vector.extract_strided_slice %201 {offsets = [0, 384], sizes = [2, 128], strides = [1, 1]} : vector<2x512xf32> to vector<2x128xf32>
    %209 = math.tanh %208 : vector<2x128xf32>
    %210 = vector.extract_strided_slice %207 {offsets = [0, 0], sizes = [2, 128], strides = [1, 1]} : vector<2x384xf32> to vector<2x128xf32>
    %211 = vector.extract_strided_slice %207 {offsets = [0, 128], sizes = [2, 128], strides = [1, 1]} : vector<2x384xf32> to vector<2x128xf32>
    %212 = vector.extract_strided_slice %207 {offsets = [0, 256], sizes = [2, 128], strides = [1, 1]} : vector<2x384xf32> to vector<2x128xf32>
    %213 = arith.mulf %211, %196 : vector<2x128xf32>
    %214 = arith.mulf %210, %209 : vector<2x128xf32>
    %215 = arith.addf %213, %214 : vector<2x128xf32>
    %216 = math.tanh %215 : vector<2x128xf32>
    %217 = arith.mulf %212, %216 : vector<2x128xf32>
    %c4_73 = arith.constant 4 : index
    %c0_74 = arith.constant 0 : index
    %218 = vector.load %arg12[%c4_73, %c0_74] : memref<16x512xf32, #tpu.memory_space<vmem>>, vector<2x512xf32>
    %cst_75 = arith.constant dense<0.000000e+00> : vector<2x512xf32>
    %219 = tpu.matmul %217, %177, %cst_75 {dimension_numbers = #tpu.dot_dimension_numbers<[1], [0], [0], [1], [0, 0, 1, 1], [], []>} : vector<2x128xf32>, vector<128x512xf32>, vector<2x512xf32> -> vector<2x512xf32>
    %220 = arith.addf %218, %219 : vector<2x512xf32>
    %221 = vector.extract_strided_slice %220 {offsets = [0, 0], sizes = [2, 384], strides = [1, 1]} : vector<2x512xf32> to vector<2x384xf32>
    %222 = arith.negf %221 : vector<2x384xf32>
    %223 = math.exp %222 : vector<2x384xf32>
    %cst_76 = arith.constant 1.000000e+00 : f32
    %224 = vector.broadcast %cst_76 : f32 to vector<2x384xf32>
    %225 = arith.addf %224, %223 : vector<2x384xf32>
    %226 = arith.divf %224, %225 : vector<2x384xf32>
    %227 = vector.extract_strided_slice %220 {offsets = [0, 384], sizes = [2, 128], strides = [1, 1]} : vector<2x512xf32> to vector<2x128xf32>
    %228 = math.tanh %227 : vector<2x128xf32>
    %229 = vector.extract_strided_slice %226 {offsets = [0, 0], sizes = [2, 128], strides = [1, 1]} : vector<2x384xf32> to vector<2x128xf32>
    %230 = vector.extract_strided_slice %226 {offsets = [0, 128], sizes = [2, 128], strides = [1, 1]} : vector<2x384xf32> to vector<2x128xf32>
    %231 = vector.extract_strided_slice %226 {offsets = [0, 256], sizes = [2, 128], strides = [1, 1]} : vector<2x384xf32> to vector<2x128xf32>
    %232 = arith.mulf %230, %215 : vector<2x128xf32>
    %233 = arith.mulf %229, %228 : vector<2x128xf32>
    %234 = arith.addf %232, %233 : vector<2x128xf32>
    %235 = math.tanh %234 : vector<2x128xf32>
    %236 = arith.mulf %231, %235 : vector<2x128xf32>
    %c6_77 = arith.constant 6 : index
    %c0_78 = arith.constant 0 : index
    %237 = vector.load %arg12[%c6_77, %c0_78] : memref<16x512xf32, #tpu.memory_space<vmem>>, vector<2x512xf32>
    %cst_79 = arith.constant dense<0.000000e+00> : vector<2x512xf32>
    %238 = tpu.matmul %236, %177, %cst_79 {dimension_numbers = #tpu.dot_dimension_numbers<[1], [0], [0], [1], [0, 0, 1, 1], [], []>} : vector<2x128xf32>, vector<128x512xf32>, vector<2x512xf32> -> vector<2x512xf32>
    %239 = arith.addf %237, %238 : vector<2x512xf32>
    %240 = vector.extract_strided_slice %239 {offsets = [0, 0], sizes = [2, 384], strides = [1, 1]} : vector<2x512xf32> to vector<2x384xf32>
    %241 = arith.negf %240 : vector<2x384xf32>
    %242 = math.exp %241 : vector<2x384xf32>
    %cst_80 = arith.constant 1.000000e+00 : f32
    %243 = vector.broadcast %cst_80 : f32 to vector<2x384xf32>
    %244 = arith.addf %243, %242 : vector<2x384xf32>
    %245 = arith.divf %243, %244 : vector<2x384xf32>
    %246 = vector.extract_strided_slice %239 {offsets = [0, 384], sizes = [2, 128], strides = [1, 1]} : vector<2x512xf32> to vector<2x128xf32>
    %247 = math.tanh %246 : vector<2x128xf32>
    %248 = vector.extract_strided_slice %245 {offsets = [0, 0], sizes = [2, 128], strides = [1, 1]} : vector<2x384xf32> to vector<2x128xf32>
    %249 = vector.extract_strided_slice %245 {offsets = [0, 128], sizes = [2, 128], strides = [1, 1]} : vector<2x384xf32> to vector<2x128xf32>
    %250 = vector.extract_strided_slice %245 {offsets = [0, 256], sizes = [2, 128], strides = [1, 1]} : vector<2x384xf32> to vector<2x128xf32>
    %251 = arith.mulf %249, %234 : vector<2x128xf32>
    %252 = arith.mulf %248, %247 : vector<2x128xf32>
    %253 = arith.addf %251, %252 : vector<2x128xf32>
    %254 = math.tanh %253 : vector<2x128xf32>
    %255 = arith.mulf %250, %254 : vector<2x128xf32>
    %c8_81 = arith.constant 8 : index
    %c0_82 = arith.constant 0 : index
    %256 = vector.load %arg12[%c8_81, %c0_82] : memref<16x512xf32, #tpu.memory_space<vmem>>, vector<2x512xf32>
    %cst_83 = arith.constant dense<0.000000e+00> : vector<2x512xf32>
    %257 = tpu.matmul %255, %177, %cst_83 {dimension_numbers = #tpu.dot_dimension_numbers<[1], [0], [0], [1], [0, 0, 1, 1], [], []>} : vector<2x128xf32>, vector<128x512xf32>, vector<2x512xf32> -> vector<2x512xf32>
    %258 = arith.addf %256, %257 : vector<2x512xf32>
    %259 = vector.extract_strided_slice %258 {offsets = [0, 0], sizes = [2, 384], strides = [1, 1]} : vector<2x512xf32> to vector<2x384xf32>
    %260 = arith.negf %259 : vector<2x384xf32>
    %261 = math.exp %260 : vector<2x384xf32>
    %cst_84 = arith.constant 1.000000e+00 : f32
    %262 = vector.broadcast %cst_84 : f32 to vector<2x384xf32>
    %263 = arith.addf %262, %261 : vector<2x384xf32>
    %264 = arith.divf %262, %263 : vector<2x384xf32>
    %265 = vector.extract_strided_slice %258 {offsets = [0, 384], sizes = [2, 128], strides = [1, 1]} : vector<2x512xf32> to vector<2x128xf32>
    %266 = math.tanh %265 : vector<2x128xf32>
    %267 = vector.extract_strided_slice %264 {offsets = [0, 0], sizes = [2, 128], strides = [1, 1]} : vector<2x384xf32> to vector<2x128xf32>
    %268 = vector.extract_strided_slice %264 {offsets = [0, 128], sizes = [2, 128], strides = [1, 1]} : vector<2x384xf32> to vector<2x128xf32>
    %269 = vector.extract_strided_slice %264 {offsets = [0, 256], sizes = [2, 128], strides = [1, 1]} : vector<2x384xf32> to vector<2x128xf32>
    %270 = arith.mulf %268, %253 : vector<2x128xf32>
    %271 = arith.mulf %267, %266 : vector<2x128xf32>
    %272 = arith.addf %270, %271 : vector<2x128xf32>
    %273 = math.tanh %272 : vector<2x128xf32>
    %274 = arith.mulf %269, %273 : vector<2x128xf32>
    %c10_85 = arith.constant 10 : index
    %c0_86 = arith.constant 0 : index
    %275 = vector.load %arg12[%c10_85, %c0_86] : memref<16x512xf32, #tpu.memory_space<vmem>>, vector<2x512xf32>
    %cst_87 = arith.constant dense<0.000000e+00> : vector<2x512xf32>
    %276 = tpu.matmul %274, %177, %cst_87 {dimension_numbers = #tpu.dot_dimension_numbers<[1], [0], [0], [1], [0, 0, 1, 1], [], []>} : vector<2x128xf32>, vector<128x512xf32>, vector<2x512xf32> -> vector<2x512xf32>
    %277 = arith.addf %275, %276 : vector<2x512xf32>
    %278 = vector.extract_strided_slice %277 {offsets = [0, 0], sizes = [2, 384], strides = [1, 1]} : vector<2x512xf32> to vector<2x384xf32>
    %279 = arith.negf %278 : vector<2x384xf32>
    %280 = math.exp %279 : vector<2x384xf32>
    %cst_88 = arith.constant 1.000000e+00 : f32
    %281 = vector.broadcast %cst_88 : f32 to vector<2x384xf32>
    %282 = arith.addf %281, %280 : vector<2x384xf32>
    %283 = arith.divf %281, %282 : vector<2x384xf32>
    %284 = vector.extract_strided_slice %277 {offsets = [0, 384], sizes = [2, 128], strides = [1, 1]} : vector<2x512xf32> to vector<2x128xf32>
    %285 = math.tanh %284 : vector<2x128xf32>
    %286 = vector.extract_strided_slice %283 {offsets = [0, 0], sizes = [2, 128], strides = [1, 1]} : vector<2x384xf32> to vector<2x128xf32>
    %287 = vector.extract_strided_slice %283 {offsets = [0, 128], sizes = [2, 128], strides = [1, 1]} : vector<2x384xf32> to vector<2x128xf32>
    %288 = vector.extract_strided_slice %283 {offsets = [0, 256], sizes = [2, 128], strides = [1, 1]} : vector<2x384xf32> to vector<2x128xf32>
    %289 = arith.mulf %287, %272 : vector<2x128xf32>
    %290 = arith.mulf %286, %285 : vector<2x128xf32>
    %291 = arith.addf %289, %290 : vector<2x128xf32>
    %292 = math.tanh %291 : vector<2x128xf32>
    %293 = arith.mulf %288, %292 : vector<2x128xf32>
    %c12_89 = arith.constant 12 : index
    %c0_90 = arith.constant 0 : index
    %294 = vector.load %arg12[%c12_89, %c0_90] : memref<16x512xf32, #tpu.memory_space<vmem>>, vector<2x512xf32>
    %cst_91 = arith.constant dense<0.000000e+00> : vector<2x512xf32>
    %295 = tpu.matmul %293, %177, %cst_91 {dimension_numbers = #tpu.dot_dimension_numbers<[1], [0], [0], [1], [0, 0, 1, 1], [], []>} : vector<2x128xf32>, vector<128x512xf32>, vector<2x512xf32> -> vector<2x512xf32>
    %296 = arith.addf %294, %295 : vector<2x512xf32>
    %297 = vector.extract_strided_slice %296 {offsets = [0, 0], sizes = [2, 384], strides = [1, 1]} : vector<2x512xf32> to vector<2x384xf32>
    %298 = arith.negf %297 : vector<2x384xf32>
    %299 = math.exp %298 : vector<2x384xf32>
    %cst_92 = arith.constant 1.000000e+00 : f32
    %300 = vector.broadcast %cst_92 : f32 to vector<2x384xf32>
    %301 = arith.addf %300, %299 : vector<2x384xf32>
    %302 = arith.divf %300, %301 : vector<2x384xf32>
    %303 = vector.extract_strided_slice %296 {offsets = [0, 384], sizes = [2, 128], strides = [1, 1]} : vector<2x512xf32> to vector<2x128xf32>
    %304 = math.tanh %303 : vector<2x128xf32>
    %305 = vector.extract_strided_slice %302 {offsets = [0, 0], sizes = [2, 128], strides = [1, 1]} : vector<2x384xf32> to vector<2x128xf32>
    %306 = vector.extract_strided_slice %302 {offsets = [0, 128], sizes = [2, 128], strides = [1, 1]} : vector<2x384xf32> to vector<2x128xf32>
    %307 = vector.extract_strided_slice %302 {offsets = [0, 256], sizes = [2, 128], strides = [1, 1]} : vector<2x384xf32> to vector<2x128xf32>
    %308 = arith.mulf %306, %291 : vector<2x128xf32>
    %309 = arith.mulf %305, %304 : vector<2x128xf32>
    %310 = arith.addf %308, %309 : vector<2x128xf32>
    %311 = math.tanh %310 : vector<2x128xf32>
    %312 = arith.mulf %307, %311 : vector<2x128xf32>
    %c14_93 = arith.constant 14 : index
    %c0_94 = arith.constant 0 : index
    %313 = vector.load %arg12[%c14_93, %c0_94] : memref<16x512xf32, #tpu.memory_space<vmem>>, vector<2x512xf32>
    %cst_95 = arith.constant dense<0.000000e+00> : vector<2x512xf32>
    %314 = tpu.matmul %312, %177, %cst_95 {dimension_numbers = #tpu.dot_dimension_numbers<[1], [0], [0], [1], [0, 0, 1, 1], [], []>} : vector<2x128xf32>, vector<128x512xf32>, vector<2x512xf32> -> vector<2x512xf32>
    %315 = arith.addf %313, %314 : vector<2x512xf32>
    %316 = vector.extract_strided_slice %315 {offsets = [0, 0], sizes = [2, 384], strides = [1, 1]} : vector<2x512xf32> to vector<2x384xf32>
    %317 = arith.negf %316 : vector<2x384xf32>
    %318 = math.exp %317 : vector<2x384xf32>
    %cst_96 = arith.constant 1.000000e+00 : f32
    %319 = vector.broadcast %cst_96 : f32 to vector<2x384xf32>
    %320 = arith.addf %319, %318 : vector<2x384xf32>
    %321 = arith.divf %319, %320 : vector<2x384xf32>
    %322 = vector.extract_strided_slice %315 {offsets = [0, 384], sizes = [2, 128], strides = [1, 1]} : vector<2x512xf32> to vector<2x128xf32>
    %323 = math.tanh %322 : vector<2x128xf32>
    %324 = vector.extract_strided_slice %321 {offsets = [0, 0], sizes = [2, 128], strides = [1, 1]} : vector<2x384xf32> to vector<2x128xf32>
    %325 = vector.extract_strided_slice %321 {offsets = [0, 128], sizes = [2, 128], strides = [1, 1]} : vector<2x384xf32> to vector<2x128xf32>
    %326 = vector.extract_strided_slice %321 {offsets = [0, 256], sizes = [2, 128], strides = [1, 1]} : vector<2x384xf32> to vector<2x128xf32>
    %327 = arith.mulf %325, %310 : vector<2x128xf32>
    %328 = arith.mulf %324, %323 : vector<2x128xf32>
    %329 = arith.addf %327, %328 : vector<2x128xf32>
    %330 = math.tanh %329 : vector<2x128xf32>
    %331 = arith.mulf %326, %330 : vector<2x128xf32>
    %c0_97 = arith.constant 0 : index
    %c0_98 = arith.constant 0 : index
    %332 = vector.load %arg7[%c0_97, %c0_98] : memref<128x128xf32, #tpu.memory_space<vmem>>, vector<128x128xf32>
    %cst_99 = arith.constant dense<0.000000e+00> : vector<2x128xf32>
    %333 = tpu.matmul %331, %332, %cst_99 {dimension_numbers = #tpu.dot_dimension_numbers<[1], [0], [0], [1], [0, 0, 1, 1], [], []>} : vector<2x128xf32>, vector<128x128xf32>, vector<2x128xf32> -> vector<2x128xf32>
    %c0_100 = arith.constant 0 : index
    %c0_101 = arith.constant 0 : index
    %334 = vector.load %arg8[%c0_100, %c0_101] : memref<1x128xf32, #tpu.memory_space<vmem>>, vector<1x128xf32>
    %335 = vector.broadcast %334 : vector<1x128xf32> to vector<2x128xf32>
    %336 = arith.addf %333, %335 : vector<2x128xf32>
    %cst_102 = arith.constant 0.000000e+00 : f32
    %337 = vector.broadcast %cst_102 : f32 to vector<2x128xf32>
    %338 = arith.maximumf %336, %337 : vector<2x128xf32>
    %c0_103 = arith.constant 0 : index
    %c0_104 = arith.constant 0 : index
    %339 = vector.load %arg9[%c0_103, %c0_104] : memref<128x128xf32, #tpu.memory_space<vmem>>, vector<128x128xf32>
    %cst_105 = arith.constant dense<0.000000e+00> : vector<2x128xf32>
    %340 = tpu.matmul %338, %339, %cst_105 {dimension_numbers = #tpu.dot_dimension_numbers<[1], [0], [0], [1], [0, 0, 1, 1], [], []>} : vector<2x128xf32>, vector<128x128xf32>, vector<2x128xf32> -> vector<2x128xf32>
    %c0_106 = arith.constant 0 : index
    %c0_107 = arith.constant 0 : index
    %341 = vector.load %arg10[%c0_106, %c0_107] : memref<1x128xf32, #tpu.memory_space<vmem>>, vector<1x128xf32>
    %342 = vector.broadcast %341 : vector<1x128xf32> to vector<2x128xf32>
    %343 = arith.addf %340, %342 : vector<2x128xf32>
    %344 = vector.extract_strided_slice %343 {offsets = [0, 0], sizes = [2, 1], strides = [1, 1]} : vector<2x128xf32> to vector<2x1xf32>
    %345 = vector.shape_cast %343 : vector<2x128xf32> to vector<1x2x128xf32>
    %cst_108 = arith.constant dense<0.000000e+00> : vector<1xf32>
    %346 = vector.multi_reduction <add>, %345, %cst_108 [1, 2] : vector<1x2x128xf32> to vector<1xf32>
    %347 = vector.shape_cast %346 : vector<1xf32> to vector<1x1x1xf32>
    %348 = vector.extract %347[0, 0, 0] : f32 from vector<1x1x1xf32>
    %349 = vector.shape_cast %344 : vector<2x1xf32> to vector<1x2x1xf32>
    %cst_109 = arith.constant dense<0.000000e+00> : vector<1xf32>
    %350 = vector.multi_reduction <add>, %349, %cst_109 [1, 2] : vector<1x2x1xf32> to vector<1xf32>
    %351 = vector.shape_cast %350 : vector<1xf32> to vector<1x1x1xf32>
    %352 = vector.extract %351[0, 0, 0] : f32 from vector<1x1x1xf32>
    %353 = arith.subf %348, %352 : f32
    %cst_110 = arith.constant 8.000000e+00 : f32
    %354 = arith.divf %353, %cst_110 : f32
    %355 = vector.broadcast %344 : vector<2x1xf32> to vector<2x128xf32>
    %356 = arith.addf %343, %355 : vector<2x128xf32>
    %357 = vector.broadcast %354 : f32 to vector<2x128xf32>
    %358 = arith.subf %356, %357 : vector<2x128xf32>
    %c0_111 = arith.constant 0 : index
    %c0_112 = arith.constant 0 : index
    %359 = vector.load %arg11[%c0_111, %c0_112] : memref<2x128xf32, #tpu.memory_space<vmem>>, vector<2x128xf32>
    tpu.vector_store %arg11[%c0_111, %c0_112], %358 {strides = array<i32>} : memref<2x128xf32, #tpu.memory_space<vmem>>, vector<2x128xf32>,
    return
  }
}

</mosaic_0001>

<bundles_post_ra>
// kernel: lstm_dddqn_forward.1
= control target key start
LH: loop header
LB: loop body
LE: loop exit
PB: predicated region body
PF: predicated region fallthrough
CT: control target
= control target key end

     0   :  { %16 = vsyncpa [#allocation5], 0  ;;  %s6651_s0 = inlined_call_operand.vmem [shape: f32[16,16], index: 0, kind: input, shape index: {}]   ;;  %s6652_s1 = inlined_call_operand.hbm [shape: f32[16,512], index: 1, kind: input, shape index: {}]   ;;  %s6653_s2 = inlined_call_operand.hbm [shape: f32[128,512], index: 2, kind: input, shape index: {}]   ;;  %s6654_s3 = inlined_call_operand.vmem [shape: f32[1,512], index: 3, kind: input, shape index: {}]   ;;  %s6655_s4 = inlined_call_operand.hbm [shape: f32[128,512], index: 4, kind: input, shape index: {}]   ;;  %s6656_s5 = inlined_call_operand.hbm [shape: f32[128,512], index: 5, kind: input, shape index: {}]   ;;  %s6657_s6 = inlined_call_operand.vmem [shape: f32[1,512], index: 6, kind: input, shape index: {}]   ;;  %s6658_s7 = inlined_call_operand.hbm [shape: f32[128,128], index: 7, kind: input, shape index: {}]   ;;  %s6659_s8 = inlined_call_operand.vmem [shape: f32[1,128], index: 8, kind: input, shape index: {}]   ;;  %s6660_s9 = inlined_call_operand.hbm [shape: f32[128,128], index: 9, kind: input, shape index: {}]   ;;  %s6661_s10 = inlined_call_operand.vmem [shape: f32[1,128], index: 10, kind: input, shape index: {}]   ;;  %s6662_s11 = inlined_call_operand.vmem [shape: f32[2,128], index: 11, kind: output, shape index: {}]  }
   0x1   :  { %17 = vsyncpa [#allocation7], 0 }
   0x2   :  { %18 = vsyncpa [#allocation10], 0 }
   0x3   :  { %19 = vsyncpa [#allocation13], 0  ;;  %s5658_s17 = smov [#allocation6]   ;;  %s5659_s19 = smov [#allocation9]  }
   0x4   :  { %s39_s18 = sshll.u32 %s5658_s17, 4  ;;  %s65_s20 = sshll.u32 %s5659_s19, 4  ;;  %s40_s18 = int_to_ptr.vmem [resolvable:$true] %s39_s18  ;;  %s5732_s20 = int_to_ptr.vmem [resolvable:$true] %s65_s20 }
   0x5   :  { %s5518_s23 = scalar_lea.hbm %s6653_s2, 8192 }
   0x6   :  { %p5519_p0 = scmp.ne.s32.totalorder %s6653_s2, %s5518_s23  ;;  %p5522_p1 = scmp.lt.u32.totalorder %s5518_s23, %s6653_s2 }
   0x8   :  { %p5524_p2 = pnand %p5522_p1, %p5519_p0 }
   0xa   :  { %5527 = shalt.err (!%p5524_p2)
}
   0xb   :  { %s5528_s28 = scalar_lea.vmem %s40_s18, 8192  ;;  %p5533_p4 = scmp.lt.s32.totalorder %s40_s18, %s40_s18 }
   0xc   :  { %p5529_p3 = scmp.ne.s32.totalorder %s40_s18, %s5528_s28  ;;  %p5534_p5 = scmp.lt.s32.totalorder %s5528_s28, %s5528_s28 }
   0xe   :  { %p5535_p6 = por %p5534_p5, %p5533_p4 }
  0x10   :  { %p5536_p7 = pnand %p5535_p6, %p5529_p3 }
  0x12   :  { %5539 = shalt.err (!%p5536_p7)
}
  0x13   :  { %s5660_s29 = smov 512   ;;  %s5661_s30 = smov 32  }
  0x14   :  { %45 = dma.hbm_to_vmem [thread:$0]  %s6653_s2, 8192, %s40_s18, [#allocation7], %s5660_s29, %s5660_s29, %s5661_s30  }
  0x15   :  { %s5540_s16 = scalar_lea.hbm %s6656_s5, 8192 }
  0x16   :  { %p5541_p8 = scmp.ne.s32.totalorder %s6656_s5, %s5540_s16  ;;  %p5544_p9 = scmp.lt.u32.totalorder %s5540_s16, %s6656_s5 }
  0x18   :  { %p5546_p10 = pnand %p5544_p9, %p5541_p8 }
  0x1a   :  { %5549 = shalt.err (!%p5546_p10)
}
  0x1b   :  { %s5550_s23 = scalar_lea.vmem %s5732_s20, 8192  ;;  %p5555_p12 = scmp.lt.s32.totalorder %s5732_s20, %s5732_s20 }
  0x1c   :  { %p5551_p11 = scmp.ne.s32.totalorder %s5732_s20, %s5550_s23  ;;  %p5556_p13 = scmp.lt.s32.totalorder %s5550_s23, %s5550_s23 }
  0x1e   :  { %p5557_p0 = por %p5556_p13, %p5555_p12 }
  0x20   :  { %p5558_p1 = pnand %p5557_p0, %p5551_p11 }
  0x22   :  { %5561 = shalt.err (!%p5558_p1)
}
  0x23   :  { %71 = dma.hbm_to_vmem [thread:$0]  %s6656_s5, 8192, %s5732_s20, [#allocation10], %s5660_s29, %s5660_s29, %s5661_s30  }
  0x24   :  { %s5662_s24 = smov [#allocation4]   ;;  %s5663_s26 = smov [#allocation8]  }
  0x25   :  { %s27_s25 = sshll.u32 %s5662_s24, 4  ;;  %s53_s27 = sshll.u32 %s5663_s26, 4  ;;  %s28_s25 = int_to_ptr.vmem [resolvable:$true] %s27_s25  ;;  %s5769_s27 = int_to_ptr.vmem [resolvable:$true] %s53_s27 }
  0x26   :  { %s5562_s13 = scalar_lea.hbm %s6652_s1, 1024 }
  0x27   :  { %p5563_p2 = scmp.ne.s32.totalorder %s6652_s1, %s5562_s13  ;;  %p5566_p3 = scmp.lt.u32.totalorder %s5562_s13, %s6652_s1 }
  0x29   :  { %p5568_p4 = pnand %p5566_p3, %p5563_p2 }
  0x2b   :  { %5571 = shalt.err (!%p5568_p4)
}
  0x2c   :  { %s5572_s5 = scalar_lea.vmem %s28_s25, 1024  ;;  %p5577_p6 = scmp.lt.s32.totalorder %s28_s25, %s28_s25 }
  0x2d   :  { %p5573_p5 = scmp.ne.s32.totalorder %s28_s25, %s5572_s5  ;;  %p5578_p7 = scmp.lt.s32.totalorder %s5572_s5, %s5572_s5 }
  0x2f   :  { %p5579_p8 = por %p5578_p7, %p5577_p6 }
  0x31   :  { %p5580_p9 = pnand %p5579_p8, %p5573_p5 }
  0x33   :  { %5583 = shalt.err (!%p5580_p9)
}
  0x34   :  { %33 = dma.hbm_to_vmem [thread:$0]  %s6652_s1, 1024, %s28_s25, [#allocation5], %s5660_s29, %s5660_s29, %s5661_s30  }
  0x35   :  { %s5584_s23 = scalar_lea.hbm %s6655_s4, 8192 }
  0x36   :  { %p5585_p10 = scmp.ne.s32.totalorder %s6655_s4, %s5584_s23  ;;  %p5588_p11 = scmp.lt.u32.totalorder %s5584_s23, %s6655_s4 }
  0x38   :  { %p5590_p12 = pnand %p5588_p11, %p5585_p10 }
  0x3a   :  { %5593 = shalt.err (!%p5590_p12)
}
  0x3b   :  { %s5594_s28 = scalar_lea.vmem %s5769_s27, 8192  ;;  %p5599_p0 = scmp.lt.s32.totalorder %s5769_s27, %s5769_s27 }
  0x3c   :  { %p5595_p13 = scmp.ne.s32.totalorder %s5769_s27, %s5594_s28  ;;  %p5600_p1 = scmp.lt.s32.totalorder %s5594_s28, %s5594_s28 }
  0x3e   :  { %p5601_p2 = por %p5600_p1, %p5599_p0 }
  0x40   :  { %p5602_p3 = pnand %p5601_p2, %p5595_p13 }
  0x42   :  { %5605 = shalt.err (!%p5602_p3)
}
  0x43   :  { %59 = dma.hbm_to_vmem [thread:$0]  %s6655_s4, 8192, %s5769_s27, [#allocation7], %s5660_s29, %s5660_s29, %s5661_s30  }
  0x44   :  { %s5664_s12 = smov [#allocation11]   ;;  %s5606_s16 = scalar_lea.hbm %s6658_s7, 2048 }
  0x45   :  { %s79_s13 = sshll.u32 %s5664_s12, 4  ;;  %p5607_p4 = scmp.ne.s32.totalorder %s6658_s7, %s5606_s16  ;;  %s80_s13 = int_to_ptr.vmem [resolvable:$true] %s79_s13 }
  0x46   :  { %p5610_p5 = scmp.lt.u32.totalorder %s5606_s16, %s6658_s7 }
  0x48   :  { %p5612_p6 = pnand %p5610_p5, %p5607_p4 }
  0x4a   :  { %5615 = shalt.err (!%p5612_p6)
}
  0x4b   :  { %s5616_s21 = scalar_lea.vmem %s80_s13, 2048  ;;  %p5621_p8 = scmp.lt.s32.totalorder %s80_s13, %s80_s13 }
  0x4c   :  { %p5617_p7 = scmp.ne.s32.totalorder %s80_s13, %s5616_s21  ;;  %p5622_p9 = scmp.lt.s32.totalorder %s5616_s21, %s5616_s21 }
  0x4e   :  { %p5623_p10 = por %p5622_p9, %p5621_p8 }
  0x50   :  { %p5624_p11 = pnand %p5623_p10, %p5617_p7 }
  0x52   :  { %5627 = shalt.err (!%p5624_p11)
}
  0x53   :  { %s5665_s4 = smov 128   ;;  %s5666_s29 = smov 8  }
  0x54   :  { %85 = dma.hbm_to_vmem [thread:$0]  %s6658_s7, 2048, %s80_s13, [#allocation10], %s5665_s4, %s5665_s4, %s5666_s29  }
  0x55   :  { %s5667_s22 = smov [#allocation12]   ;;  %s5628_s24 = scalar_lea.hbm %s6660_s9, 2048 }
  0x56   :  { %s93_s23 = sshll.u32 %s5667_s22, 4  ;;  %p5629_p12 = scmp.ne.s32.totalorder %s6660_s9, %s5628_s24  ;;  %s94_s23 = int_to_ptr.vmem [resolvable:$true] %s93_s23 }
  0x57   :  { %p5632_p13 = scmp.lt.u32.totalorder %s5628_s24, %s6660_s9 }
  0x59   :  { %p5634_p0 = pnand %p5632_p13, %p5629_p12 }
  0x5b   :  { %5637 = shalt.err (!%p5634_p0)
}
  0x5c   :  { %s5638_s12 = scalar_lea.vmem %s94_s23, 2048  ;;  %p5643_p2 = scmp.lt.s32.totalorder %s94_s23, %s94_s23 }
  0x5d   :  { %p5639_p1 = scmp.ne.s32.totalorder %s94_s23, %s5638_s12  ;;  %p5644_p3 = scmp.lt.s32.totalorder %s5638_s12, %s5638_s12 }
  0x5f   :  { %p5645_p4 = por %p5644_p3, %p5643_p2 }
  0x61   :  { %p5646_p5 = pnand %p5645_p4, %p5639_p1 }
  0x63   :  { %5649 = shalt.err (!%p5646_p5)
}
  0x64   :  { %99 = dma.hbm_to_vmem [thread:$0]  %s6660_s9, 2048, %s94_s23, [#allocation13], %s5665_s4, %s5665_s4, %s5666_s29  }
  0x65   :  { %5650 = dma.done.wait [#allocation5], 1024  }
  0x66   :  { %5651 = vsyncadd [#allocation5], 4294966272 }
  0x67   :  { %5652 = dma.done.wait [#allocation7], 16384  }
  0x68   :  { %5653 = vsyncadd [#allocation7], 4294950912 }
  0x69   :  { %5654 = dma.done.wait [#allocation10], 10240  }
  0x6a   :  { %5655 = vsyncadd [#allocation10], 4294957056 }
  0x6b   :  { %5656 = dma.done.wait [#allocation13], 2048  }
  0x6c   :  { %5657 = vsyncadd [#allocation13], 4294965248  ;;  %v5668_v0 = vmov 0.0   ;;  %v123_v1 = vld [vmem:[#allocation4 + $0x8] sm:$0xff]  ;;  %v125_v3 = vld [vmem:[#allocation4 + $0x18] sm:$0xff]  ;;  %vm152_vm0 = vcmask 130048  }
  0x6d   :  { %223 = vmatprep.mubr.f32.mxu0 %v5668_v0  ;;  %300 = vmatprep.mubr.f32.mxu1 %v5668_v0  ;;  %v127_v2 = vld [vmem:[#allocation4 + $0x28] sm:$0xff]  ;;  %v129_v5 = vld [vmem:[#allocation4 + $0x38] sm:$0xff]  ;;  %v122_v6 = vld [vmem:[#allocation4] sm:$0xff]  ;;  %vm5670_vm1 = vmmov 0   ;;  %vm3897_vm2 = vcmask 1041408   ;;  %vm3908_vm3 = vcmask 1024  }
  0x6e   :  { %v4098_v4 = vpack.c.bf16 %v127_v2, %v123_v1  ;;  %v126_v7 = vld [vmem:[#allocation4 + $0x20] sm:$0xff]  ;;  %v4102_v8 = vpack.c.bf16 %v129_v5, %v125_v3  ;;  %v124_v10 = vld [vmem:[#allocation4 + $0x10] sm:$0xff]  ;;  %v322_v14 = vld [vmem:[#allocation6 + $0x8] sm:$0xff] }
  0x6f   :  { %v4100_v9 = vpack.c.bf16 %v126_v7, %v122_v6  ;;  %v128_v11 = vld [vmem:[#allocation4 + $0x30] sm:$0xff]  ;;  %v326_v15 = vld [vmem:[#allocation6 + $0x28] sm:$0xff]  ;;  %v324_v16 = vld [vmem:[#allocation6 + $0x18] sm:$0xff] }
  0x70   :  { %v120_v12 = vld [vmem:[%s6651_s0] sm:$0xff]  ;;  %4099 = vmatprep.subr.bf16.mxu0 %v4098_v4  ;;  %v4104_v13 = vpack.c.bf16 %v128_v11, %v124_v10  ;;  %4103 = vmatprep.subr.bf16.mxu1 %v4102_v8  ;;  %v5835_v17 = vpack.c.bf16 %v326_v15, %v322_v14  ;;  %v328_v18 = vld [vmem:[#allocation6 + $0x38] sm:$0xff]  ;;  %v321_v19 = vld [vmem:[#allocation6] sm:$0xff] }
  0x71   :  { %4101 = vmatpush1.bf16.msra.mxu0 %v4100_v9  ;;  %v325_v20 = vld [vmem:[#allocation6 + $0x20] sm:$0xff]  ;;  %v5837_v21 = vpack.c.bf16 %v328_v18, %v324_v16  ;;  %v323_v23 = vld [vmem:[#allocation6 + $0x10] sm:$0xff]  ;;  %v330_v25 = vld [vmem:[#allocation6 + $0x48] sm:$0xff] }
  0x72   :  { %4105 = vmatpush1.bf16.msra.mxu1 %v4104_v13  ;;  %v5839_v22 = vpack.c.bf16 %v325_v20, %v321_v19  ;;  %v327_v24 = vld [vmem:[#allocation6 + $0x30] sm:$0xff]  ;;  %4107 = vmatprep.subr.bf16.mxu0 %v5835_v17  ;;  %v334_v27 = vld [vmem:[#allocation6 + $0x68] sm:$0xff]  ;;  %v332_v28 = vld [vmem:[#allocation6 + $0x58] sm:$0xff] }
  0x73   :  { %v5842_v26 = vpack.c.bf16 %v327_v24, %v323_v23  ;;  %v336_v29 = vld [vmem:[#allocation6 + $0x78] sm:$0xff]  ;;  %4139 = vmatprep.subr.bf16.mxu1 %v5837_v21  ;;  %v5846_v30 = vpack.c.bf16 %v334_v27, %v330_v25  ;;  %v329_v32 = vld [vmem:[#allocation6 + $0x40] sm:$0xff]  ;;  %v331_v34 = vld [vmem:[#allocation6 + $0x50] sm:$0xff] }
  0x74   :  { %3940 = vmatmul.mubr.msk.f32.vlgmr.msra.gmra.mrb[0].mxu0 %vm152_vm0, %v120_v12  ;;  %v5848_v31 = vpack.c.bf16 %v336_v29, %v332_v28  ;;  %v333_v33 = vld [vmem:[#allocation6 + $0x60] sm:$0xff]  ;;  %v335_v36 = vld [vmem:[#allocation6 + $0x70] sm:$0xff]  ;;  %v338_v37 = vld [vmem:[#allocation6 + $0x88] sm:$0xff] }
  0x75   :  { %3942 = vmatmul.mubr.msk.f32.vlgmr.msra.gmra.mrb[0].mxu1 %vm152_vm0, %v120_v12  ;;  %4109 = vmatpush1.bf16.msra.mxu0 %v5839_v22  ;;  %v5852_v35 = vpack.c.bf16 %v333_v33, %v329_v32  ;;  %v342_v38 = vld [vmem:[#allocation6 + $0xa8] sm:$0xff]  ;;  %v5856_v39 = vpack.c.bf16 %v335_v36, %v331_v34  ;;  %v340_v41 = vld [vmem:[#allocation6 + $0x98] sm:$0xff]  ;;  %v337_v43 = vld [vmem:[#allocation6 + $0x80] sm:$0xff] }
  0x76   :  { %4141 = vmatpush1.bf16.msra.mxu1 %v5842_v26  ;;  %4111 = vmatprep.subr.bf16.mxu0 %v5846_v30  ;;  %v5858_v40 = vpack.c.bf16 %v342_v38, %v338_v37  ;;  %v344_v42 = vld [vmem:[#allocation6 + $0xb8] sm:$0xff]  ;;  %v341_v45 = vld [vmem:[#allocation6 + $0xa0] sm:$0xff]  ;;  %v339_v46 = vld [vmem:[#allocation6 + $0x90] sm:$0xff] }
  0x77   :  { %4143 = vmatprep.subr.bf16.mxu1 %v5848_v31  ;;  %v5861_v44 = vpack.c.bf16 %v344_v42, %v340_v41  ;;  %v343_v47 = vld [vmem:[#allocation6 + $0xb0] sm:$0xff]  ;;  %229 = vmatprep.mubr.f32.mxu0 %v5668_v0  ;;  %v346_v48 = vld [vmem:[#allocation6 + $0xc8] sm:$0xff]  ;;  %v348_v50 = vld [vmem:[#allocation6 + $0xd8] sm:$0xff]  ;;  %v5866_v51 = vpack.c.bf16 %v341_v45, %v337_v43 }
  0x78   :  { %v350_v49 = vld [vmem:[#allocation6 + $0xe8] sm:$0xff]  ;;  %306 = vmatprep.mubr.f32.mxu1 %v5668_v0  ;;  %v352_v52 = vld [vmem:[#allocation6 + $0xf8] sm:$0xff]  ;;  %v5870_v53 = vpack.c.bf16 %v343_v47, %v339_v46  ;;  %v345_v55 = vld [vmem:[#allocation6 + $0xc0] sm:$0xff] }
  0x79   :  { %4113 = vmatpush1.bf16.msra.mxu0 %v5852_v35  ;;  %v5872_v54 = vpack.c.bf16 %v350_v49, %v346_v48  ;;  %v349_v56 = vld [vmem:[#allocation6 + $0xe0] sm:$0xff]  ;;  %v347_v57 = vld [vmem:[#allocation6 + $0xd0] sm:$0xff]  ;;  %v5875_v58 = vpack.c.bf16 %v352_v52, %v348_v50  ;;  %v354_v60 = vld [vmem:[#allocation6 + $0x108] sm:$0xff] }
  0x7a   :  { %4145 = vmatpush1.bf16.msra.mxu1 %v5856_v39  ;;  %4115 = vmatprep.subr.bf16.mxu0 %v5858_v40  ;;  %v351_v59 = vld [vmem:[#allocation6 + $0xf0] sm:$0xff]  ;;  %v358_v61 = vld [vmem:[#allocation6 + $0x128] sm:$0xff]  ;;  %v356_v62 = vld [vmem:[#allocation6 + $0x118] sm:$0xff]  ;;  %v5878_v1 = vpack.c.bf16 %v349_v56, %v345_v55 }
  0x7b   :  { %4147 = vmatprep.subr.bf16.mxu1 %v5861_v44  ;;  %v360_v63 = vld [vmem:[#allocation6 + $0x138] sm:$0xff]  ;;  %v5882_v2 = vpack.c.bf16 %v351_v59, %v347_v57  ;;  %v5884_v3 = vpack.c.bf16 %v358_v61, %v354_v60  ;;  %v353_v4 = vld [vmem:[#allocation6 + $0x100] sm:$0xff]  ;;  %v355_v6 = vld [vmem:[#allocation6 + $0x110] sm:$0xff] }
  0x7c   :  { %v357_v5 = vld [vmem:[#allocation6 + $0x120] sm:$0xff]  ;;  %v5887_v7 = vpack.c.bf16 %v360_v63, %v356_v62  ;;  %v359_v8 = vld [vmem:[#allocation6 + $0x130] sm:$0xff]  ;;  %v362_v9 = vld [vmem:[#allocation6 + $0x148] sm:$0xff]  ;;  %v132_v62 = vlaneseq }
  0x7d   :  { %4117 = vmatpush1.bf16.msra.mxu0 %v5866_v51  ;;  %v366_v10 = vld [vmem:[#allocation6 + $0x168] sm:$0xff]  ;;  %v364_v11 = vld [vmem:[#allocation6 + $0x158] sm:$0xff]  ;;  %v5890_v13 = vpack.c.bf16 %v357_v5, %v353_v4  ;;  %v361_v14 = vld [vmem:[#allocation6 + $0x140] sm:$0xff]  ;;  %v5894_v15 = vpack.c.bf16 %v359_v8, %v355_v6 }
  0x7e   :  { %4149 = vmatpush1.bf16.msra.mxu1 %v5870_v53  ;;  %4119 = vmatprep.subr.bf16.mxu0 %v5872_v54  ;;  %v368_v12 = vld [vmem:[#allocation6 + $0x178] sm:$0xff]  ;;  %v5896_v16 = vpack.c.bf16 %v366_v10, %v362_v9  ;;  %v365_v18 = vld [vmem:[#allocation6 + $0x160] sm:$0xff]  ;;  %v363_v19 = vld [vmem:[#allocation6 + $0x150] sm:$0xff]  ;;  %v5980_v63 = vshrl.u32 %v132_v62, 7 }
  0x7f   :  { %4151 = vmatprep.subr.bf16.mxu1 %v5875_v58  ;;  %v121_v20 = vld [vmem:[%s6651_s0 + $0x8] sm:$0xff]  ;;  %v5902_v23 = vpack.c.bf16 %v368_v12, %v364_v11  ;;  %v367_v24 = vld [vmem:[#allocation6 + $0x170] sm:$0xff]  ;;  %v370_v25 = vld [vmem:[#allocation6 + $0x188] sm:$0xff]  ;;  %v5908_v32 = vpack.c.bf16 %v365_v18, %v361_v14 }
  0x80   :  { %v374_v27 = vld [vmem:[#allocation6 + $0x1a8] sm:$0xff]  ;;  %3941 = vmatmul.mubr.msk.f32.gmra.mrb[2].mxu0 %vm152_vm0, %v121_v20  ;;  %v372_v28 = vld [vmem:[#allocation6 + $0x198] sm:$0xff]  ;;  %3943 = vmatmul.mubr.msk.f32.gmra.mrb[2].mxu1 %vm152_vm0, %v121_v20  ;;  %v5913_v33 = vpack.c.bf16 %v367_v24, %v363_v19  ;;  %v369_v36 = vld [vmem:[#allocation6 + $0x180] sm:$0xff]  ;;  %v134_v4 = vsub.s32 0, %v5980_v63  ;;  %v138_v6 = vsub.s32 1, %v5980_v63  ;;  %v142_v8 = vsub.s32 2, %v5980_v63 }
  0x81   :  { %4121 = vmatpush1.bf16.msra.mxu0 %v5878_v1  ;;  %v376_v29 = vld [vmem:[#allocation6 + $0x1b8] sm:$0xff]  ;;  %453 = vmatprep.mubr.f32.mxu0 %v5668_v0  ;;  %v5915_v34 = vpack.c.bf16 %v374_v27, %v370_v25  ;;  %v373_v37 = vld [vmem:[#allocation6 + $0x1a0] sm:$0xff]  ;;  %v371_v38 = vld [vmem:[#allocation6 + $0x190] sm:$0xff]  ;;  %v146_v9 = vsub.s32 3, %v5980_v63 }
  0x82   :  { %4153 = vmatpush1.bf16.msra.mxu1 %v5882_v2  ;;  %4123 = vmatprep.subr.bf16.mxu0 %v5884_v3  ;;  %v5918_v41 = vpack.c.bf16 %v376_v29, %v372_v28  ;;  %v375_v42 = vld [vmem:[#allocation6 + $0x1b0] sm:$0xff]  ;;  %v378_v43 = vld [vmem:[#allocation6 + $0x1c8] sm:$0xff]  ;;  %v380_v46 = vld [vmem:[#allocation6 + $0x1d8] sm:$0xff]  ;;  %v5921_v48 = vpack.c.bf16 %v373_v37, %v369_v36 }
  0x83   :  { %4155 = vmatprep.subr.bf16.mxu1 %v5887_v7  ;;  %524 = vmatprep.mubr.f32.mxu1 %v5668_v0  ;;  %v382_v45 = vld [vmem:[#allocation6 + $0x1e8] sm:$0xff]  ;;  %v384_v47 = vld [vmem:[#allocation6 + $0x1f8] sm:$0xff]  ;;  %v5925_v49 = vpack.c.bf16 %v375_v42, %v371_v38  ;;  %v377_v52 = vld [vmem:[#allocation6 + $0x1c0] sm:$0xff] }
  0x84   :  { %v5927_v50 = vpack.c.bf16 %v382_v45, %v378_v43  ;;  %v381_v55 = vld [vmem:[#allocation6 + $0x1e0] sm:$0xff]  ;;  %v5930_v56 = vpack.c.bf16 %v384_v47, %v380_v46  ;;  %v379_v57 = vld [vmem:[#allocation6 + $0x1d0] sm:$0xff] }
  0x85   :  { %4125 = vmatpush1.bf16.msra.mxu0 %v5890_v13  ;;  %v383_v59 = vld [vmem:[#allocation6 + $0x1f0] sm:$0xff]  ;;  %v5933_v60 = vpack.c.bf16 %v381_v55, %v377_v52 }
  0x86   :  { %4157 = vmatpush1.bf16.msra.mxu1 %v5894_v15  ;;  %4127 = vmatprep.subr.bf16.mxu0 %v5896_v16  ;;  %v5937_v61 = vpack.c.bf16 %v383_v59, %v379_v57  ;;  %v130_v5 = vld [vmem:[%s6654_s3] sm:$0xf] }
  0x87   :  { %4159 = vmatprep.subr.bf16.mxu1 %v5902_v23  ;;  %v135_v10 = vrot.slane %v130_v5, %v134_v4  ;;  %v139_v11 = vrot.slane %v130_v5, %v138_v6  ;;  %v143_v12 = vrot.slane %v130_v5, %v142_v8  ;;  %v147_v14 = vrot.slane %v130_v5, %v146_v9 }
  0x89   :  { %4129 = vmatpush1.bf16.msra.mxu0 %v5908_v32 }
  0x8a   :  { %4161 = vmatpush1.bf16.msra.mxu1 %v5913_v33  ;;  %4131 = vmatprep.subr.bf16.mxu0 %v5915_v34 }
  0x8b   :  { %4163 = vmatprep.subr.bf16.mxu1 %v5918_v41 }
  0x8d   :  { %4133 = vmatpush1.bf16.msra.mxu0 %v5921_v48 }
  0x8e   :  { %4165 = vmatpush1.bf16.msra.mxu1 %v5925_v49  ;;  %4135 = vmatprep.subr.bf16.mxu0 %v5927_v50 }
  0x8f   :  { %4167 = vmatprep.subr.bf16.mxu1 %v5930_v56 }
  0x91   :  { %4137 = vmatpush1.bf16.msra.mxu0 %v5933_v60 }
  0x92   :  { %4169 = vmatpush1.bf16.msra.mxu1 %v5937_v61  ;;  %4171 = vmatprep.subr.bf16.mxu0 %v5835_v17 }
  0x93   :  { %4203 = vmatprep.subr.bf16.mxu1 %v5837_v21 }
  0x94   :  { %454 = vmatmul.mubr.f32.vlgmr.msra.gmra.mrb[4].mxu0 %v5668_v0 }
  0x95   :  { %525 = vmatmul.mubr.f32.vlgmr.msra.gmra.mrb[4].mxu1 %v5668_v0  ;;  %4173 = vmatpush1.bf16.msra.mxu0 %v5839_v22 }
  0x96   :  { %4205 = vmatpush1.bf16.msra.mxu1 %v5842_v26  ;;  %4175 = vmatprep.subr.bf16.mxu0 %v5846_v30 }
  0x97   :  { %4207 = vmatprep.subr.bf16.mxu1 %v5848_v31  ;;  %628 = vmatprep.mubr.f32.mxu0 %v5668_v0 }
  0x98   :  { %699 = vmatprep.mubr.f32.mxu1 %v5668_v0 }
  0x99   :  { %4177 = vmatpush1.bf16.msra.mxu0 %v5852_v35 }
  0x9a   :  { %4209 = vmatpush1.bf16.msra.mxu1 %v5856_v39  ;;  %4179 = vmatprep.subr.bf16.mxu0 %v5858_v40 }
  0x9b   :  { %4211 = vmatprep.subr.bf16.mxu1 %v5861_v44 }
  0x9d   :  { %4181 = vmatpush1.bf16.msra.mxu0 %v5866_v51 }
  0x9e   :  { %4213 = vmatpush1.bf16.msra.mxu1 %v5870_v53  ;;  %4183 = vmatprep.subr.bf16.mxu0 %v5872_v54 }
  0x9f   :  { %4215 = vmatprep.subr.bf16.mxu1 %v5875_v58 }
  0xa1   :  { %4185 = vmatpush1.bf16.msra.mxu0 %v5878_v1 }
  0xa2   :  { %4217 = vmatpush1.bf16.msra.mxu1 %v5882_v2  ;;  %4187 = vmatprep.subr.bf16.mxu0 %v5884_v3 }
  0xa3   :  { %4219 = vmatprep.subr.bf16.mxu1 %v5887_v7 }
  0xa5   :  { %4189 = vmatpush1.bf16.msra.mxu0 %v5890_v13 }
  0xa6   :  { %4221 = vmatpush1.bf16.msra.mxu1 %v5894_v15  ;;  %4191 = vmatprep.subr.bf16.mxu0 %v5896_v16 }
  0xa7   :  { %4223 = vmatprep.subr.bf16.mxu1 %v5902_v23 }
  0xa9   :  { %4193 = vmatpush1.bf16.msra.mxu0 %v5908_v32 }
  0xaa   :  { %4225 = vmatpush1.bf16.msra.mxu1 %v5913_v33  ;;  %4195 = vmatprep.subr.bf16.mxu0 %v5915_v34 }
  0xab   :  { %4227 = vmatprep.subr.bf16.mxu1 %v5918_v41 }
  0xad   :  { %4197 = vmatpush1.bf16.msra.mxu0 %v5921_v48 }
  0xae   :  { %4229 = vmatpush1.bf16.msra.mxu1 %v5925_v49  ;;  %4199 = vmatprep.subr.bf16.mxu0 %v5927_v50 }
  0xaf   :  { %4231 = vmatprep.subr.bf16.mxu1 %v5930_v56 }
  0xb1   :  { %4201 = vmatpush1.bf16.msra.mxu0 %v5933_v60 }
  0xb2   :  { %4233 = vmatpush1.bf16.msra.mxu1 %v5937_v61  ;;  %4235 = vmatprep.subr.bf16.mxu0 %v5835_v17 }
  0xb3   :  { %4267 = vmatprep.subr.bf16.mxu1 %v5837_v21 }
 0x147   :  { %v225_v18 = vpop.f32.mrb[0].mxu0 }
 0x148   :  { %v226_v19 = vadd.f32 %v225_v18, %v135_v10  ;;  %v227_v20 = vpop.f32.mrb[1].mxu0  ;;  %v302_v24 = vpop.f32.mrb[0].mxu1 }
 0x149   :  { %v228_v25 = vadd.f32 %v227_v20, %v139_v11  ;;  %v303_v27 = vadd.f32 %v302_v24, %v143_v12  ;;  %v304_v28 = vpop.f32.mrb[1].mxu1 }
 0x14a   :  { %313 = vst [vmem:[#allocation2] sm:$0xff] %v226_v19  ;;  %v305_v29 = vadd.f32 %v304_v28, %v147_v14 }
 0x14b   :  { %314 = vst [vmem:[#allocation2 + $0x8] sm:$0xff] %v228_v25  ;;  %315 = vst [vmem:[#allocation2 + $0x10] sm:$0xff] %v303_v27 }
 0x14c   :  { %316 = vst [vmem:[#allocation2 + $0x18] sm:$0xff] %v305_v29 }
 0x151   :  { %v385_v52 = vld [vmem:[#allocation2] sm:$0x3] }
 0x152   :  { %v386_v62 = vld [vmem:[#allocation2 + $0x8] sm:$0x3]  ;;  %v387_v24 = vld [vmem:[#allocation2 + $0x10] sm:$0x3] }
 0x153   :  { %v231_v36 = vpop.f32.mrb[2].mxu0  ;;  %v308_v42 = vpop.f32.mrb[2].mxu1  ;;  %v388_v25 = vld [vmem:[#allocation2 + $0x18] sm:$0x3] }
 0x154   :  { %v232_v37 = vadd.f32 %v231_v36, %v135_v10  ;;  %v233_v38 = vpop.f32.mrb[3].mxu0  ;;  %v309_v45 = vadd.f32 %v308_v42, %v143_v12  ;;  %v310_v46 = vpop.f32.mrb[3].mxu1 }
 0x155   :  { %v234_v43 = vadd.f32 %v233_v38, %v139_v11  ;;  %v311_v47 = vadd.f32 %v310_v46, %v147_v14 }
 0x156   :  { %317 = vst [vmem:[#allocation2 + $0x20] sm:$0xff] %v232_v37  ;;  %319 = vst [vmem:[#allocation2 + $0x30] sm:$0xff] %v309_v45 }
 0x157   :  { %318 = vst [vmem:[#allocation2 + $0x28] sm:$0xff] %v234_v43  ;;  %320 = vst [vmem:[#allocation2 + $0x38] sm:$0xff] %v311_v47 }
 0x167   :  { %v455_v55 = vpop.f32.mrb[4].mxu0 }
 0x168   :  { %v531_v57 = vadd.f32 %v455_v55, %v385_v52  ;;  %v526_v59 = vpop.f32.mrb[4].mxu1  ;;  %v457_v5 = vpop.f32.mrb[5].mxu0 }
 0x169   :  { %v532_v18 = vadd.f32 %v457_v5, %v386_v62  ;;  %v528_v19 = vpop.f32.mrb[5].mxu1  ;;  %v533_v11 = vadd.f32 %v526_v59, %v387_v24 }
 0x16a   :  { %v3944_v20 = vmul.f32 -1.442695, %v531_v57  ;;  %v534_v14 = vadd.f32 %v528_v19, %v388_v25 }
 0x16b   :  { %v3945_v10 = vmul.f32 -1.442695, %v532_v18  ;;  %v3946_v12 = vmul.f32 -1.442695, %v533_v11 }
 0x16c   :  { %5262 = vpow2.f32 %v3944_v20 }
 0x16d   :  { %5264 = vpow2.f32 %v3945_v10  ;;  %v560_v10 = vld [vmem:[#allocation2] sm:$0xc] }
 0x16e   :  { %5266 = vpow2.f32 %v3946_v12  ;;  %v561_v12 = vld [vmem:[#allocation2 + $0x8] sm:$0xc] }
 0x16f   :  { %5268 = vtanh.f32 %v534_v14 }
 0x176   :  { %v5263_v27 = vpop.eup %5262 }
 0x177   :  { %v544_v28 = vadd.f32 1.0, %v5263_v27  ;;  %v5265_v29 = vpop.eup %5264 }
 0x178   :  { %v545_v36 = vadd.f32 1.0, %v5265_v29  ;;  %v5267_v37 = vpop.eup %5266  ;;  %v562_v29 = vld [vmem:[#allocation2 + $0x10] sm:$0xc] }
 0x179   :  { %5270 = vrcp.f32 %v544_v28  ;;  %v5269_v38 = vpop.eup %5268  ;;  %v546_v46 = vadd.f32 1.0, %v5267_v37 }
 0x17a   :  { %5272 = vrcp.f32 %v545_v36 }
 0x17b   :  { %5274 = vrcp.f32 %v546_v46 }
 0x183   :  { %v5271_v42 = vpop.eup %5270 }
 0x184   :  { %v555_v43 = vmul.f32 %v5271_v42, %v5269_v38  ;;  %v5273_v45 = vpop.eup %5272  ;;  %v563_v38 = vld [vmem:[#allocation2 + $0x18] sm:$0xc] }
 0x185   :  { %v554_v47 = vmul.f32 0.0, %v5273_v45  ;;  %v5275_v55 = vpop.eup %5274 }
 0x187   :  { %v5997_v52 = vadd.f32 %v555_v43, %v554_v47 }
 0x189   :  { %5276 = vtanh.f32 %v5997_v52 }
 0x193   :  { %v5277_v57 = vpop.eup %5276 }
 0x194   :  { %v558_v59 = vmul.f32 %v5277_v57, %v5275_v55 }
 0x196   :  { %559 = vst [vmem:[#allocation3] sm:$0x3] %v558_v59  ;;  %629 = vmatmul.mubr.f32.vlgmr.msra.gmra.mrb[6].mxu0 %v558_v59  ;;  %700 = vmatmul.mubr.f32.vlgmr.msra.gmra.mrb[6].mxu1 %v558_v59 }
 0x197   :  { %4237 = vmatpush1.bf16.msra.mxu0 %v5839_v22  ;;  %4269 = vmatpush1.bf16.msra.mxu1 %v5842_v26 }
 0x198   :  { %4239 = vmatprep.subr.bf16.mxu0 %v5846_v30  ;;  %4271 = vmatprep.subr.bf16.mxu1 %v5848_v31 }
 0x199   :  { %821 = vmatprep.mubr.f32.mxu0 %v5668_v0  ;;  %892 = vmatprep.mubr.f32.mxu1 %v5668_v0 }
 0x19b   :  { %4241 = vmatpush1.bf16.msra.mxu0 %v5852_v35  ;;  %4273 = vmatpush1.bf16.msra.mxu1 %v5856_v39 }
 0x19c   :  { %4243 = vmatprep.subr.bf16.mxu0 %v5858_v40  ;;  %4275 = vmatprep.subr.bf16.mxu1 %v5861_v44 }
 0x19f   :  { %4245 = vmatpush1.bf16.msra.mxu0 %v5866_v51  ;;  %4277 = vmatpush1.bf16.msra.mxu1 %v5870_v53 }
 0x1a0   :  { %4247 = vmatprep.subr.bf16.mxu0 %v5872_v54  ;;  %4279 = vmatprep.subr.bf16.mxu1 %v5875_v58 }
 0x1a3   :  { %4249 = vmatpush1.bf16.msra.mxu0 %v5878_v1  ;;  %4281 = vmatpush1.bf16.msra.mxu1 %v5882_v2 }
 0x1a4   :  { %4251 = vmatprep.subr.bf16.mxu0 %v5884_v3  ;;  %4283 = vmatprep.subr.bf16.mxu1 %v5887_v7 }
 0x1a7   :  { %4253 = vmatpush1.bf16.msra.mxu0 %v5890_v13  ;;  %4285 = vmatpush1.bf16.msra.mxu1 %v5894_v15 }
 0x1a8   :  { %4255 = vmatprep.subr.bf16.mxu0 %v5896_v16  ;;  %4287 = vmatprep.subr.bf16.mxu1 %v5902_v23 }
 0x1ab   :  { %4257 = vmatpush1.bf16.msra.mxu0 %v5908_v32  ;;  %4289 = vmatpush1.bf16.msra.mxu1 %v5913_v33 }
 0x1ac   :  { %4259 = vmatprep.subr.bf16.mxu0 %v5915_v34  ;;  %4291 = vmatprep.subr.bf16.mxu1 %v5918_v41 }
 0x1af   :  { %4261 = vmatpush1.bf16.msra.mxu0 %v5921_v48  ;;  %4293 = vmatpush1.bf16.msra.mxu1 %v5925_v49 }
 0x1b0   :  { %4263 = vmatprep.subr.bf16.mxu0 %v5927_v50  ;;  %4295 = vmatprep.subr.bf16.mxu1 %v5930_v56 }
 0x1b3   :  { %4265 = vmatpush1.bf16.msra.mxu0 %v5933_v60  ;;  %4297 = vmatpush1.bf16.msra.mxu1 %v5937_v61 }
 0x1b4   :  { %4299 = vmatprep.subr.bf16.mxu0 %v5835_v17  ;;  %4331 = vmatprep.subr.bf16.mxu1 %v5837_v21 }
 0x269   :  { %v630_v62 = vpop.f32.mrb[6].mxu0  ;;  %v701_v5 = vpop.f32.mrb[6].mxu1 }
 0x26a   :  { %v710_v18 = vrot.slane %v630_v62, 6  ;;  %v632_v19 = vpop.f32.mrb[7].mxu0  ;;  %v703_v20 = vpop.f32.mrb[7].mxu1  ;;  %v712_v28 = vrot.slane %v701_v5, 6  ;;  %v742_v5 = vrot.slane %v5997_v52, 6 }
 0x26b   :  { %v711_v24 = vrot.slane %v632_v19, 6  ;;  %v713_v36 = vrot.slane %v703_v20, 6 }
 0x26c   :  { %v718_v11 = vadd.f32 %v710_v18, %v560_v10  ;;  %v720_v37 = vadd.f32 %v712_v28, %v562_v29 }
 0x26d   :  { %v719_v25 = vadd.f32 %v711_v24, %v561_v12  ;;  %v721_v42 = vadd.f32 %v713_v36, %v563_v38 }
 0x26e   :  { %v3947_v14 = vmul.f32 -1.442695, %v718_v11  ;;  %v3949_v43 = vmul.f32 -1.442695, %v720_v37  ;;  %v750_v37 = vld [vmem:[#allocation2] sm:$0x30] }
 0x26f   :  { %v3948_v27 = vmul.f32 -1.442695, %v719_v25 }
 0x270   :  { %5278 = vpow2.f32 %v3947_v14 }
 0x271   :  { %5280 = vpow2.f32 %v3948_v27 }
 0x272   :  { %5282 = vtanh.f32 %v721_v42 }
 0x273   :  { %5284 = vpow2.f32 %v3949_v43  ;;  %v751_v43 = vld [vmem:[#allocation2 + $0x8] sm:$0x30] }
 0x27a   :  { %v5279_v45 = vpop.eup %5278 }
 0x27b   :  { %v731_v46 = vadd.f32 1.0, %v5279_v45  ;;  %v5281_v47 = vpop.eup %5280 }
 0x27c   :  { %v732_v55 = vadd.f32 1.0, %v5281_v47  ;;  %v5283_v57 = vpop.eup %5282 }
 0x27d   :  { %5286 = vrcp.f32 %v731_v46  ;;  %v5285_v59 = vpop.eup %5284 }
 0x27e   :  { %5288 = vrcp.f32 %v732_v55  ;;  %v733_v20 = vadd.f32 1.0, %v5285_v59 }
 0x280   :  { %5290 = vrcp.f32 %v733_v20 }
 0x287   :  { %v5287_v62 = vpop.eup %5286 }
 0x288   :  { %v745_v18 = vmul.f32 %v5287_v62, %v5283_v57  ;;  %v5289_v19 = vpop.eup %5288  ;;  %v752_v57 = vld [vmem:[#allocation2 + $0x10] sm:$0x30] }
 0x289   :  { %v744_v10 = vmul.f32 %v5289_v19, %v742_v5  ;;  %v753_v5 = vld [vmem:[#allocation2 + $0x18] sm:$0x30] }
 0x28a   :  { %v5291_v11 = vpop.eup %5290 }
 0x28b   :  { %v6035_v24 = vadd.f32 %v745_v18, %v744_v10 }
 0x28d   :  { %5292 = vtanh.f32 %v6035_v24 }
 0x297   :  { %v5293_v12 = vpop.eup %5292 }
 0x298   :  { %v748_v25 = vmul.f32 %v5293_v12, %v5291_v11 }
 0x29a   :  { %749 = vst [vmem:[#allocation3] sm:$0xc] %v748_v25  ;;  %v755_v14 = vrot.slane %v748_v25, 2 }
 0x29c   :  { %822 = vmatmul.mubr.f32.vlgmr.msra.gmra.mrb[8].mxu0 %v755_v14  ;;  %893 = vmatmul.mubr.f32.vlgmr.msra.gmra.mrb[8].mxu1 %v755_v14 }
 0x29d   :  { %4301 = vmatpush1.bf16.msra.mxu0 %v5839_v22  ;;  %4333 = vmatpush1.bf16.msra.mxu1 %v5842_v26 }
 0x29e   :  { %4303 = vmatprep.subr.bf16.mxu0 %v5846_v30  ;;  %4335 = vmatprep.subr.bf16.mxu1 %v5848_v31 }
 0x29f   :  { %1014 = vmatprep.mubr.f32.mxu0 %v5668_v0  ;;  %1085 = vmatprep.mubr.f32.mxu1 %v5668_v0 }
 0x2a1   :  { %4305 = vmatpush1.bf16.msra.mxu0 %v5852_v35  ;;  %4337 = vmatpush1.bf16.msra.mxu1 %v5856_v39 }
 0x2a2   :  { %4307 = vmatprep.subr.bf16.mxu0 %v5858_v40  ;;  %4339 = vmatprep.subr.bf16.mxu1 %v5861_v44 }
 0x2a5   :  { %4309 = vmatpush1.bf16.msra.mxu0 %v5866_v51  ;;  %4341 = vmatpush1.bf16.msra.mxu1 %v5870_v53 }
 0x2a6   :  { %4311 = vmatprep.subr.bf16.mxu0 %v5872_v54  ;;  %4343 = vmatprep.subr.bf16.mxu1 %v5875_v58 }
 0x2a9   :  { %4313 = vmatpush1.bf16.msra.mxu0 %v5878_v1  ;;  %4345 = vmatpush1.bf16.msra.mxu1 %v5882_v2 }
 0x2aa   :  { %4315 = vmatprep.subr.bf16.mxu0 %v5884_v3  ;;  %4347 = vmatprep.subr.bf16.mxu1 %v5887_v7 }
 0x2ad   :  { %4317 = vmatpush1.bf16.msra.mxu0 %v5890_v13  ;;  %4349 = vmatpush1.bf16.msra.mxu1 %v5894_v15 }
 0x2ae   :  { %4319 = vmatprep.subr.bf16.mxu0 %v5896_v16  ;;  %4351 = vmatprep.subr.bf16.mxu1 %v5902_v23 }
 0x2b1   :  { %4321 = vmatpush1.bf16.msra.mxu0 %v5908_v32  ;;  %4353 = vmatpush1.bf16.msra.mxu1 %v5913_v33 }
 0x2b2   :  { %4323 = vmatprep.subr.bf16.mxu0 %v5915_v34  ;;  %4355 = vmatprep.subr.bf16.mxu1 %v5918_v41 }
 0x2b5   :  { %4325 = vmatpush1.bf16.msra.mxu0 %v5921_v48  ;;  %4357 = vmatpush1.bf16.msra.mxu1 %v5925_v49 }
 0x2b6   :  { %4327 = vmatprep.subr.bf16.mxu0 %v5927_v50  ;;  %4359 = vmatprep.subr.bf16.mxu1 %v5930_v56 }
 0x2b9   :  { %4329 = vmatpush1.bf16.msra.mxu0 %v5933_v60  ;;  %4361 = vmatpush1.bf16.msra.mxu1 %v5937_v61 }
 0x2ba   :  { %4363 = vmatprep.subr.bf16.mxu0 %v5835_v17  ;;  %4395 = vmatprep.subr.bf16.mxu1 %v5837_v21 }
 0x36f   :  { %v823_v52 = vpop.f32.mrb[8].mxu0  ;;  %v894_v27 = vpop.f32.mrb[8].mxu1 }
 0x370   :  { %v903_v28 = vrot.slane %v823_v52, 4  ;;  %v825_v29 = vpop.f32.mrb[9].mxu0  ;;  %v896_v36 = vpop.f32.mrb[9].mxu1  ;;  %v905_v55 = vrot.slane %v894_v27, 4  ;;  %v935_v27 = vrot.slane %v6035_v24, 6 }
 0x371   :  { %v904_v38 = vrot.slane %v825_v29, 4  ;;  %v906_v59 = vrot.slane %v896_v36, 4 }
 0x372   :  { %v911_v42 = vadd.f32 %v903_v28, %v750_v37  ;;  %v913_v62 = vadd.f32 %v905_v55, %v752_v57 }
 0x373   :  { %v912_v45 = vadd.f32 %v904_v38, %v751_v43  ;;  %v914_v18 = vadd.f32 %v906_v59, %v753_v5 }
 0x374   :  { %v3950_v46 = vmul.f32 -1.442695, %v911_v42  ;;  %v3952_v19 = vmul.f32 -1.442695, %v913_v62  ;;  %v943_v62 = vld [vmem:[#allocation2] sm:$0xc0] }
 0x375   :  { %v3951_v47 = vmul.f32 -1.442695, %v912_v45 }
 0x376   :  { %5294 = vpow2.f32 %v3950_v46 }
 0x377   :  { %5296 = vpow2.f32 %v3951_v47 }
 0x378   :  { %5298 = vtanh.f32 %v914_v18 }
 0x379   :  { %5300 = vpow2.f32 %v3952_v19  ;;  %v944_v19 = vld [vmem:[#allocation2 + $0x8] sm:$0xc0] }
 0x380   :  { %v5295_v20 = vpop.eup %5294 }
 0x381   :  { %v924_v10 = vadd.f32 1.0, %v5295_v20  ;;  %v5297_v11 = vpop.eup %5296 }
 0x382   :  { %v925_v12 = vadd.f32 1.0, %v5297_v11  ;;  %v5299_v25 = vpop.eup %5298 }
 0x383   :  { %5302 = vrcp.f32 %v924_v10  ;;  %v5301_v14 = vpop.eup %5300 }
 0x384   :  { %5304 = vrcp.f32 %v925_v12  ;;  %v926_v36 = vadd.f32 1.0, %v5301_v14 }
 0x386   :  { %5306 = vrcp.f32 %v926_v36 }
 0x38d   :  { %v5303_v52 = vpop.eup %5302 }
 0x38e   :  { %v938_v28 = vmul.f32 %v5303_v52, %v5299_v25  ;;  %v5305_v29 = vpop.eup %5304  ;;  %v945_v25 = vld [vmem:[#allocation2 + $0x10] sm:$0xc0] }
 0x38f   :  { %v937_v37 = vmul.f32 %v5305_v29, %v935_v27  ;;  %v946_v27 = vld [vmem:[#allocation2 + $0x18] sm:$0xc0] }
 0x390   :  { %v5307_v42 = vpop.eup %5306 }
 0x391   :  { %v6073_v38 = vadd.f32 %v938_v28, %v937_v37 }
 0x393   :  { %5308 = vtanh.f32 %v6073_v38 }
 0x39d   :  { %v5309_v43 = vpop.eup %5308 }
 0x39e   :  { %v941_v45 = vmul.f32 %v5309_v43, %v5307_v42 }
 0x3a0   :  { %942 = vst [vmem:[#allocation3] sm:$0x30] %v941_v45  ;;  %v948_v46 = vrot.slane %v941_v45, 4 }
 0x3a2   :  { %1015 = vmatmul.mubr.f32.vlgmr.msra.gmra.mrb[10].mxu0 %v948_v46  ;;  %1086 = vmatmul.mubr.f32.vlgmr.msra.gmra.mrb[10].mxu1 %v948_v46 }
 0x3a3   :  { %4365 = vmatpush1.bf16.msra.mxu0 %v5839_v22  ;;  %4397 = vmatpush1.bf16.msra.mxu1 %v5842_v26 }
 0x3a4   :  { %4367 = vmatprep.subr.bf16.mxu0 %v5846_v30  ;;  %4399 = vmatprep.subr.bf16.mxu1 %v5848_v31 }
 0x3a5   :  { %1207 = vmatprep.mubr.f32.mxu0 %v5668_v0  ;;  %1278 = vmatprep.mubr.f32.mxu1 %v5668_v0 }
 0x3a7   :  { %4369 = vmatpush1.bf16.msra.mxu0 %v5852_v35  ;;  %4401 = vmatpush1.bf16.msra.mxu1 %v5856_v39 }
 0x3a8   :  { %4371 = vmatprep.subr.bf16.mxu0 %v5858_v40  ;;  %4403 = vmatprep.subr.bf16.mxu1 %v5861_v44 }
 0x3ab   :  { %4373 = vmatpush1.bf16.msra.mxu0 %v5866_v51  ;;  %4405 = vmatpush1.bf16.msra.mxu1 %v5870_v53 }
 0x3ac   :  { %4375 = vmatprep.subr.bf16.mxu0 %v5872_v54  ;;  %4407 = vmatprep.subr.bf16.mxu1 %v5875_v58 }
 0x3af   :  { %4377 = vmatpush1.bf16.msra.mxu0 %v5878_v1  ;;  %4409 = vmatpush1.bf16.msra.mxu1 %v5882_v2 }
 0x3b0   :  { %4379 = vmatprep.subr.bf16.mxu0 %v5884_v3  ;;  %4411 = vmatprep.subr.bf16.mxu1 %v5887_v7 }
 0x3b3   :  { %4381 = vmatpush1.bf16.msra.mxu0 %v5890_v13  ;;  %4413 = vmatpush1.bf16.msra.mxu1 %v5894_v15 }
 0x3b4   :  { %4383 = vmatprep.subr.bf16.mxu0 %v5896_v16  ;;  %4415 = vmatprep.subr.bf16.mxu1 %v5902_v23 }
 0x3b7   :  { %4385 = vmatpush1.bf16.msra.mxu0 %v5908_v32  ;;  %4417 = vmatpush1.bf16.msra.mxu1 %v5913_v33 }
 0x3b8   :  { %4387 = vmatprep.subr.bf16.mxu0 %v5915_v34  ;;  %4419 = vmatprep.subr.bf16.mxu1 %v5918_v41 }
 0x3bb   :  { %4389 = vmatpush1.bf16.msra.mxu0 %v5921_v48  ;;  %4421 = vmatpush1.bf16.msra.mxu1 %v5925_v49 }
 0x3bc   :  { %4391 = vmatprep.subr.bf16.mxu0 %v5927_v50  ;;  %4423 = vmatprep.subr.bf16.mxu1 %v5930_v56 }
 0x3bf   :  { %4393 = vmatpush1.bf16.msra.mxu0 %v5933_v60  ;;  %4425 = vmatpush1.bf16.msra.mxu1 %v5937_v61 }
 0x3c0   :  { %4427 = vmatprep.subr.bf16.mxu0 %v5835_v17  ;;  %4459 = vmatprep.subr.bf16.mxu1 %v5837_v21 }
 0x475   :  { %v1016_v24 = vpop.f32.mrb[10].mxu0  ;;  %v1087_v47 = vpop.f32.mrb[10].mxu1 }
 0x476   :  { %v1096_v55 = vrot.slane %v1016_v24, 2  ;;  %v1018_v57 = vpop.f32.mrb[11].mxu0  ;;  %v1089_v59 = vpop.f32.mrb[11].mxu1  ;;  %v1098_v12 = vrot.slane %v1087_v47, 2  ;;  %v1128_v47 = vrot.slane %v6073_v38, 6 }
 0x477   :  { %v1097_v5 = vrot.slane %v1018_v57, 2  ;;  %v1099_v14 = vrot.slane %v1089_v59, 2  ;;  %v1136_v38 = vld [vmem:[#allocation2 + $0x20] sm:$0x3] }
 0x478   :  { %v1104_v18 = vadd.f32 %v1096_v55, %v943_v62  ;;  %v1106_v52 = vadd.f32 %v1098_v12, %v945_v25 }
 0x479   :  { %v1105_v20 = vadd.f32 %v1097_v5, %v944_v19  ;;  %v1107_v28 = vadd.f32 %v1099_v14, %v946_v27  ;;  %v1137_v14 = vld [vmem:[#allocation2 + $0x28] sm:$0x3] }
 0x47a   :  { %v3953_v10 = vmul.f32 -1.442695, %v1104_v18  ;;  %v3955_v29 = vmul.f32 -1.442695, %v1106_v52 }
 0x47b   :  { %v3954_v11 = vmul.f32 -1.442695, %v1105_v20 }
 0x47c   :  { %5310 = vpow2.f32 %v3953_v10 }
 0x47d   :  { %5312 = vpow2.f32 %v3954_v11 }
 0x47e   :  { %5314 = vtanh.f32 %v1107_v28 }
 0x47f   :  { %5316 = vpow2.f32 %v3955_v29 }
 0x486   :  { %v5311_v36 = vpop.eup %5310 }
 0x487   :  { %v1117_v37 = vadd.f32 1.0, %v5311_v36  ;;  %v5313_v42 = vpop.eup %5312 }
 0x488   :  { %v1118_v43 = vadd.f32 1.0, %v5313_v42  ;;  %v5315_v45 = vpop.eup %5314 }
 0x489   :  { %5318 = vrcp.f32 %v1117_v37  ;;  %v5317_v46 = vpop.eup %5316  ;;  %v1138_v37 = vld [vmem:[#allocation2 + $0x30] sm:$0x3] }
 0x48a   :  { %5320 = vrcp.f32 %v1118_v43  ;;  %v1119_v59 = vadd.f32 1.0, %v5317_v46  ;;  %v1139_v43 = vld [vmem:[#allocation2 + $0x38] sm:$0x3] }
 0x48c   :  { %5322 = vrcp.f32 %v1119_v59 }
 0x493   :  { %v5319_v24 = vpop.eup %5318 }
 0x494   :  { %v1131_v55 = vmul.f32 %v5319_v24, %v5315_v45  ;;  %v5321_v57 = vpop.eup %5320 }
 0x495   :  { %v1130_v62 = vmul.f32 %v5321_v57, %v1128_v47 }
 0x496   :  { %v5323_v18 = vpop.eup %5322 }
 0x497   :  { %v6111_v5 = vadd.f32 %v1131_v55, %v1130_v62 }
 0x499   :  { %5324 = vtanh.f32 %v6111_v5 }
 0x4a3   :  { %v5325_v19 = vpop.eup %5324 }
 0x4a4   :  { %v1134_v20 = vmul.f32 %v5325_v19, %v5323_v18  ;;  %v1309_v19 = vrot.slane %v6111_v5, 6 }
 0x4a6   :  { %1135 = vst [vmem:[#allocation3] sm:$0xc0] %v1134_v20  ;;  %v1141_v10 = vrot.slane %v1134_v20, 6 }
 0x4a8   :  { %1208 = vmatmul.mubr.f32.vlgmr.msra.gmra.mrb[12].mxu0 %v1141_v10  ;;  %1279 = vmatmul.mubr.f32.vlgmr.msra.gmra.mrb[12].mxu1 %v1141_v10 }
 0x4a9   :  { %4429 = vmatpush1.bf16.msra.mxu0 %v5839_v22  ;;  %4461 = vmatpush1.bf16.msra.mxu1 %v5842_v26 }
 0x4aa   :  { %4431 = vmatprep.subr.bf16.mxu0 %v5846_v30  ;;  %4463 = vmatprep.subr.bf16.mxu1 %v5848_v31 }
 0x4ab   :  { %1385 = vmatprep.mubr.f32.mxu0 %v5668_v0  ;;  %1456 = vmatprep.mubr.f32.mxu1 %v5668_v0 }
 0x4ad   :  { %4433 = vmatpush1.bf16.msra.mxu0 %v5852_v35  ;;  %4465 = vmatpush1.bf16.msra.mxu1 %v5856_v39 }
 0x4ae   :  { %4435 = vmatprep.subr.bf16.mxu0 %v5858_v40  ;;  %4467 = vmatprep.subr.bf16.mxu1 %v5861_v44 }
 0x4b1   :  { %4437 = vmatpush1.bf16.msra.mxu0 %v5866_v51  ;;  %4469 = vmatpush1.bf16.msra.mxu1 %v5870_v53 }
 0x4b2   :  { %4439 = vmatprep.subr.bf16.mxu0 %v5872_v54  ;;  %4471 = vmatprep.subr.bf16.mxu1 %v5875_v58 }
 0x4b5   :  { %4441 = vmatpush1.bf16.msra.mxu0 %v5878_v1  ;;  %4473 = vmatpush1.bf16.msra.mxu1 %v5882_v2 }
 0x4b6   :  { %4443 = vmatprep.subr.bf16.mxu0 %v5884_v3  ;;  %4475 = vmatprep.subr.bf16.mxu1 %v5887_v7 }
 0x4b9   :  { %4445 = vmatpush1.bf16.msra.mxu0 %v5890_v13  ;;  %4477 = vmatpush1.bf16.msra.mxu1 %v5894_v15 }
 0x4ba   :  { %4447 = vmatprep.subr.bf16.mxu0 %v5896_v16  ;;  %4479 = vmatprep.subr.bf16.mxu1 %v5902_v23 }
 0x4bd   :  { %4449 = vmatpush1.bf16.msra.mxu0 %v5908_v32  ;;  %4481 = vmatpush1.bf16.msra.mxu1 %v5913_v33 }
 0x4be   :  { %4451 = vmatprep.subr.bf16.mxu0 %v5915_v34  ;;  %4483 = vmatprep.subr.bf16.mxu1 %v5918_v41 }
 0x4c1   :  { %4453 = vmatpush1.bf16.msra.mxu0 %v5921_v48  ;;  %4485 = vmatpush1.bf16.msra.mxu1 %v5925_v49 }
 0x4c2   :  { %4455 = vmatprep.subr.bf16.mxu0 %v5927_v50  ;;  %4487 = vmatprep.subr.bf16.mxu1 %v5930_v56 }
 0x4c5   :  { %4457 = vmatpush1.bf16.msra.mxu0 %v5933_v60  ;;  %4489 = vmatpush1.bf16.msra.mxu1 %v5937_v61 }
 0x4c6   :  { %4491 = vmatprep.subr.bf16.mxu0 %v5835_v17  ;;  %4523 = vmatprep.subr.bf16.mxu1 %v5837_v21 }
 0x57b   :  { %v1209_v11 = vpop.f32.mrb[12].mxu0  ;;  %v1280_v12 = vpop.f32.mrb[12].mxu1 }
 0x57c   :  { %v1285_v25 = vadd.f32 %v1209_v11, %v1136_v38  ;;  %v1211_v52 = vpop.f32.mrb[13].mxu0  ;;  %v1282_v27 = vpop.f32.mrb[13].mxu1  ;;  %v1287_v42 = vadd.f32 %v1280_v12, %v1138_v37  ;;  %v1317_v37 = vld [vmem:[#allocation2 + $0x20] sm:$0xc] }
 0x57d   :  { %v1286_v28 = vadd.f32 %v1211_v52, %v1137_v14  ;;  %v1288_v45 = vadd.f32 %v1282_v27, %v1139_v43 }
 0x57e   :  { %v3956_v29 = vmul.f32 -1.442695, %v1285_v25  ;;  %v3958_v46 = vmul.f32 -1.442695, %v1287_v42 }
 0x57f   :  { %v3957_v36 = vmul.f32 -1.442695, %v1286_v28 }
 0x580   :  { %5326 = vpow2.f32 %v3956_v29 }
 0x581   :  { %5328 = vpow2.f32 %v3957_v36 }
 0x582   :  { %5330 = vtanh.f32 %v1288_v45  ;;  %v1318_v45 = vld [vmem:[#allocation2 + $0x28] sm:$0xc] }
 0x583   :  { %5332 = vpow2.f32 %v3958_v46 }
 0x58a   :  { %v5327_v24 = vpop.eup %5326 }
 0x58b   :  { %v1298_v47 = vadd.f32 1.0, %v5327_v24  ;;  %v5329_v55 = vpop.eup %5328 }
 0x58c   :  { %v1299_v57 = vadd.f32 1.0, %v5329_v55  ;;  %v5331_v59 = vpop.eup %5330 }
 0x58d   :  { %5334 = vrcp.f32 %v1298_v47  ;;  %v5333_v62 = vpop.eup %5332 }
 0x58e   :  { %5336 = vrcp.f32 %v1299_v57  ;;  %v1300_v38 = vadd.f32 1.0, %v5333_v62  ;;  %v1319_v57 = vld [vmem:[#allocation2 + $0x30] sm:$0xc]  ;;  %v1320_v62 = vld [vmem:[#allocation2 + $0x38] sm:$0xc] }
 0x590   :  { %5338 = vrcp.f32 %v1300_v38 }
 0x597   :  { %v5335_v18 = vpop.eup %5334 }
 0x598   :  { %v1312_v20 = vmul.f32 %v5335_v18, %v5331_v59  ;;  %v5337_v10 = vpop.eup %5336 }
 0x599   :  { %v1311_v11 = vmul.f32 %v5337_v10, %v1309_v19 }
 0x59a   :  { %v5339_v25 = vpop.eup %5338 }
 0x59b   :  { %v6149_v12 = vadd.f32 %v1312_v20, %v1311_v11 }
 0x59d   :  { %5340 = vtanh.f32 %v6149_v12 }
 0x5a7   :  { %v5341_v14 = vpop.eup %5340 }
 0x5a8   :  { %v1315_v52 = vmul.f32 %v5341_v14, %v5339_v25 }
 0x5aa   :  { %1316 = vst [vmem:[#allocation3 + $0x8] sm:$0x3] %v1315_v52  ;;  %1386 = vmatmul.mubr.f32.vlgmr.msra.gmra.mrb[14].mxu0 %v1315_v52  ;;  %1457 = vmatmul.mubr.f32.vlgmr.msra.gmra.mrb[14].mxu1 %v1315_v52  ;;  %v1499_v52 = vrot.slane %v6149_v12, 6 }
 0x5ab   :  { %4493 = vmatpush1.bf16.msra.mxu0 %v5839_v22  ;;  %4525 = vmatpush1.bf16.msra.mxu1 %v5842_v26 }
 0x5ac   :  { %4495 = vmatprep.subr.bf16.mxu0 %v5846_v30  ;;  %4527 = vmatprep.subr.bf16.mxu1 %v5848_v31 }
 0x5ad   :  { %1578 = vmatprep.mubr.f32.mxu0 %v5668_v0  ;;  %1649 = vmatprep.mubr.f32.mxu1 %v5668_v0 }
 0x5af   :  { %4497 = vmatpush1.bf16.msra.mxu0 %v5852_v35  ;;  %4529 = vmatpush1.bf16.msra.mxu1 %v5856_v39 }
 0x5b0   :  { %4499 = vmatprep.subr.bf16.mxu0 %v5858_v40  ;;  %4531 = vmatprep.subr.bf16.mxu1 %v5861_v44 }
 0x5b3   :  { %4501 = vmatpush1.bf16.msra.mxu0 %v5866_v51  ;;  %4533 = vmatpush1.bf16.msra.mxu1 %v5870_v53 }
 0x5b4   :  { %4503 = vmatprep.subr.bf16.mxu0 %v5872_v54  ;;  %4535 = vmatprep.subr.bf16.mxu1 %v5875_v58 }
 0x5b7   :  { %4505 = vmatpush1.bf16.msra.mxu0 %v5878_v1  ;;  %4537 = vmatpush1.bf16.msra.mxu1 %v5882_v2 }
 0x5b8   :  { %4507 = vmatprep.subr.bf16.mxu0 %v5884_v3  ;;  %4539 = vmatprep.subr.bf16.mxu1 %v5887_v7 }
 0x5bb   :  { %4509 = vmatpush1.bf16.msra.mxu0 %v5890_v13  ;;  %4541 = vmatpush1.bf16.msra.mxu1 %v5894_v15 }
 0x5bc   :  { %4511 = vmatprep.subr.bf16.mxu0 %v5896_v16  ;;  %4543 = vmatprep.subr.bf16.mxu1 %v5902_v23 }
 0x5bf   :  { %4513 = vmatpush1.bf16.msra.mxu0 %v5908_v32  ;;  %4545 = vmatpush1.bf16.msra.mxu1 %v5913_v33 }
 0x5c0   :  { %4515 = vmatprep.subr.bf16.mxu0 %v5915_v34  ;;  %4547 = vmatprep.subr.bf16.mxu1 %v5918_v41 }
 0x5c3   :  { %4517 = vmatpush1.bf16.msra.mxu0 %v5921_v48  ;;  %4549 = vmatpush1.bf16.msra.mxu1 %v5925_v49 }
 0x5c4   :  { %4519 = vmatprep.subr.bf16.mxu0 %v5927_v50  ;;  %4551 = vmatprep.subr.bf16.mxu1 %v5930_v56 }
 0x5c7   :  { %4521 = vmatpush1.bf16.msra.mxu0 %v5933_v60  ;;  %4553 = vmatpush1.bf16.msra.mxu1 %v5937_v61 }
 0x5c8   :  { %4555 = vmatprep.subr.bf16.mxu0 %v5835_v17  ;;  %4587 = vmatprep.subr.bf16.mxu1 %v5837_v21 }
 0x67d   :  { %v1387_v5 = vpop.f32.mrb[14].mxu0  ;;  %v1458_v27 = vpop.f32.mrb[14].mxu1 }
 0x67e   :  { %v1467_v28 = vrot.slane %v1387_v5, 6  ;;  %v1389_v29 = vpop.f32.mrb[15].mxu0  ;;  %v1460_v36 = vpop.f32.mrb[15].mxu1  ;;  %v1469_v55 = vrot.slane %v1458_v27, 6 }
 0x67f   :  { %v1468_v42 = vrot.slane %v1389_v29, 6  ;;  %v1470_v59 = vrot.slane %v1460_v36, 6 }
 0x680   :  { %v1475_v43 = vadd.f32 %v1467_v28, %v1317_v37  ;;  %v1477_v17 = vadd.f32 %v1469_v55, %v1319_v57 }
 0x681   :  { %v1476_v46 = vadd.f32 %v1468_v42, %v1318_v45  ;;  %v1478_v21 = vadd.f32 %v1470_v59, %v1320_v62  ;;  %v1895_v62 = vld [vmem:[#allocation8] sm:$0xff] }
 0x682   :  { %v3959_v24 = vmul.f32 -1.442695, %v1475_v43  ;;  %v3961_v18 = vmul.f32 -1.442695, %v1477_v17 }
 0x683   :  { %v3960_v47 = vmul.f32 -1.442695, %v1476_v46 }
 0x684   :  { %5342 = vpow2.f32 %v3959_v24 }
 0x685   :  { %5344 = vpow2.f32 %v3960_v47 }
 0x686   :  { %5346 = vtanh.f32 %v1478_v21  ;;  %v1899_v21 = vld [vmem:[#allocation8 + $0x20] sm:$0xff] }
 0x687   :  { %5348 = vpow2.f32 %v3961_v18 }
 0x68e   :  { %v5343_v19 = vpop.eup %5342 }
 0x68f   :  { %v1488_v20 = vadd.f32 1.0, %v5343_v19  ;;  %v5345_v10 = vpop.eup %5344  ;;  %v1897_v19 = vld [vmem:[#allocation8 + $0x10] sm:$0xff] }
 0x690   :  { %v1489_v38 = vadd.f32 1.0, %v5345_v10  ;;  %v5347_v11 = vpop.eup %5346  ;;  %v1904_v10 = vld [vmem:[#allocation8 + $0x48] sm:$0xff] }
 0x691   :  { %5350 = vrcp.f32 %v1488_v20  ;;  %v5349_v25 = vpop.eup %5348  ;;  %v1901_v20 = vld [vmem:[#allocation8 + $0x30] sm:$0xff] }
 0x692   :  { %5352 = vrcp.f32 %v1489_v38  ;;  %v1490_v28 = vadd.f32 1.0, %v5349_v25  ;;  %v1906_v25 = vld [vmem:[#allocation8 + $0x58] sm:$0xff] }
 0x694   :  { %5354 = vrcp.f32 %v1490_v28  ;;  %v1903_v28 = vld [vmem:[#allocation8 + $0x40] sm:$0xff] }
 0x69b   :  { %v5351_v14 = vpop.eup %5350 }
 0x69c   :  { %v1502_v5 = vmul.f32 %v5351_v14, %v5347_v11  ;;  %v5353_v27 = vpop.eup %5352  ;;  %v1908_v11 = vld [vmem:[#allocation8 + $0x68] sm:$0xff]  ;;  %v1910_v14 = vld [vmem:[#allocation8 + $0x78] sm:$0xff] }
 0x69d   :  { %v1501_v29 = vmul.f32 %v5353_v27, %v1499_v52  ;;  %v4652_v27 = vpack.c.bf16 %v1901_v20, %v1897_v19 }
 0x69e   :  { %v5355_v37 = vpop.eup %5354 }
 0x69f   :  { %v6187_v36 = vadd.f32 %v1502_v5, %v1501_v29  ;;  %v4620_v5 = vpack.c.bf16 %v1899_v21, %v1895_v62  ;;  %v1907_v29 = vld [vmem:[#allocation8 + $0x60] sm:$0xff]  ;;  %v1940_v62 = vld [vmem:[#allocation8 + $0x168] sm:$0xff]  ;;  %v1938_v21 = vld [vmem:[#allocation8 + $0x158] sm:$0xff] }
 0x6a1   :  { %5356 = vtanh.f32 %v6187_v36  ;;  %v1692_v24 = vrot.slane %v6187_v36, 6 }
 0x6ab   :  { %v5357_v42 = vpop.eup %5356 }
 0x6ac   :  { %v1505_v43 = vmul.f32 %v5357_v42, %v5355_v37  ;;  %v4622_v37 = vpack.c.bf16 %v1908_v11, %v1904_v10  ;;  %v4654_v42 = vpack.c.bf16 %v1910_v14, %v1906_v25  ;;  %v1935_v10 = vld [vmem:[#allocation8 + $0x140] sm:$0xff]  ;;  %v1937_v14 = vld [vmem:[#allocation8 + $0x150] sm:$0xff] }
 0x6ae   :  { %1506 = vst [vmem:[#allocation3 + $0x8] sm:$0xc] %v1505_v43  ;;  %v1512_v45 = vrot.slane %v1505_v43, 2  ;;  %v1905_v43 = vld [vmem:[#allocation8 + $0x50] sm:$0xff] }
 0x6b0   :  { %1579 = vmatmul.mubr.f32.vlgmr.msra.gmra.mrb[16].mxu0 %v1512_v45  ;;  %1650 = vmatmul.mubr.f32.vlgmr.msra.gmra.mrb[16].mxu1 %v1512_v45  ;;  %v1909_v45 = vld [vmem:[#allocation8 + $0x70] sm:$0xff] }
 0x6b1   :  { %4557 = vmatpush1.bf16.msra.mxu0 %v5839_v22  ;;  %4589 = vmatpush1.bf16.msra.mxu1 %v5842_v26  ;;  %v1896_v22 = vld [vmem:[#allocation8 + $0x8] sm:$0xff] }
 0x6b2   :  { %4559 = vmatprep.subr.bf16.mxu0 %v5846_v30  ;;  %4591 = vmatprep.subr.bf16.mxu1 %v5848_v31  ;;  %v1900_v26 = vld [vmem:[#allocation8 + $0x28] sm:$0xff]  ;;  %v1898_v30 = vld [vmem:[#allocation8 + $0x18] sm:$0xff] }
 0x6b3   :  { %1771 = vmatprep.mubr.f32.mxu0 %v5668_v0  ;;  %1842 = vmatprep.mubr.f32.mxu1 %v5668_v0  ;;  %v4618_v31 = vpack.c.bf16 %v1900_v26, %v1896_v22  ;;  %v1912_v22 = vld [vmem:[#allocation8 + $0x88] sm:$0xff] }
 0x6b4   :  { %v1916_v26 = vld [vmem:[#allocation8 + $0xa8] sm:$0xff] }
 0x6b5   :  { %4561 = vmatpush1.bf16.msra.mxu0 %v5852_v35  ;;  %4593 = vmatpush1.bf16.msra.mxu1 %v5856_v39  ;;  %v1902_v35 = vld [vmem:[#allocation8 + $0x38] sm:$0xff] }
 0x6b6   :  { %4563 = vmatprep.subr.bf16.mxu0 %v5858_v40  ;;  %4595 = vmatprep.subr.bf16.mxu1 %v5861_v44  ;;  %v4650_v39 = vpack.c.bf16 %v1902_v35, %v1898_v30  ;;  %v1914_v30 = vld [vmem:[#allocation8 + $0x98] sm:$0xff]  ;;  %v4624_v35 = vpack.c.bf16 %v1907_v29, %v1903_v28 }
 0x6b7   :  { %v1946_v28 = vld [vmem:[#allocation8 + $0x198] sm:$0xff] }
 0x6b8   :  { %v1950_v29 = vld [vmem:[#allocation8 + $0x1b8] sm:$0xff] }
 0x6b9   :  { %4565 = vmatpush1.bf16.msra.mxu0 %v5866_v51  ;;  %4597 = vmatpush1.bf16.msra.mxu1 %v5870_v53 }
 0x6ba   :  { %4567 = vmatprep.subr.bf16.mxu0 %v5872_v54  ;;  %4599 = vmatprep.subr.bf16.mxu1 %v5875_v58  ;;  %v1507_v58 = vld [vmem:[#allocation2 + $0x20] sm:$0x30] }
 0x6bd   :  { %4569 = vmatpush1.bf16.msra.mxu0 %v5878_v1  ;;  %4601 = vmatpush1.bf16.msra.mxu1 %v5882_v2 }
 0x6be   :  { %4571 = vmatprep.subr.bf16.mxu0 %v5884_v3  ;;  %4603 = vmatprep.subr.bf16.mxu1 %v5887_v7  ;;  %v1508_v3 = vld [vmem:[#allocation2 + $0x28] sm:$0x30] }
 0x6c1   :  { %4573 = vmatpush1.bf16.msra.mxu0 %v5890_v13  ;;  %4605 = vmatpush1.bf16.msra.mxu1 %v5894_v15 }
 0x6c2   :  { %4575 = vmatprep.subr.bf16.mxu0 %v5896_v16  ;;  %4607 = vmatprep.subr.bf16.mxu1 %v5902_v23  ;;  %v1509_v23 = vld [vmem:[#allocation2 + $0x30] sm:$0x30] }
 0x6c5   :  { %4577 = vmatpush1.bf16.msra.mxu0 %v5908_v32  ;;  %4609 = vmatpush1.bf16.msra.mxu1 %v5913_v33 }
 0x6c6   :  { %4579 = vmatprep.subr.bf16.mxu0 %v5915_v34  ;;  %4611 = vmatprep.subr.bf16.mxu1 %v5918_v41  ;;  %v1510_v34 = vld [vmem:[#allocation2 + $0x38] sm:$0x30] }
 0x6c9   :  { %4581 = vmatpush1.bf16.msra.mxu0 %v5921_v48  ;;  %4613 = vmatpush1.bf16.msra.mxu1 %v5925_v49 }
 0x6ca   :  { %4583 = vmatprep.subr.bf16.mxu0 %v5927_v50  ;;  %4615 = vmatprep.subr.bf16.mxu1 %v5930_v56 }
 0x6cd   :  { %4585 = vmatpush1.bf16.msra.mxu0 %v5933_v60  ;;  %4617 = vmatpush1.bf16.msra.mxu1 %v5937_v61 }
 0x6ce   :  { %4619 = vmatprep.subr.bf16.mxu0 %v4618_v31  ;;  %4651 = vmatprep.subr.bf16.mxu1 %v4650_v39  ;;  %v1918_v31 = vld [vmem:[#allocation8 + $0xb8] sm:$0xff]  ;;  %v4656_v39 = vpack.c.bf16 %v1909_v45, %v1905_v43  ;;  %v1947_v43 = vld [vmem:[#allocation8 + $0x1a0] sm:$0xff] }
 0x783   :  { %v1580_v40 = vpop.f32.mrb[16].mxu0  ;;  %v1651_v44 = vpop.f32.mrb[16].mxu1 }
 0x784   :  { %v1660_v51 = vrot.slane %v1580_v40, 4  ;;  %v1582_v53 = vpop.f32.mrb[17].mxu0  ;;  %v1653_v54 = vpop.f32.mrb[17].mxu1  ;;  %v1662_v16 = vrot.slane %v1651_v44, 4  ;;  %v1911_v40 = vld [vmem:[#allocation8 + $0x80] sm:$0xff] }
 0x785   :  { %v1661_v1 = vrot.slane %v1582_v53, 4  ;;  %v1663_v32 = vrot.slane %v1653_v54, 4  ;;  %v1915_v44 = vld [vmem:[#allocation8 + $0xa0] sm:$0xff]  ;;  %v4658_v53 = vpack.c.bf16 %v1918_v31, %v1914_v30  ;;  %v1913_v54 = vld [vmem:[#allocation8 + $0x90] sm:$0xff]  ;;  %v1952_v31 = vld [vmem:[#allocation8 + $0x1c8] sm:$0xff] }
 0x786   :  { %v1668_v2 = vadd.f32 %v1660_v51, %v1507_v58  ;;  %v1670_v33 = vadd.f32 %v1662_v16, %v1509_v23  ;;  %v4626_v51 = vpack.c.bf16 %v1916_v26, %v1912_v22  ;;  %v1917_v58 = vld [vmem:[#allocation8 + $0xb0] sm:$0xff]  ;;  %v1919_v16 = vld [vmem:[#allocation8 + $0xc0] sm:$0xff]  ;;  %v4674_v22 = vpack.c.bf16 %v1950_v29, %v1946_v28 }
 0x787   :  { %v1669_v7 = vadd.f32 %v1661_v1, %v1508_v3  ;;  %v1671_v41 = vadd.f32 %v1663_v32, %v1510_v34  ;;  %v1920_v1 = vld [vmem:[#allocation8 + $0xc8] sm:$0xff]  ;;  %v1922_v3 = vld [vmem:[#allocation8 + $0xd8] sm:$0xff]  ;;  %v1923_v23 = vld [vmem:[#allocation8 + $0xe0] sm:$0xff] }
 0x788   :  { %v3962_v13 = vmul.f32 -1.442695, %v1668_v2  ;;  %v3964_v48 = vmul.f32 -1.442695, %v1670_v33  ;;  %v1924_v2 = vld [vmem:[#allocation8 + $0xe8] sm:$0xff]  ;;  %v1921_v34 = vld [vmem:[#allocation8 + $0xd0] sm:$0xff] }
 0x789   :  { %v3963_v15 = vmul.f32 -1.442695, %v1669_v7  ;;  %v1926_v7 = vld [vmem:[#allocation8 + $0xf8] sm:$0xff]  ;;  %v4630_v32 = vpack.c.bf16 %v1924_v2, %v1920_v1  ;;  %v1945_v26 = vld [vmem:[#allocation8 + $0x190] sm:$0xff]  ;;  %v1955_v1 = vld [vmem:[#allocation8 + $0x1e0] sm:$0xff] }
 0x78a   :  { %5358 = vpow2.f32 %v3962_v13  ;;  %v4628_v13 = vpack.c.bf16 %v1915_v44, %v1911_v40  ;;  %v4662_v33 = vpack.c.bf16 %v1926_v7, %v1922_v3  ;;  %v1949_v30 = vld [vmem:[#allocation8 + $0x1b0] sm:$0xff]  ;;  %v1958_v40 = vld [vmem:[#allocation8 + $0x1f8] sm:$0xff] }
 0x78b   :  { %5360 = vpow2.f32 %v3963_v15  ;;  %v4660_v15 = vpack.c.bf16 %v1917_v58, %v1913_v54  ;;  %v1953_v2 = vld [vmem:[#allocation8 + $0x1d0] sm:$0xff] }
 0x78c   :  { %5362 = vtanh.f32 %v1671_v41  ;;  %v1925_v41 = vld [vmem:[#allocation8 + $0xf0] sm:$0xff] }
 0x78d   :  { %5364 = vpow2.f32 %v3964_v48  ;;  %v1928_v48 = vld [vmem:[#allocation8 + $0x108] sm:$0xff]  ;;  %v1957_v3 = vld [vmem:[#allocation8 + $0x1f0] sm:$0xff] }
 0x78e   :  { %v2161_v29 = vld [vmem:[#allocation9 + $0x90] sm:$0xff] }
 0x794   :  { %v5359_v49 = vpop.eup %5358 }
 0x795   :  { %v1681_v50 = vadd.f32 1.0, %v5359_v49  ;;  %v5361_v56 = vpop.eup %5360  ;;  %v1932_v49 = vld [vmem:[#allocation8 + $0x128] sm:$0xff] }
 0x796   :  { %v1682_v60 = vadd.f32 1.0, %v5361_v56  ;;  %v5363_v61 = vpop.eup %5362  ;;  %v1934_v56 = vld [vmem:[#allocation8 + $0x138] sm:$0xff] }
 0x797   :  { %5366 = vrcp.f32 %v1681_v50  ;;  %v5365_v12 = vpop.eup %5364  ;;  %v1930_v50 = vld [vmem:[#allocation8 + $0x118] sm:$0xff] }
 0x798   :  { %5368 = vrcp.f32 %v1682_v60  ;;  %v1683_v57 = vadd.f32 1.0, %v5365_v12  ;;  %v4632_v60 = vpack.c.bf16 %v1923_v23, %v1919_v16  ;;  %v1927_v12 = vld [vmem:[#allocation8 + $0x100] sm:$0xff]  ;;  %v2144_v16 = vld [vmem:[#allocation9 + $0x8] sm:$0xff] }
 0x799   :  { %v2148_v23 = vld [vmem:[#allocation9 + $0x28] sm:$0xff] }
 0x79a   :  { %5370 = vrcp.f32 %v1683_v57  ;;  %v1933_v57 = vld [vmem:[#allocation8 + $0x130] sm:$0xff] }
 0x7a1   :  { %v5367_v46 = vpop.eup %5366 }
 0x7a2   :  { %v1695_v47 = vmul.f32 %v5367_v46, %v5363_v61  ;;  %v5369_v55 = vpop.eup %5368  ;;  %v4664_v61 = vpack.c.bf16 %v1925_v41, %v1921_v34  ;;  %v1931_v46 = vld [vmem:[#allocation8 + $0x120] sm:$0xff]  ;;  %v2150_v34 = vld [vmem:[#allocation9 + $0x38] sm:$0xff] }
 0x7a3   :  { %v1694_v59 = vmul.f32 %v5369_v55, %v1692_v24  ;;  %v4634_v24 = vpack.c.bf16 %v1932_v49, %v1928_v48  ;;  %v1929_v55 = vld [vmem:[#allocation8 + $0x110] sm:$0xff]  ;;  %v4636_v19 = vpack.c.bf16 %v1931_v46, %v1927_v12  ;;  %v2143_v41 = vld [vmem:[#allocation9] sm:$0xff]  ;;  %v2152_v12 = vld [vmem:[#allocation9 + $0x48] sm:$0xff] }
 0x7a4   :  { %v5371_v18 = vpop.eup %5370  ;;  %v4668_v20 = vpack.c.bf16 %v1933_v57, %v1929_v55  ;;  %v2147_v48 = vld [vmem:[#allocation9 + $0x20] sm:$0xff]  ;;  %v2156_v46 = vld [vmem:[#allocation9 + $0x68] sm:$0xff]  ;;  %v2158_v55 = vld [vmem:[#allocation9 + $0x78] sm:$0xff] }
 0x7a5   :  { %v6223_v17 = vadd.f32 %v1695_v47, %v1694_v59  ;;  %v4666_v47 = vpack.c.bf16 %v1934_v56, %v1930_v50  ;;  %v1936_v59 = vld [vmem:[#allocation8 + $0x148] sm:$0xff]  ;;  %v6234_v50 = vpack.c.bf16 %v2147_v48, %v2143_v41  ;;  %v2145_v56 = vld [vmem:[#allocation9 + $0x10] sm:$0xff]  ;;  %v2151_v57 = vld [vmem:[#allocation9 + $0x40] sm:$0xff] }
 0x7a6   :  { %v4638_v11 = vpack.c.bf16 %v1940_v62, %v1936_v59  ;;  %v2155_v59 = vld [vmem:[#allocation9 + $0x60] sm:$0xff]  ;;  %v2188_v41 = vld [vmem:[#allocation9 + $0x168] sm:$0xff]  ;;  %v2186_v48 = vld [vmem:[#allocation9 + $0x158] sm:$0xff] }
 0x7a7   :  { %5372 = vtanh.f32 %v6223_v17 }
 0x7b1   :  { %v5373_v38 = vpop.eup %5372 }
 0x7b2   :  { %v1698_v52 = vmul.f32 %v5373_v38, %v5371_v18  ;;  %v1942_v18 = vld [vmem:[#allocation8 + $0x178] sm:$0xff]  ;;  %v1939_v38 = vld [vmem:[#allocation8 + $0x160] sm:$0xff] }
 0x7b3   :  { %v4670_v25 = vpack.c.bf16 %v1942_v18, %v1938_v21  ;;  %v6246_v21 = vpack.c.bf16 %v2155_v59, %v2151_v57  ;;  %v2153_v18 = vld [vmem:[#allocation9 + $0x50] sm:$0xff] }
 0x7b4   :  { %1699 = vst [vmem:[#allocation3 + $0x8] sm:$0x30] %v1698_v52  ;;  %v1705_v36 = vrot.slane %v1698_v52, 4  ;;  %v1941_v52 = vld [vmem:[#allocation8 + $0x170] sm:$0xff] }
 0x7b5   :  { %v2185_v57 = vld [vmem:[#allocation9 + $0x150] sm:$0xff] }
 0x7b6   :  { %1772 = vmatmul.mubr.f32.vlgmr.msra.gmra.mrb[18].mxu0 %v1705_v36  ;;  %1843 = vmatmul.mubr.f32.vlgmr.msra.gmra.mrb[18].mxu1 %v1705_v36  ;;  %v4640_v36 = vpack.c.bf16 %v1939_v38, %v1935_v10  ;;  %v2160_v10 = vld [vmem:[#allocation9 + $0x88] sm:$0xff]  ;;  %v2189_v59 = vld [vmem:[#allocation9 + $0x170] sm:$0xff] }
 0x7b7   :  { %4621 = vmatpush1.bf16.msra.mxu0 %v4620_v5  ;;  %4653 = vmatpush1.bf16.msra.mxu1 %v4652_v27  ;;  %v1944_v5 = vld [vmem:[#allocation8 + $0x188] sm:$0xff] }
 0x7b8   :  { %4623 = vmatprep.subr.bf16.mxu0 %v4622_v37  ;;  %4655 = vmatprep.subr.bf16.mxu1 %v4654_v42  ;;  %v1948_v27 = vld [vmem:[#allocation8 + $0x1a8] sm:$0xff]  ;;  %v4672_v37 = vpack.c.bf16 %v1941_v52, %v1937_v14  ;;  %v1943_v42 = vld [vmem:[#allocation8 + $0x180] sm:$0xff]  ;;  %v2166_v14 = vld [vmem:[#allocation9 + $0xb8] sm:$0xff] }
 0x7b9   :  { %2045 = vmatprep.mubr.f32.mxu0 %v5668_v0  ;;  %2122 = vmatprep.mubr.f32.mxu1 %v5668_v0  ;;  %v4642_v45 = vpack.c.bf16 %v1948_v27, %v1944_v5  ;;  %v4644_v44 = vpack.c.bf16 %v1947_v43, %v1943_v42  ;;  %v2164_v38 = vld [vmem:[#allocation9 + $0xa8] sm:$0xff]  ;;  %v2159_v52 = vld [vmem:[#allocation9 + $0x80] sm:$0xff] }
 0x7ba   :  { %v2163_v5 = vld [vmem:[#allocation9 + $0xa0] sm:$0xff]  ;;  %v2168_v42 = vld [vmem:[#allocation9 + $0xc8] sm:$0xff] }
 0x7bb   :  { %4625 = vmatpush1.bf16.msra.mxu0 %v4624_v35  ;;  %4657 = vmatpush1.bf16.msra.mxu1 %v4656_v39  ;;  %v1956_v35 = vld [vmem:[#allocation8 + $0x1e8] sm:$0xff]  ;;  %v1954_v39 = vld [vmem:[#allocation8 + $0x1d8] sm:$0xff]  ;;  %v6258_v28 = vpack.c.bf16 %v2163_v5, %v2159_v52  ;;  %v2191_v52 = vld [vmem:[#allocation9 + $0x180] sm:$0xff] }
 0x7bc   :  { %4627 = vmatprep.subr.bf16.mxu0 %v4626_v51  ;;  %4659 = vmatprep.subr.bf16.mxu1 %v4658_v53  ;;  %v4676_v51 = vpack.c.bf16 %v1949_v30, %v1945_v26  ;;  %v1951_v53 = vld [vmem:[#allocation8 + $0x1c0] sm:$0xff]  ;;  %v4646_v54 = vpack.c.bf16 %v1956_v35, %v1952_v31  ;;  %v4678_v58 = vpack.c.bf16 %v1958_v40, %v1954_v39  ;;  %v2172_v43 = vld [vmem:[#allocation9 + $0xe8] sm:$0xff]  ;;  %v2174_v26 = vld [vmem:[#allocation9 + $0xf8] sm:$0xff] }
 0x7bd   :  { %v4648_v7 = vpack.c.bf16 %v1955_v1, %v1951_v53  ;;  %v2167_v30 = vld [vmem:[#allocation9 + $0xc0] sm:$0xff]  ;;  %v2169_v40 = vld [vmem:[#allocation9 + $0xd0] sm:$0xff]  ;;  %v2176_v53 = vld [vmem:[#allocation9 + $0x108] sm:$0xff] }
 0x7be   :  { %v2171_v31 = vld [vmem:[#allocation9 + $0xe0] sm:$0xff] }
 0x7bf   :  { %4629 = vmatpush1.bf16.msra.mxu0 %v4628_v13  ;;  %4661 = vmatpush1.bf16.msra.mxu1 %v4660_v15  ;;  %v4680_v13 = vpack.c.bf16 %v1957_v3, %v1953_v2  ;;  %v1893_v15 = vld [vmem:[#allocation3] sm:$0xff]  ;;  %v6270_v39 = vpack.c.bf16 %v2171_v31, %v2167_v30  ;;  %v2182_v2 = vld [vmem:[#allocation9 + $0x138] sm:$0xff]  ;;  %v2175_v3 = vld [vmem:[#allocation9 + $0x100] sm:$0xff] }
 0x7c0   :  { %4631 = vmatprep.subr.bf16.mxu0 %v4630_v32  ;;  %4663 = vmatprep.subr.bf16.mxu1 %v4662_v33  ;;  %v2146_v32 = vld [vmem:[#allocation9 + $0x18] sm:$0xff]  ;;  %v6230_v33 = vpack.c.bf16 %v2148_v23, %v2144_v16  ;;  %v2177_v16 = vld [vmem:[#allocation9 + $0x110] sm:$0xff]  ;;  %v2195_v5 = vld [vmem:[#allocation9 + $0x1a0] sm:$0xff] }
 0x7c1   :  { %v6232_v49 = vpack.c.bf16 %v2150_v34, %v2146_v32  ;;  %v2181_v23 = vld [vmem:[#allocation9 + $0x130] sm:$0xff]  ;;  %v2184_v34 = vld [vmem:[#allocation9 + $0x148] sm:$0xff]  ;;  %v2202_v31 = vld [vmem:[#allocation9 + $0x1d8] sm:$0xff] }
 0x7c2   :  { %v6285_v32 = vpack.c.bf16 %v2181_v23, %v2177_v16  ;;  %v2204_v30 = vld [vmem:[#allocation9 + $0x1e8] sm:$0xff] }
 0x7c3   :  { %4633 = vmatpush1.bf16.msra.mxu0 %v4632_v60  ;;  %4665 = vmatpush1.bf16.msra.mxu1 %v4664_v61  ;;  %v2149_v60 = vld [vmem:[#allocation9 + $0x30] sm:$0xff] }
 0x7c4   :  { %4635 = vmatprep.subr.bf16.mxu0 %v4634_v24  ;;  %4667 = vmatprep.subr.bf16.mxu1 %v4666_v47  ;;  %v6237_v61 = vpack.c.bf16 %v2149_v60, %v2145_v56  ;;  %v2154_v24 = vld [vmem:[#allocation9 + $0x58] sm:$0xff]  ;;  %v6242_v47 = vpack.c.bf16 %v2156_v46, %v2152_v12  ;;  %v6290_v56 = vpack.c.bf16 %v2188_v41, %v2184_v34  ;;  %v2183_v12 = vld [vmem:[#allocation9 + $0x140] sm:$0xff] }
 0x7c5   :  { %v6244_v62 = vpack.c.bf16 %v2158_v55, %v2154_v24  ;;  %v2190_v60 = vld [vmem:[#allocation9 + $0x178] sm:$0xff]  ;;  %v2187_v46 = vld [vmem:[#allocation9 + $0x160] sm:$0xff] }
 0x7c6   :  { %v6292_v24 = vpack.c.bf16 %v2190_v60, %v2186_v48  ;;  %v6294_v55 = vpack.c.bf16 %v2187_v46, %v2183_v12  ;;  %v1700_v12 = vld [vmem:[#allocation2 + $0x20] sm:$0xc0] }
 0x7c7   :  { %4637 = vmatpush1.bf16.msra.mxu0 %v4636_v19  ;;  %4669 = vmatpush1.bf16.msra.mxu1 %v4668_v20  ;;  %v2157_v19 = vld [vmem:[#allocation9 + $0x70] sm:$0xff] }
 0x7c8   :  { %4639 = vmatprep.subr.bf16.mxu0 %v4638_v11  ;;  %4671 = vmatprep.subr.bf16.mxu1 %v4670_v25  ;;  %v6249_v20 = vpack.c.bf16 %v2157_v19, %v2153_v18  ;;  %v2162_v11 = vld [vmem:[#allocation9 + $0x98] sm:$0xff]  ;;  %v6254_v25 = vpack.c.bf16 %v2164_v38, %v2160_v10  ;;  %v6297_v18 = vpack.c.bf16 %v2189_v59, %v2185_v57  ;;  %v2192_v19 = vld [vmem:[#allocation9 + $0x188] sm:$0xff] }
 0x7c9   :  { %v6256_v27 = vpack.c.bf16 %v2166_v14, %v2162_v11  ;;  %v2196_v10 = vld [vmem:[#allocation9 + $0x1a8] sm:$0xff]  ;;  %v2194_v38 = vld [vmem:[#allocation9 + $0x198] sm:$0xff] }
 0x7ca   :  { %v6301_v11 = vpack.c.bf16 %v2196_v10, %v2192_v19  ;;  %v2198_v14 = vld [vmem:[#allocation9 + $0x1b8] sm:$0xff] }
 0x7cb   :  { %4641 = vmatpush1.bf16.msra.mxu0 %v4640_v36  ;;  %4673 = vmatpush1.bf16.msra.mxu1 %v4672_v37  ;;  %v2165_v36 = vld [vmem:[#allocation9 + $0xb0] sm:$0xff]  ;;  %v1701_v59 = vld [vmem:[#allocation2 + $0x28] sm:$0xc0] }
 0x7cc   :  { %4643 = vmatprep.subr.bf16.mxu0 %v4642_v45  ;;  %4675 = vmatprep.subr.bf16.mxu1 %v4674_v22  ;;  %v6261_v37 = vpack.c.bf16 %v2165_v36, %v2161_v29  ;;  %v2170_v45 = vld [vmem:[#allocation9 + $0xd8] sm:$0xff]  ;;  %v6266_v22 = vpack.c.bf16 %v2172_v43, %v2168_v42  ;;  %v6304_v29 = vpack.c.bf16 %v2198_v14, %v2194_v38  ;;  %v2193_v42 = vld [vmem:[#allocation9 + $0x190] sm:$0xff] }
 0x7cd   :  { %v6268_v35 = vpack.c.bf16 %v2174_v26, %v2170_v45  ;;  %v6306_v36 = vpack.c.bf16 %v2195_v5, %v2191_v52  ;;  %v2197_v43 = vld [vmem:[#allocation9 + $0x1b0] sm:$0xff]  ;;  %v2200_v26 = vld [vmem:[#allocation9 + $0x1c8] sm:$0xff]  ;;  %v1702_v52 = vld [vmem:[#allocation2 + $0x30] sm:$0xc0] }
 0x7ce   :  { %v6309_v45 = vpack.c.bf16 %v2197_v43, %v2193_v42  ;;  %v1703_v43 = vld [vmem:[#allocation2 + $0x38] sm:$0xc0] }
 0x7cf   :  { %4645 = vmatpush1.bf16.msra.mxu0 %v4644_v44  ;;  %4677 = vmatpush1.bf16.msra.mxu1 %v4676_v51  ;;  %v2173_v44 = vld [vmem:[#allocation9 + $0xf0] sm:$0xff] }
 0x7d0   :  { %4647 = vmatprep.subr.bf16.mxu0 %v4646_v54  ;;  %4679 = vmatprep.subr.bf16.mxu1 %v4678_v58  ;;  %v6273_v51 = vpack.c.bf16 %v2173_v44, %v2169_v40  ;;  %v2180_v54 = vld [vmem:[#allocation9 + $0x128] sm:$0xff]  ;;  %v2178_v58 = vld [vmem:[#allocation9 + $0x118] sm:$0xff]  ;;  %v6314_v40 = vpack.c.bf16 %v2204_v30, %v2200_v26 }
 0x7d1   :  { %v6278_v1 = vpack.c.bf16 %v2180_v54, %v2176_v53  ;;  %v2206_v44 = vld [vmem:[#allocation9 + $0x1f8] sm:$0xff]  ;;  %v2199_v53 = vld [vmem:[#allocation9 + $0x1c0] sm:$0xff] }
 0x7d2   :  { %v2203_v54 = vld [vmem:[#allocation9 + $0x1e0] sm:$0xff] }
 0x7d3   :  { %4649 = vmatpush1.bf16.msra.mxu0 %v4648_v7  ;;  %4681 = vmatpush1.bf16.msra.mxu1 %v4680_v13  ;;  %v2179_v7 = vld [vmem:[#allocation9 + $0x120] sm:$0xff]  ;;  %v6280_v13 = vpack.c.bf16 %v2182_v2, %v2178_v58  ;;  %v6316_v58 = vpack.c.bf16 %v2206_v44, %v2202_v31  ;;  %v6318_v2 = vpack.c.bf16 %v2203_v54, %v2199_v53 }
 0x7d4   :  { %4683 = vmatprep.subr.bf16.mxu0 %v6230_v33  ;;  %4715 = vmatprep.subr.bf16.mxu1 %v6232_v49 }
 0x7d6   :  { %2046 = vmatmul.mubr.f32.vlgmr.msra.gmra.mrb[20].mxu0 %v1893_v15  ;;  %2123 = vmatmul.mubr.f32.vlgmr.msra.gmra.mrb[20].mxu1 %v1893_v15  ;;  %v6282_v15 = vpack.c.bf16 %v2179_v7, %v2175_v3  ;;  %v2201_v3 = vld [vmem:[#allocation9 + $0x1d0] sm:$0xff] }
 0x7d7   :  { %2051 = vmatprep.mubr.f32.mxu0 %v5668_v0  ;;  %2128 = vmatprep.mubr.f32.mxu1 %v5668_v0  ;;  %v2205_v7 = vld [vmem:[#allocation9 + $0x1f0] sm:$0xff] }
 0x7d8   :  { %4685 = vmatpush1.bf16.msra.mxu0 %v6234_v50  ;;  %4717 = vmatpush1.bf16.msra.mxu1 %v6237_v61  ;;  %v6321_v16 = vpack.c.bf16 %v2205_v7, %v2201_v3  ;;  %v1959_v3 = vld [vmem:[%s6657_s6] sm:$0xf] }
 0x7d9   :  { %4687 = vmatprep.subr.bf16.mxu0 %v6242_v47  ;;  %4719 = vmatprep.subr.bf16.mxu1 %v6244_v62 }
 0x7dc   :  { %4689 = vmatpush1.bf16.msra.mxu0 %v6246_v21  ;;  %4721 = vmatpush1.bf16.msra.mxu1 %v6249_v20 }
 0x7dd   :  { %4691 = vmatprep.subr.bf16.mxu0 %v6254_v25  ;;  %4723 = vmatprep.subr.bf16.mxu1 %v6256_v27 }
 0x7e0   :  { %4693 = vmatpush1.bf16.msra.mxu0 %v6258_v28  ;;  %4725 = vmatpush1.bf16.msra.mxu1 %v6261_v37 }
 0x7e1   :  { %4695 = vmatprep.subr.bf16.mxu0 %v6266_v22  ;;  %4727 = vmatprep.subr.bf16.mxu1 %v6268_v35 }
 0x7e4   :  { %4697 = vmatpush1.bf16.msra.mxu0 %v6270_v39  ;;  %4729 = vmatpush1.bf16.msra.mxu1 %v6273_v51 }
 0x7e5   :  { %4699 = vmatprep.subr.bf16.mxu0 %v6278_v1  ;;  %4731 = vmatprep.subr.bf16.mxu1 %v6280_v13 }
 0x7e8   :  { %4701 = vmatpush1.bf16.msra.mxu0 %v6282_v15  ;;  %4733 = vmatpush1.bf16.msra.mxu1 %v6285_v32 }
 0x7e9   :  { %4703 = vmatprep.subr.bf16.mxu0 %v6290_v56  ;;  %4735 = vmatprep.subr.bf16.mxu1 %v6292_v24 }
 0x7ec   :  { %4705 = vmatpush1.bf16.msra.mxu0 %v6294_v55  ;;  %4737 = vmatpush1.bf16.msra.mxu1 %v6297_v18 }
 0x7ed   :  { %4707 = vmatprep.subr.bf16.mxu0 %v6301_v11  ;;  %4739 = vmatprep.subr.bf16.mxu1 %v6304_v29 }
 0x7f0   :  { %4709 = vmatpush1.bf16.msra.mxu0 %v6306_v36  ;;  %4741 = vmatpush1.bf16.msra.mxu1 %v6309_v45 }
 0x7f1   :  { %4711 = vmatprep.subr.bf16.mxu0 %v6314_v40  ;;  %4743 = vmatprep.subr.bf16.mxu1 %v6316_v58 }
 0x7f4   :  { %4713 = vmatpush1.bf16.msra.mxu0 %v6318_v2  ;;  %4745 = vmatpush1.bf16.msra.mxu1 %v6321_v16 }
 0x7f5   :  { %4747 = vmatprep.subr.bf16.mxu0 %v6230_v33  ;;  %4779 = vmatprep.subr.bf16.mxu1 %v6232_v49 }
 0x889   :  { %v1773_v23 = vpop.f32.mrb[18].mxu0  ;;  %v1844_v34 = vpop.f32.mrb[18].mxu1 }
 0x88a   :  { %v1853_v41 = vrot.slane %v1773_v23, 2  ;;  %v1775_v48 = vpop.f32.mrb[19].mxu0  ;;  %v1846_v60 = vpop.f32.mrb[19].mxu1  ;;  %v1855_v14 = vrot.slane %v1844_v34, 2  ;;  %v6333_v34 = vrot.slane %v1959_v3, %v134_v4 }
 0x88b   :  { %v1854_v46 = vrot.slane %v1775_v48, 2  ;;  %v1856_v5 = vrot.slane %v1846_v60, 2  ;;  %v6341_v60 = vrot.slane %v1959_v3, %v138_v6 }
 0x88c   :  { %v1861_v57 = vadd.f32 %v1853_v41, %v1700_v12  ;;  %v1863_v42 = vadd.f32 %v1855_v14, %v1702_v52  ;;  %v6337_v41 = vrot.slane %v1959_v3, %v142_v8  ;;  %v6345_v12 = vrot.slane %v1959_v3, %v146_v9 }
 0x88d   :  { %v1862_v19 = vadd.f32 %v1854_v46, %v1701_v59  ;;  %v1864_v26 = vadd.f32 %v1856_v5, %v1703_v43  ;;  %v1885_v46 = vrot.slane %v6223_v17, 6 }
 0x88e   :  { %v3965_v10 = vmul.f32 -1.442695, %v1861_v57  ;;  %v3967_v30 = vmul.f32 -1.442695, %v1863_v42 }
 0x88f   :  { %v3966_v38 = vmul.f32 -1.442695, %v1862_v19 }
 0x890   :  { %5374 = vpow2.f32 %v3965_v10 }
 0x891   :  { %5376 = vpow2.f32 %v3966_v38 }
 0x892   :  { %5378 = vtanh.f32 %v1864_v26 }
 0x893   :  { %5380 = vpow2.f32 %v3967_v30 }
 0x89a   :  { %v5375_v31 = vpop.eup %5374 }
 0x89b   :  { %v1874_v44 = vadd.f32 1.0, %v5375_v31  ;;  %v5377_v53 = vpop.eup %5376 }
 0x89c   :  { %v1875_v54 = vadd.f32 1.0, %v5377_v53  ;;  %v5379_v7 = vpop.eup %5378 }
 0x89d   :  { %5382 = vrcp.f32 %v1874_v44  ;;  %v5381_v23 = vpop.eup %5380 }
 0x89e   :  { %5384 = vrcp.f32 %v1875_v54  ;;  %v1876_v19 = vadd.f32 1.0, %v5381_v23 }
 0x8a0   :  { %5386 = vrcp.f32 %v1876_v19 }
 0x8a7   :  { %v5383_v48 = vpop.eup %5382 }
 0x8a8   :  { %v1888_v57 = vmul.f32 %v5383_v48, %v5379_v7  ;;  %v5385_v59 = vpop.eup %5384 }
 0x8a9   :  { %v2047_v4 = vpop.f32.mrb[20].mxu0  ;;  %v2124_v10 = vpop.f32.mrb[20].mxu1  ;;  %v1887_v38 = vmul.f32 %v5385_v59, %v1885_v46 }
 0x8aa   :  { %v2048_v8 = vadd.f32 %v2047_v4, %v6333_v34  ;;  %v2125_v14 = vadd.f32 %v2124_v10, %v6337_v41  ;;  %v2049_v52 = vpop.f32.mrb[21].mxu0  ;;  %v2126_v5 = vpop.f32.mrb[21].mxu1 }
 0x8ab   :  { %v2050_v6 = vadd.f32 %v2049_v52, %v6341_v60  ;;  %v2127_v63 = vadd.f32 %v2126_v5, %v6345_v12  ;;  %v1889_v9 = vadd.f32 %v1888_v57, %v1887_v38  ;;  %v5387_v17 = vpop.eup %5386 }
 0x8ac   :  { %2135 = vst [vmem:[#allocation2] sm:$0xff] %v2048_v8  ;;  %2137 = vst [vmem:[#allocation2 + $0x10] sm:$0xff] %v2125_v14 }
 0x8ad   :  { %2136 = vst [vmem:[#allocation2 + $0x8] sm:$0xff] %v2050_v6  ;;  %2138 = vst [vmem:[#allocation2 + $0x18] sm:$0xff] %v2127_v63  ;;  %5388 = vtanh.f32 %v1889_v9 }
 0x8b3   :  { %v2207_v48 = vld [vmem:[#allocation2] sm:$0x3]  ;;  %v2209_v8 = vld [vmem:[#allocation2 + $0x10] sm:$0x3] }
 0x8b4   :  { %v2208_v19 = vld [vmem:[#allocation2 + $0x8] sm:$0x3]  ;;  %v2210_v14 = vld [vmem:[#allocation2 + $0x18] sm:$0x3] }
 0x8b7   :  { %v5389_v42 = vpop.eup %5388 }
 0x8b8   :  { %v1891_v43 = vmul.f32 %v5389_v42, %v5387_v17 }
 0x8ba   :  { %1892 = vst [vmem:[#allocation3 + $0x8] sm:$0xc0] %v1891_v43 }
 0x8c1   :  { %v1894_v26 = vld [vmem:[#allocation3 + $0x8] sm:$0xff] }
 0x8c2   :  { %2052 = vmatmul.mubr.f32.gmra.mrb[22].mxu0 %v1894_v26  ;;  %2129 = vmatmul.mubr.f32.gmra.mrb[22].mxu1 %v1894_v26 }
 0x8c3   :  { %2275 = vmatprep.mubr.f32.mxu0 %v5668_v0  ;;  %2346 = vmatprep.mubr.f32.mxu1 %v5668_v0 }
 0x8c6   :  { %2276 = vmatmul.mubr.f32.vlgmr.msra.gmra.mrb[24].mxu0 %v5668_v0  ;;  %2347 = vmatmul.mubr.f32.vlgmr.msra.gmra.mrb[24].mxu1 %v5668_v0 }
 0x8c7   :  { %4749 = vmatpush1.bf16.msra.mxu0 %v6234_v50  ;;  %4781 = vmatpush1.bf16.msra.mxu1 %v6237_v61 }
 0x8c8   :  { %4751 = vmatprep.subr.bf16.mxu0 %v6242_v47  ;;  %4783 = vmatprep.subr.bf16.mxu1 %v6244_v62 }
 0x8c9   :  { %2449 = vmatprep.mubr.f32.mxu0 %v5668_v0  ;;  %2520 = vmatprep.mubr.f32.mxu1 %v5668_v0 }
 0x8cb   :  { %4753 = vmatpush1.bf16.msra.mxu0 %v6246_v21  ;;  %4785 = vmatpush1.bf16.msra.mxu1 %v6249_v20 }
 0x8cc   :  { %4755 = vmatprep.subr.bf16.mxu0 %v6254_v25  ;;  %4787 = vmatprep.subr.bf16.mxu1 %v6256_v27 }
 0x8cf   :  { %4757 = vmatpush1.bf16.msra.mxu0 %v6258_v28  ;;  %4789 = vmatpush1.bf16.msra.mxu1 %v6261_v37 }
 0x8d0   :  { %4759 = vmatprep.subr.bf16.mxu0 %v6266_v22  ;;  %4791 = vmatprep.subr.bf16.mxu1 %v6268_v35 }
 0x8d3   :  { %4761 = vmatpush1.bf16.msra.mxu0 %v6270_v39  ;;  %4793 = vmatpush1.bf16.msra.mxu1 %v6273_v51 }
 0x8d4   :  { %4763 = vmatprep.subr.bf16.mxu0 %v6278_v1  ;;  %4795 = vmatprep.subr.bf16.mxu1 %v6280_v13 }
 0x8d7   :  { %4765 = vmatpush1.bf16.msra.mxu0 %v6282_v15  ;;  %4797 = vmatpush1.bf16.msra.mxu1 %v6285_v32 }
 0x8d8   :  { %4767 = vmatprep.subr.bf16.mxu0 %v6290_v56  ;;  %4799 = vmatprep.subr.bf16.mxu1 %v6292_v24 }
 0x8db   :  { %4769 = vmatpush1.bf16.msra.mxu0 %v6294_v55  ;;  %4801 = vmatpush1.bf16.msra.mxu1 %v6297_v18 }
 0x8dc   :  { %4771 = vmatprep.subr.bf16.mxu0 %v6301_v11  ;;  %4803 = vmatprep.subr.bf16.mxu1 %v6304_v29 }
 0x8df   :  { %4773 = vmatpush1.bf16.msra.mxu0 %v6306_v36  ;;  %4805 = vmatpush1.bf16.msra.mxu1 %v6309_v45 }
 0x8e0   :  { %4775 = vmatprep.subr.bf16.mxu0 %v6314_v40  ;;  %4807 = vmatprep.subr.bf16.mxu1 %v6316_v58 }
 0x8e3   :  { %4777 = vmatpush1.bf16.msra.mxu0 %v6318_v2  ;;  %4809 = vmatpush1.bf16.msra.mxu1 %v6321_v16 }
 0x8e4   :  { %4811 = vmatprep.subr.bf16.mxu0 %v6230_v33  ;;  %4843 = vmatprep.subr.bf16.mxu1 %v6232_v49 }
 0x995   :  { %v2053_v30 = vpop.f32.mrb[22].mxu0  ;;  %v2130_v31 = vpop.f32.mrb[22].mxu1 }
 0x996   :  { %v2054_v44 = vadd.f32 %v2053_v30, %v6333_v34  ;;  %v2131_v53 = vadd.f32 %v2130_v31, %v6337_v41  ;;  %v2055_v54 = vpop.f32.mrb[23].mxu0  ;;  %v2132_v3 = vpop.f32.mrb[23].mxu1 }
 0x997   :  { %v2056_v7 = vadd.f32 %v2055_v54, %v6341_v60  ;;  %v2133_v23 = vadd.f32 %v2132_v3, %v6345_v12 }
 0x998   :  { %2139 = vst [vmem:[#allocation2 + $0x20] sm:$0xff] %v2054_v44  ;;  %2141 = vst [vmem:[#allocation2 + $0x30] sm:$0xff] %v2131_v53 }
 0x999   :  { %2140 = vst [vmem:[#allocation2 + $0x28] sm:$0xff] %v2056_v7  ;;  %2142 = vst [vmem:[#allocation2 + $0x38] sm:$0xff] %v2133_v23  ;;  %v2277_v46 = vpop.f32.mrb[24].mxu0  ;;  %v2348_v57 = vpop.f32.mrb[24].mxu1 }
 0x99a   :  { %v2353_v59 = vadd.f32 %v2277_v46, %v2207_v48  ;;  %v2279_v4 = vpop.f32.mrb[25].mxu0  ;;  %v2350_v10 = vpop.f32.mrb[25].mxu1  ;;  %v2355_v60 = vadd.f32 %v2348_v57, %v2209_v8 }
 0x99b   :  { %v2354_v34 = vadd.f32 %v2279_v4, %v2208_v19  ;;  %v2356_v12 = vadd.f32 %v2350_v10, %v2210_v14  ;;  %v2381_v19 = vld [vmem:[#allocation2] sm:$0xc]  ;;  %v2383_v14 = vld [vmem:[#allocation2 + $0x10] sm:$0xc] }
 0x99c   :  { %v3968_v38 = vmul.f32 -1.442695, %v2353_v59  ;;  %v3970_v52 = vmul.f32 -1.442695, %v2355_v60 }
 0x99d   :  { %v3969_v41 = vmul.f32 -1.442695, %v2354_v34  ;;  %v2382_v34 = vld [vmem:[#allocation2 + $0x8] sm:$0xc] }
 0x99e   :  { %5390 = vpow2.f32 %v3968_v38 }
 0x99f   :  { %5392 = vpow2.f32 %v3969_v41 }
 0x9a0   :  { %5394 = vtanh.f32 %v2356_v12 }
 0x9a1   :  { %5396 = vpow2.f32 %v3970_v52 }
 0x9a8   :  { %v5391_v5 = vpop.eup %5390 }
 0x9a9   :  { %v2366_v6 = vadd.f32 1.0, %v5391_v5  ;;  %v5393_v63 = vpop.eup %5392  ;;  %v2384_v5 = vld [vmem:[#allocation2 + $0x18] sm:$0xc] }
 0x9aa   :  { %v2367_v9 = vadd.f32 1.0, %v5393_v63  ;;  %v5395_v17 = vpop.eup %5394 }
 0x9ab   :  { %5398 = vrcp.f32 %v2366_v6  ;;  %v5397_v42 = vpop.eup %5396 }
 0x9ac   :  { %5400 = vrcp.f32 %v2367_v9  ;;  %v2368_v31 = vadd.f32 1.0, %v5397_v42 }
 0x9ae   :  { %5402 = vrcp.f32 %v2368_v31 }
 0x9b5   :  { %v5399_v43 = vpop.eup %5398 }
 0x9b6   :  { %v2377_v26 = vmul.f32 %v5399_v43, %v5395_v17  ;;  %v5401_v30 = vpop.eup %5400 }
 0x9b7   :  { %v2376_v44 = vmul.f32 0.0, %v5401_v30 }
 0x9b8   :  { %v5403_v54 = vpop.eup %5402 }
 0x9b9   :  { %v6394_v53 = vadd.f32 %v2377_v26, %v2376_v44 }
 0x9bb   :  { %5404 = vtanh.f32 %v6394_v53  ;;  %v2563_v44 = vrot.slane %v6394_v53, 6 }
 0x9c5   :  { %v5405_v3 = vpop.eup %5404 }
 0x9c6   :  { %v2380_v7 = vmul.f32 %v5405_v3, %v5403_v54 }
 0x9c8   :  { %2450 = vmatmul.mubr.f32.vlgmr.msra.gmra.mrb[26].mxu0 %v2380_v7  ;;  %2521 = vmatmul.mubr.f32.vlgmr.msra.gmra.mrb[26].mxu1 %v2380_v7 }
 0x9c9   :  { %4813 = vmatpush1.bf16.msra.mxu0 %v6234_v50  ;;  %4845 = vmatpush1.bf16.msra.mxu1 %v6237_v61 }
 0x9ca   :  { %4815 = vmatprep.subr.bf16.mxu0 %v6242_v47  ;;  %4847 = vmatprep.subr.bf16.mxu1 %v6244_v62 }
 0x9cb   :  { %2641 = vmatprep.mubr.f32.mxu0 %v5668_v0  ;;  %2712 = vmatprep.mubr.f32.mxu1 %v5668_v0 }
 0x9cd   :  { %4817 = vmatpush1.bf16.msra.mxu0 %v6246_v21  ;;  %4849 = vmatpush1.bf16.msra.mxu1 %v6249_v20 }
 0x9ce   :  { %4819 = vmatprep.subr.bf16.mxu0 %v6254_v25  ;;  %4851 = vmatprep.subr.bf16.mxu1 %v6256_v27 }
 0x9d1   :  { %4821 = vmatpush1.bf16.msra.mxu0 %v6258_v28  ;;  %4853 = vmatpush1.bf16.msra.mxu1 %v6261_v37 }
 0x9d2   :  { %4823 = vmatprep.subr.bf16.mxu0 %v6266_v22  ;;  %4855 = vmatprep.subr.bf16.mxu1 %v6268_v35 }
 0x9d5   :  { %4825 = vmatpush1.bf16.msra.mxu0 %v6270_v39  ;;  %4857 = vmatpush1.bf16.msra.mxu1 %v6273_v51 }
 0x9d6   :  { %4827 = vmatprep.subr.bf16.mxu0 %v6278_v1  ;;  %4859 = vmatprep.subr.bf16.mxu1 %v6280_v13 }
 0x9d9   :  { %4829 = vmatpush1.bf16.msra.mxu0 %v6282_v15  ;;  %4861 = vmatpush1.bf16.msra.mxu1 %v6285_v32 }
 0x9da   :  { %4831 = vmatprep.subr.bf16.mxu0 %v6290_v56  ;;  %4863 = vmatprep.subr.bf16.mxu1 %v6292_v24 }
 0x9dd   :  { %4833 = vmatpush1.bf16.msra.mxu0 %v6294_v55  ;;  %4865 = vmatpush1.bf16.msra.mxu1 %v6297_v18 }
 0x9de   :  { %4835 = vmatprep.subr.bf16.mxu0 %v6301_v11  ;;  %4867 = vmatprep.subr.bf16.mxu1 %v6304_v29 }
 0x9e1   :  { %4837 = vmatpush1.bf16.msra.mxu0 %v6306_v36  ;;  %4869 = vmatpush1.bf16.msra.mxu1 %v6309_v45 }
 0x9e2   :  { %4839 = vmatprep.subr.bf16.mxu0 %v6314_v40  ;;  %4871 = vmatprep.subr.bf16.mxu1 %v6316_v58 }
 0x9e5   :  { %4841 = vmatpush1.bf16.msra.mxu0 %v6318_v2  ;;  %4873 = vmatpush1.bf16.msra.mxu1 %v6321_v16 }
 0x9e6   :  { %4875 = vmatprep.subr.bf16.mxu0 %v6230_v33  ;;  %4907 = vmatprep.subr.bf16.mxu1 %v6232_v49 }
 0xa9b   :  { %v2451_v23 = vpop.f32.mrb[26].mxu0  ;;  %v2522_v48 = vpop.f32.mrb[26].mxu1 }
 0xa9c   :  { %v2531_v46 = vrot.slane %v2451_v23, 6  ;;  %v2453_v57 = vpop.f32.mrb[27].mxu0  ;;  %v2524_v59 = vpop.f32.mrb[27].mxu1  ;;  %v2533_v60 = vrot.slane %v2522_v48, 6 }
 0xa9d   :  { %v2532_v4 = vrot.slane %v2453_v57, 6  ;;  %v2534_v12 = vrot.slane %v2524_v59, 6 }
 0xa9e   :  { %v2539_v10 = vadd.f32 %v2531_v46, %v2381_v19  ;;  %v2541_v52 = vadd.f32 %v2533_v60, %v2383_v14  ;;  %v2571_v14 = vld [vmem:[#allocation2 + $0x8] sm:$0x30] }
 0xa9f   :  { %v2540_v38 = vadd.f32 %v2532_v4, %v2382_v34  ;;  %v2542_v6 = vadd.f32 %v2534_v12, %v2384_v5 }
 0xaa0   :  { %v3971_v41 = vmul.f32 -1.442695, %v2539_v10  ;;  %v3973_v63 = vmul.f32 -1.442695, %v2541_v52 }
 0xaa1   :  { %v3972_v8 = vmul.f32 -1.442695, %v2540_v38 }
 0xaa2   :  { %5406 = vpow2.f32 %v3971_v41  ;;  %v2570_v41 = vld [vmem:[#allocation2] sm:$0x30] }
 0xaa3   :  { %5408 = vpow2.f32 %v3972_v8 }
 0xaa4   :  { %5410 = vtanh.f32 %v2542_v6 }
 0xaa5   :  { %5412 = vpow2.f32 %v3973_v63  ;;  %v2572_v63 = vld [vmem:[#allocation2 + $0x10] sm:$0x30] }
 0xaac   :  { %v5407_v9 = vpop.eup %5406 }
 0xaad   :  { %v2552_v17 = vadd.f32 1.0, %v5407_v9  ;;  %v5409_v42 = vpop.eup %5408 }
 0xaae   :  { %v2553_v43 = vadd.f32 1.0, %v5409_v42  ;;  %v5411_v26 = vpop.eup %5410  ;;  %v2573_v42 = vld [vmem:[#allocation2 + $0x18] sm:$0x30] }
 0xaaf   :  { %5414 = vrcp.f32 %v2552_v17  ;;  %v5413_v30 = vpop.eup %5412 }
 0xab0   :  { %5416 = vrcp.f32 %v2553_v43  ;;  %v2554_v7 = vadd.f32 1.0, %v5413_v30 }
 0xab2   :  { %5418 = vrcp.f32 %v2554_v7 }
 0xab9   :  { %v5415_v31 = vpop.eup %5414 }
 0xaba   :  { %v2566_v54 = vmul.f32 %v5415_v31, %v5411_v26  ;;  %v5417_v3 = vpop.eup %5416 }
 0xabb   :  { %v2565_v23 = vmul.f32 %v5417_v3, %v2563_v44 }
 0xabc   :  { %v5419_v46 = vpop.eup %5418 }
 0xabd   :  { %v6432_v48 = vadd.f32 %v2566_v54, %v2565_v23 }
 0xabf   :  { %5420 = vtanh.f32 %v6432_v48 }
 0xac9   :  { %v5421_v57 = vpop.eup %5420 }
 0xaca   :  { %v2569_v59 = vmul.f32 %v5421_v57, %v5419_v46  ;;  %v2755_v46 = vrot.slane %v6432_v48, 6 }
 0xacc   :  { %v2575_v19 = vrot.slane %v2569_v59, 2 }
 0xace   :  { %2642 = vmatmul.mubr.f32.vlgmr.msra.gmra.mrb[28].mxu0 %v2575_v19  ;;  %2713 = vmatmul.mubr.f32.vlgmr.msra.gmra.mrb[28].mxu1 %v2575_v19 }
 0xacf   :  { %4877 = vmatpush1.bf16.msra.mxu0 %v6234_v50  ;;  %4909 = vmatpush1.bf16.msra.mxu1 %v6237_v61 }
 0xad0   :  { %4879 = vmatprep.subr.bf16.mxu0 %v6242_v47  ;;  %4911 = vmatprep.subr.bf16.mxu1 %v6244_v62 }
 0xad1   :  { %2833 = vmatprep.mubr.f32.mxu0 %v5668_v0  ;;  %2904 = vmatprep.mubr.f32.mxu1 %v5668_v0 }
 0xad3   :  { %4881 = vmatpush1.bf16.msra.mxu0 %v6246_v21  ;;  %4913 = vmatpush1.bf16.msra.mxu1 %v6249_v20 }
 0xad4   :  { %4883 = vmatprep.subr.bf16.mxu0 %v6254_v25  ;;  %4915 = vmatprep.subr.bf16.mxu1 %v6256_v27 }
 0xad7   :  { %4885 = vmatpush1.bf16.msra.mxu0 %v6258_v28  ;;  %4917 = vmatpush1.bf16.msra.mxu1 %v6261_v37 }
 0xad8   :  { %4887 = vmatprep.subr.bf16.mxu0 %v6266_v22  ;;  %4919 = vmatprep.subr.bf16.mxu1 %v6268_v35 }
 0xadb   :  { %4889 = vmatpush1.bf16.msra.mxu0 %v6270_v39  ;;  %4921 = vmatpush1.bf16.msra.mxu1 %v6273_v51 }
 0xadc   :  { %4891 = vmatprep.subr.bf16.mxu0 %v6278_v1  ;;  %4923 = vmatprep.subr.bf16.mxu1 %v6280_v13 }
 0xadf   :  { %4893 = vmatpush1.bf16.msra.mxu0 %v6282_v15  ;;  %4925 = vmatpush1.bf16.msra.mxu1 %v6285_v32 }
 0xae0   :  { %4895 = vmatprep.subr.bf16.mxu0 %v6290_v56  ;;  %4927 = vmatprep.subr.bf16.mxu1 %v6292_v24 }
 0xae3   :  { %4897 = vmatpush1.bf16.msra.mxu0 %v6294_v55  ;;  %4929 = vmatpush1.bf16.msra.mxu1 %v6297_v18 }
 0xae4   :  { %4899 = vmatprep.subr.bf16.mxu0 %v6301_v11  ;;  %4931 = vmatprep.subr.bf16.mxu1 %v6304_v29 }
 0xae7   :  { %4901 = vmatpush1.bf16.msra.mxu0 %v6306_v36  ;;  %4933 = vmatpush1.bf16.msra.mxu1 %v6309_v45 }
 0xae8   :  { %4903 = vmatprep.subr.bf16.mxu0 %v6314_v40  ;;  %4935 = vmatprep.subr.bf16.mxu1 %v6316_v58 }
 0xaeb   :  { %4905 = vmatpush1.bf16.msra.mxu0 %v6318_v2  ;;  %4937 = vmatpush1.bf16.msra.mxu1 %v6321_v16 }
 0xaec   :  { %4939 = vmatprep.subr.bf16.mxu0 %v6230_v33  ;;  %4971 = vmatprep.subr.bf16.mxu1 %v6232_v49 }
 0xba1   :  { %v2643_v53 = vpop.f32.mrb[28].mxu0  ;;  %v2714_v4 = vpop.f32.mrb[28].mxu1 }
 0xba2   :  { %v2723_v10 = vrot.slane %v2643_v53, 4  ;;  %v2645_v34 = vpop.f32.mrb[29].mxu0  ;;  %v2716_v38 = vpop.f32.mrb[29].mxu1  ;;  %v2725_v6 = vrot.slane %v2714_v4, 4 }
 0xba3   :  { %v2724_v8 = vrot.slane %v2645_v34, 4  ;;  %v2726_v9 = vrot.slane %v2716_v38, 4 }
 0xba4   :  { %v2731_v60 = vadd.f32 %v2723_v10, %v2570_v41  ;;  %v2733_v17 = vadd.f32 %v2725_v6, %v2572_v63  ;;  %v2763_v63 = vld [vmem:[#allocation2 + $0x8] sm:$0xc0] }
 0xba5   :  { %v2732_v12 = vadd.f32 %v2724_v8, %v2571_v14  ;;  %v2734_v43 = vadd.f32 %v2726_v9, %v2573_v42 }
 0xba6   :  { %v3974_v52 = vmul.f32 -1.442695, %v2731_v60  ;;  %v3976_v26 = vmul.f32 -1.442695, %v2733_v17 }
 0xba7   :  { %v3975_v5 = vmul.f32 -1.442695, %v2732_v12 }
 0xba8   :  { %5422 = vpow2.f32 %v3974_v52  ;;  %v2762_v52 = vld [vmem:[#allocation2] sm:$0xc0] }
 0xba9   :  { %5424 = vpow2.f32 %v3975_v5 }
 0xbaa   :  { %5426 = vtanh.f32 %v2734_v43 }
 0xbab   :  { %5428 = vpow2.f32 %v3976_v26  ;;  %v2764_v26 = vld [vmem:[#allocation2 + $0x10] sm:$0xc0] }
 0xbb2   :  { %v5423_v30 = vpop.eup %5422 }
 0xbb3   :  { %v2744_v31 = vadd.f32 1.0, %v5423_v30  ;;  %v5425_v44 = vpop.eup %5424 }
 0xbb4   :  { %v2745_v54 = vadd.f32 1.0, %v5425_v44  ;;  %v5427_v3 = vpop.eup %5426  ;;  %v2765_v44 = vld [vmem:[#allocation2 + $0x18] sm:$0xc0] }
 0xbb5   :  { %5430 = vrcp.f32 %v2744_v31  ;;  %v5429_v7 = vpop.eup %5428 }
 0xbb6   :  { %5432 = vrcp.f32 %v2745_v54  ;;  %v2746_v19 = vadd.f32 1.0, %v5429_v7 }
 0xbb8   :  { %5434 = vrcp.f32 %v2746_v19 }
 0xbbf   :  { %v5431_v23 = vpop.eup %5430 }
 0xbc0   :  { %v2758_v57 = vmul.f32 %v5431_v23, %v5427_v3  ;;  %v5433_v59 = vpop.eup %5432 }
 0xbc1   :  { %v2757_v53 = vmul.f32 %v5433_v59, %v2755_v46 }
 0xbc2   :  { %v5435_v10 = vpop.eup %5434 }
 0xbc3   :  { %v6470_v4 = vadd.f32 %v2758_v57, %v2757_v53 }
 0xbc5   :  { %5436 = vtanh.f32 %v6470_v4 }
 0xbcf   :  { %v5437_v34 = vpop.eup %5436 }
 0xbd0   :  { %v2761_v38 = vmul.f32 %v5437_v34, %v5435_v10  ;;  %v2947_v10 = vrot.slane %v6470_v4, 6  ;;  %v2954_v4 = vld [vmem:[#allocation2 + $0x20] sm:$0x3] }
 0xbd2   :  { %v2767_v41 = vrot.slane %v2761_v38, 4 }
 0xbd4   :  { %2834 = vmatmul.mubr.f32.vlgmr.msra.gmra.mrb[30].mxu0 %v2767_v41  ;;  %2905 = vmatmul.mubr.f32.vlgmr.msra.gmra.mrb[30].mxu1 %v2767_v41 }
 0xbd5   :  { %4941 = vmatpush1.bf16.msra.mxu0 %v6234_v50  ;;  %4973 = vmatpush1.bf16.msra.mxu1 %v6237_v61 }
 0xbd6   :  { %4943 = vmatprep.subr.bf16.mxu0 %v6242_v47  ;;  %4975 = vmatprep.subr.bf16.mxu1 %v6244_v62 }
 0xbd7   :  { %3025 = vmatprep.mubr.f32.mxu0 %v5668_v0  ;;  %3096 = vmatprep.mubr.f32.mxu1 %v5668_v0 }
 0xbd9   :  { %4945 = vmatpush1.bf16.msra.mxu0 %v6246_v21  ;;  %4977 = vmatpush1.bf16.msra.mxu1 %v6249_v20 }
 0xbda   :  { %4947 = vmatprep.subr.bf16.mxu0 %v6254_v25  ;;  %4979 = vmatprep.subr.bf16.mxu1 %v6256_v27 }
 0xbdd   :  { %4949 = vmatpush1.bf16.msra.mxu0 %v6258_v28  ;;  %4981 = vmatpush1.bf16.msra.mxu1 %v6261_v37 }
 0xbde   :  { %4951 = vmatprep.subr.bf16.mxu0 %v6266_v22  ;;  %4983 = vmatprep.subr.bf16.mxu1 %v6268_v35 }
 0xbe1   :  { %4953 = vmatpush1.bf16.msra.mxu0 %v6270_v39  ;;  %4985 = vmatpush1.bf16.msra.mxu1 %v6273_v51 }
 0xbe2   :  { %4955 = vmatprep.subr.bf16.mxu0 %v6278_v1  ;;  %4987 = vmatprep.subr.bf16.mxu1 %v6280_v13 }
 0xbe5   :  { %4957 = vmatpush1.bf16.msra.mxu0 %v6282_v15  ;;  %4989 = vmatpush1.bf16.msra.mxu1 %v6285_v32 }
 0xbe6   :  { %4959 = vmatprep.subr.bf16.mxu0 %v6290_v56  ;;  %4991 = vmatprep.subr.bf16.mxu1 %v6292_v24 }
 0xbe9   :  { %4961 = vmatpush1.bf16.msra.mxu0 %v6294_v55  ;;  %4993 = vmatpush1.bf16.msra.mxu1 %v6297_v18 }
 0xbea   :  { %4963 = vmatprep.subr.bf16.mxu0 %v6301_v11  ;;  %4995 = vmatprep.subr.bf16.mxu1 %v6304_v29 }
 0xbed   :  { %4965 = vmatpush1.bf16.msra.mxu0 %v6306_v36  ;;  %4997 = vmatpush1.bf16.msra.mxu1 %v6309_v45 }
 0xbee   :  { %4967 = vmatprep.subr.bf16.mxu0 %v6314_v40  ;;  %4999 = vmatprep.subr.bf16.mxu1 %v6316_v58 }
 0xbf1   :  { %4969 = vmatpush1.bf16.msra.mxu0 %v6318_v2  ;;  %5001 = vmatpush1.bf16.msra.mxu1 %v6321_v16 }
 0xbf2   :  { %5003 = vmatprep.subr.bf16.mxu0 %v6230_v33  ;;  %5035 = vmatprep.subr.bf16.mxu1 %v6232_v49 }
 0xca7   :  { %v2835_v48 = vpop.f32.mrb[30].mxu0  ;;  %v2906_v8 = vpop.f32.mrb[30].mxu1 }
 0xca8   :  { %v2915_v60 = vrot.slane %v2835_v48, 2  ;;  %v2837_v14 = vpop.f32.mrb[31].mxu0  ;;  %v2908_v12 = vpop.f32.mrb[31].mxu1  ;;  %v2917_v43 = vrot.slane %v2906_v8, 2 }
 0xca9   :  { %v2916_v5 = vrot.slane %v2837_v14, 2  ;;  %v2918_v30 = vrot.slane %v2908_v12, 2 }
 0xcaa   :  { %v2923_v6 = vadd.f32 %v2915_v60, %v2762_v52  ;;  %v2925_v31 = vadd.f32 %v2917_v43, %v2764_v26 }
 0xcab   :  { %v2924_v9 = vadd.f32 %v2916_v5, %v2763_v63  ;;  %v2926_v54 = vadd.f32 %v2918_v30, %v2765_v44 }
 0xcac   :  { %v3977_v17 = vmul.f32 -1.442695, %v2923_v6  ;;  %v3979_v3 = vmul.f32 -1.442695, %v2925_v31  ;;  %v2956_v31 = vld [vmem:[#allocation2 + $0x30] sm:$0x3] }
 0xcad   :  { %v3978_v42 = vmul.f32 -1.442695, %v2924_v9  ;;  %v2955_v9 = vld [vmem:[#allocation2 + $0x28] sm:$0x3] }
 0xcae   :  { %5438 = vpow2.f32 %v3977_v17 }
 0xcaf   :  { %5440 = vpow2.f32 %v3978_v42 }
 0xcb0   :  { %5442 = vtanh.f32 %v2926_v54  ;;  %v2957_v54 = vld [vmem:[#allocation2 + $0x38] sm:$0x3] }
 0xcb1   :  { %5444 = vpow2.f32 %v3979_v3 }
 0xcb8   :  { %v5439_v7 = vpop.eup %5438 }
 0xcb9   :  { %v2936_v23 = vadd.f32 1.0, %v5439_v7  ;;  %v5441_v46 = vpop.eup %5440 }
 0xcba   :  { %v2937_v57 = vadd.f32 1.0, %v5441_v46  ;;  %v5443_v59 = vpop.eup %5442 }
 0xcbb   :  { %5446 = vrcp.f32 %v2936_v23  ;;  %v5445_v19 = vpop.eup %5444 }
 0xcbc   :  { %5448 = vrcp.f32 %v2937_v57  ;;  %v2938_v41 = vadd.f32 1.0, %v5445_v19 }
 0xcbe   :  { %5450 = vrcp.f32 %v2938_v41 }
 0xcc5   :  { %v5447_v53 = vpop.eup %5446 }
 0xcc6   :  { %v2950_v34 = vmul.f32 %v5447_v53, %v5443_v59  ;;  %v5449_v38 = vpop.eup %5448 }
 0xcc7   :  { %v2949_v48 = vmul.f32 %v5449_v38, %v2947_v10 }
 0xcc8   :  { %v5451_v60 = vpop.eup %5450 }
 0xcc9   :  { %v6508_v8 = vadd.f32 %v2950_v34, %v2949_v48 }
 0xccb   :  { %5452 = vtanh.f32 %v6508_v8  ;;  %v3127_v34 = vrot.slane %v6508_v8, 6 }
 0xcd5   :  { %v5453_v14 = vpop.eup %5452 }
 0xcd6   :  { %v2953_v12 = vmul.f32 %v5453_v14, %v5451_v60 }
 0xcd8   :  { %v2959_v52 = vrot.slane %v2953_v12, 6 }
 0xcda   :  { %3026 = vmatmul.mubr.f32.vlgmr.msra.gmra.mrb[32].mxu0 %v2959_v52  ;;  %3097 = vmatmul.mubr.f32.vlgmr.msra.gmra.mrb[32].mxu1 %v2959_v52 }
 0xcdb   :  { %5005 = vmatpush1.bf16.msra.mxu0 %v6234_v50  ;;  %5037 = vmatpush1.bf16.msra.mxu1 %v6237_v61 }
 0xcdc   :  { %5007 = vmatprep.subr.bf16.mxu0 %v6242_v47  ;;  %5039 = vmatprep.subr.bf16.mxu1 %v6244_v62 }
 0xcdd   :  { %3202 = vmatprep.mubr.f32.mxu0 %v5668_v0  ;;  %3273 = vmatprep.mubr.f32.mxu1 %v5668_v0 }
 0xcdf   :  { %5009 = vmatpush1.bf16.msra.mxu0 %v6246_v21  ;;  %5041 = vmatpush1.bf16.msra.mxu1 %v6249_v20 }
 0xce0   :  { %5011 = vmatprep.subr.bf16.mxu0 %v6254_v25  ;;  %5043 = vmatprep.subr.bf16.mxu1 %v6256_v27 }
 0xce3   :  { %5013 = vmatpush1.bf16.msra.mxu0 %v6258_v28  ;;  %5045 = vmatpush1.bf16.msra.mxu1 %v6261_v37 }
 0xce4   :  { %5015 = vmatprep.subr.bf16.mxu0 %v6266_v22  ;;  %5047 = vmatprep.subr.bf16.mxu1 %v6268_v35 }
 0xce7   :  { %5017 = vmatpush1.bf16.msra.mxu0 %v6270_v39  ;;  %5049 = vmatpush1.bf16.msra.mxu1 %v6273_v51 }
 0xce8   :  { %5019 = vmatprep.subr.bf16.mxu0 %v6278_v1  ;;  %5051 = vmatprep.subr.bf16.mxu1 %v6280_v13 }
 0xceb   :  { %5021 = vmatpush1.bf16.msra.mxu0 %v6282_v15  ;;  %5053 = vmatpush1.bf16.msra.mxu1 %v6285_v32 }
 0xcec   :  { %5023 = vmatprep.subr.bf16.mxu0 %v6290_v56  ;;  %5055 = vmatprep.subr.bf16.mxu1 %v6292_v24 }
 0xcef   :  { %5025 = vmatpush1.bf16.msra.mxu0 %v6294_v55  ;;  %5057 = vmatpush1.bf16.msra.mxu1 %v6297_v18 }
 0xcf0   :  { %5027 = vmatprep.subr.bf16.mxu0 %v6301_v11  ;;  %5059 = vmatprep.subr.bf16.mxu1 %v6304_v29 }
 0xcf3   :  { %5029 = vmatpush1.bf16.msra.mxu0 %v6306_v36  ;;  %5061 = vmatpush1.bf16.msra.mxu1 %v6309_v45 }
 0xcf4   :  { %5031 = vmatprep.subr.bf16.mxu0 %v6314_v40  ;;  %5063 = vmatprep.subr.bf16.mxu1 %v6316_v58 }
 0xcf7   :  { %5033 = vmatpush1.bf16.msra.mxu0 %v6318_v2  ;;  %5065 = vmatpush1.bf16.msra.mxu1 %v6321_v16 }
 0xcf8   :  { %5067 = vmatprep.subr.bf16.mxu0 %v6230_v33  ;;  %5099 = vmatprep.subr.bf16.mxu1 %v6232_v49 }
 0xdad   :  { %v3027_v5 = vpop.f32.mrb[32].mxu0  ;;  %v3098_v6 = vpop.f32.mrb[32].mxu1 }
 0xdae   :  { %v3103_v63 = vadd.f32 %v3027_v5, %v2954_v4  ;;  %v3029_v17 = vpop.f32.mrb[33].mxu0  ;;  %v3100_v42 = vpop.f32.mrb[33].mxu1  ;;  %v3105_v44 = vadd.f32 %v3098_v6, %v2956_v31 }
 0xdaf   :  { %v3104_v43 = vadd.f32 %v3029_v17, %v2955_v9  ;;  %v3106_v3 = vadd.f32 %v3100_v42, %v2957_v54  ;;  %v3134_v17 = vld [vmem:[#allocation2 + $0x20] sm:$0xc] }
 0xdb0   :  { %v3980_v26 = vmul.f32 -1.442695, %v3103_v63  ;;  %v3982_v7 = vmul.f32 -1.442695, %v3105_v44 }
 0xdb1   :  { %v3981_v30 = vmul.f32 -1.442695, %v3104_v43 }
 0xdb2   :  { %5454 = vpow2.f32 %v3980_v26  ;;  %v3135_v26 = vld [vmem:[#allocation2 + $0x28] sm:$0xc] }
 0xdb3   :  { %5456 = vpow2.f32 %v3981_v30 }
 0xdb4   :  { %5458 = vtanh.f32 %v3106_v3  ;;  %v3136_v3 = vld [vmem:[#allocation2 + $0x30] sm:$0xc] }
 0xdb5   :  { %5460 = vpow2.f32 %v3982_v7 }
 0xdbc   :  { %v5455_v23 = vpop.eup %5454 }
 0xdbd   :  { %v3116_v46 = vadd.f32 1.0, %v5455_v23  ;;  %v5457_v57 = vpop.eup %5456  ;;  %v3137_v23 = vld [vmem:[#allocation2 + $0x38] sm:$0xc] }
 0xdbe   :  { %v3117_v59 = vadd.f32 1.0, %v5457_v57  ;;  %v5459_v19 = vpop.eup %5458 }
 0xdbf   :  { %5462 = vrcp.f32 %v3116_v46  ;;  %v5461_v53 = vpop.eup %5460 }
 0xdc0   :  { %5464 = vrcp.f32 %v3117_v59  ;;  %v3118_v48 = vadd.f32 1.0, %v5461_v53 }
 0xdc2   :  { %5466 = vrcp.f32 %v3118_v48 }
 0xdc9   :  { %v5463_v10 = vpop.eup %5462 }
 0xdca   :  { %v3130_v38 = vmul.f32 %v5463_v10, %v5459_v19  ;;  %v5465_v41 = vpop.eup %5464 }
 0xdcb   :  { %v3129_v60 = vmul.f32 %v5465_v41, %v3127_v34 }
 0xdcc   :  { %v5467_v12 = vpop.eup %5466 }
 0xdcd   :  { %v6546_v14 = vadd.f32 %v3130_v38, %v3129_v60 }
 0xdcf   :  { %5468 = vtanh.f32 %v6546_v14  ;;  %v3316_v41 = vrot.slane %v6546_v14, 6 }
 0xdd9   :  { %v5469_v52 = vpop.eup %5468 }
 0xdda   :  { %v3133_v4 = vmul.f32 %v5469_v52, %v5467_v12 }
 0xddc   :  { %3203 = vmatmul.mubr.f32.vlgmr.msra.gmra.mrb[34].mxu0 %v3133_v4  ;;  %3274 = vmatmul.mubr.f32.vlgmr.msra.gmra.mrb[34].mxu1 %v3133_v4 }
 0xddd   :  { %5069 = vmatpush1.bf16.msra.mxu0 %v6234_v50  ;;  %5101 = vmatpush1.bf16.msra.mxu1 %v6237_v61 }
 0xdde   :  { %5071 = vmatprep.subr.bf16.mxu0 %v6242_v47  ;;  %5103 = vmatprep.subr.bf16.mxu1 %v6244_v62 }
 0xddf   :  { %3394 = vmatprep.mubr.f32.mxu0 %v5668_v0  ;;  %3465 = vmatprep.mubr.f32.mxu1 %v5668_v0 }
 0xde1   :  { %5073 = vmatpush1.bf16.msra.mxu0 %v6246_v21  ;;  %5105 = vmatpush1.bf16.msra.mxu1 %v6249_v20 }
 0xde2   :  { %5075 = vmatprep.subr.bf16.mxu0 %v6254_v25  ;;  %5107 = vmatprep.subr.bf16.mxu1 %v6256_v27 }
 0xde5   :  { %5077 = vmatpush1.bf16.msra.mxu0 %v6258_v28  ;;  %5109 = vmatpush1.bf16.msra.mxu1 %v6261_v37 }
 0xde6   :  { %5079 = vmatprep.subr.bf16.mxu0 %v6266_v22  ;;  %5111 = vmatprep.subr.bf16.mxu1 %v6268_v35 }
 0xde9   :  { %5081 = vmatpush1.bf16.msra.mxu0 %v6270_v39  ;;  %5113 = vmatpush1.bf16.msra.mxu1 %v6273_v51 }
 0xdea   :  { %5083 = vmatprep.subr.bf16.mxu0 %v6278_v1  ;;  %5115 = vmatprep.subr.bf16.mxu1 %v6280_v13 }
 0xded   :  { %5085 = vmatpush1.bf16.msra.mxu0 %v6282_v15  ;;  %5117 = vmatpush1.bf16.msra.mxu1 %v6285_v32 }
 0xdee   :  { %5087 = vmatprep.subr.bf16.mxu0 %v6290_v56  ;;  %5119 = vmatprep.subr.bf16.mxu1 %v6292_v24 }
 0xdf1   :  { %5089 = vmatpush1.bf16.msra.mxu0 %v6294_v55  ;;  %5121 = vmatpush1.bf16.msra.mxu1 %v6297_v18 }
 0xdf2   :  { %5091 = vmatprep.subr.bf16.mxu0 %v6301_v11  ;;  %5123 = vmatprep.subr.bf16.mxu1 %v6304_v29 }
 0xdf5   :  { %5093 = vmatpush1.bf16.msra.mxu0 %v6306_v36  ;;  %5125 = vmatpush1.bf16.msra.mxu1 %v6309_v45 }
 0xdf6   :  { %5095 = vmatprep.subr.bf16.mxu0 %v6314_v40  ;;  %5127 = vmatprep.subr.bf16.mxu1 %v6316_v58 }
 0xdf9   :  { %5097 = vmatpush1.bf16.msra.mxu0 %v6318_v2  ;;  %5129 = vmatpush1.bf16.msra.mxu1 %v6321_v16 }
 0xdfa   :  { %5131 = vmatprep.subr.bf16.mxu0 %v6230_v33  ;;  %5163 = vmatprep.subr.bf16.mxu1 %v6232_v49 }
 0xeaf   :  { %v3204_v8 = vpop.f32.mrb[34].mxu0  ;;  %v3275_v5 = vpop.f32.mrb[34].mxu1 }
 0xeb0   :  { %v3284_v6 = vrot.slane %v3204_v8, 6  ;;  %v3206_v63 = vpop.f32.mrb[35].mxu0  ;;  %v3277_v9 = vpop.f32.mrb[35].mxu1  ;;  %v3286_v54 = vrot.slane %v3275_v5, 6 }
 0xeb1   :  { %v3285_v42 = vrot.slane %v3206_v63, 6  ;;  %v3287_v7 = vrot.slane %v3277_v9, 6 }
 0xeb2   :  { %v3292_v43 = vadd.f32 %v3284_v6, %v3134_v17  ;;  %v3294_v33 = vadd.f32 %v3286_v54, %v3136_v3  ;;  %v5669_v54 = vmov 0.0|0.0   ;;  %v3709_v3 = vld [vmem:[#allocation11 + $0x10] sm:$0xff] }
 0xeb3   :  { %v3293_v30 = vadd.f32 %v3285_v42, %v3135_v26  ;;  %v3295_v49 = vadd.f32 %v3287_v7, %v3137_v23  ;;  %v3710_v7 = vld [vmem:[#allocation11 + $0x18] sm:$0xff]  ;;  %v3711_v23 = vld [vmem:[#allocation11 + $0x20] sm:$0xff] }
 0xeb4   :  { %v3983_v31 = vmul.f32 -1.442695, %v3292_v43  ;;  %v3985_v46 = vmul.f32 -1.442695, %v3294_v33  ;;  %v5198_v33 = vpack.c.bf16 %v3710_v7, %v3709_v3 }
 0xeb5   :  { %v3984_v44 = vmul.f32 -1.442695, %v3293_v30  ;;  %v3707_v30 = vld [vmem:[#allocation11] sm:$0xff] }
 0xeb6   :  { %5470 = vpow2.f32 %v3983_v31  ;;  %v3708_v31 = vld [vmem:[#allocation11 + $0x8] sm:$0xff] }
 0xeb7   :  { %5472 = vpow2.f32 %v3984_v44  ;;  %v5195_v44 = vpack.c.bf16 %v3708_v31, %v3707_v30 }
 0xeb8   :  { %5474 = vtanh.f32 %v3295_v49  ;;  %v3712_v49 = vld [vmem:[#allocation11 + $0x28] sm:$0xff] }
 0xeb9   :  { %5476 = vpow2.f32 %v3985_v46  ;;  %v5201_v46 = vpack.c.bf16 %v3712_v49, %v3711_v23 }
 0xec0   :  { %v5471_v57 = vpop.eup %5470 }
 0xec1   :  { %v3305_v59 = vadd.f32 1.0, %v5471_v57  ;;  %v5473_v19 = vpop.eup %5472  ;;  %v3713_v57 = vld [vmem:[#allocation11 + $0x30] sm:$0xff] }
 0xec2   :  { %v3306_v53 = vadd.f32 1.0, %v5473_v19  ;;  %v5475_v10 = vpop.eup %5474 }
 0xec3   :  { %5478 = vrcp.f32 %v3305_v59  ;;  %v5477_v34 = vpop.eup %5476  ;;  %v3714_v59 = vld [vmem:[#allocation11 + $0x38] sm:$0xff] }
 0xec4   :  { %5480 = vrcp.f32 %v3306_v53  ;;  %v3307_v12 = vadd.f32 1.0, %v5477_v34  ;;  %v5204_v19 = vpack.c.bf16 %v3714_v59, %v3713_v57  ;;  %v3715_v53 = vld [vmem:[#allocation11 + $0x40] sm:$0xff] }
 0xec6   :  { %5482 = vrcp.f32 %v3307_v12  ;;  %v3720_v12 = vld [vmem:[#allocation11 + $0x68] sm:$0xff] }
 0xecd   :  { %v5479_v38 = vpop.eup %5478 }
 0xece   :  { %v3319_v48 = vmul.f32 %v5479_v38, %v5475_v10  ;;  %v5481_v60 = vpop.eup %5480  ;;  %v3716_v10 = vld [vmem:[#allocation11 + $0x48] sm:$0xff]  ;;  %v3717_v38 = vld [vmem:[#allocation11 + $0x50] sm:$0xff] }
 0xecf   :  { %v3318_v52 = vmul.f32 %v5481_v60, %v3316_v41  ;;  %v5207_v34 = vpack.c.bf16 %v3716_v10, %v3715_v53  ;;  %v3718_v41 = vld [vmem:[#allocation11 + $0x58] sm:$0xff]  ;;  %v3719_v60 = vld [vmem:[#allocation11 + $0x60] sm:$0xff] }
 0xed0   :  { %v5483_v8 = vpop.eup %5482 }
 0xed1   :  { %v6584_v4 = vadd.f32 %v3319_v48, %v3318_v52  ;;  %v5210_v48 = vpack.c.bf16 %v3718_v41, %v3717_v38  ;;  %v5213_v52 = vpack.c.bf16 %v3720_v12, %v3719_v60  ;;  %v3818_v60 = vld [vmem:[#allocation12 + $0x70] sm:$0xff]  ;;  %v3819_v12 = vld [vmem:[#allocation12 + $0x78] sm:$0xff] }
 0xed3   :  { %5484 = vtanh.f32 %v6584_v4 }
 0xedd   :  { %v5485_v5 = vpop.eup %5484 }
 0xede   :  { %v3322_v6 = vmul.f32 %v5485_v5, %v5483_v8  ;;  %v3722_v8 = vld [vmem:[#allocation11 + $0x78] sm:$0xff] }
 0xee0   :  { %v3328_v63 = vrot.slane %v3322_v6, 2  ;;  %v3804_v6 = vld [vmem:[#allocation12] sm:$0xff] }
 0xee2   :  { %3395 = vmatmul.mubr.f32.vlgmr.msra.gmra.mrb[36].mxu0 %v3328_v63  ;;  %3466 = vmatmul.mubr.f32.vlgmr.msra.gmra.mrb[36].mxu1 %v3328_v63  ;;  %v3805_v63 = vld [vmem:[#allocation12 + $0x8] sm:$0xff] }
 0xee3   :  { %5133 = vmatpush1.bf16.msra.mxu0 %v6234_v50  ;;  %5165 = vmatpush1.bf16.msra.mxu1 %v6237_v61 }
 0xee4   :  { %5135 = vmatprep.subr.bf16.mxu0 %v6242_v47  ;;  %5167 = vmatprep.subr.bf16.mxu1 %v6244_v62 }
 0xee5   :  { %3586 = vmatprep.mubr.f32.mxu0 %v5668_v0  ;;  %3657 = vmatprep.mubr.f32.mxu1 %v5668_v0 }
 0xee7   :  { %5137 = vmatpush1.bf16.msra.mxu0 %v6246_v21  ;;  %5169 = vmatpush1.bf16.msra.mxu1 %v6249_v20  ;;  %v3323_v20 = vld [vmem:[#allocation2 + $0x20] sm:$0x30] }
 0xee8   :  { %5139 = vmatprep.subr.bf16.mxu0 %v6254_v25  ;;  %5171 = vmatprep.subr.bf16.mxu1 %v6256_v27 }
 0xeeb   :  { %5141 = vmatpush1.bf16.msra.mxu0 %v6258_v28  ;;  %5173 = vmatpush1.bf16.msra.mxu1 %v6261_v37  ;;  %v3324_v28 = vld [vmem:[#allocation2 + $0x28] sm:$0x30] }
 0xeec   :  { %5143 = vmatprep.subr.bf16.mxu0 %v6266_v22  ;;  %5175 = vmatprep.subr.bf16.mxu1 %v6268_v35 }
 0xeef   :  { %5145 = vmatpush1.bf16.msra.mxu0 %v6270_v39  ;;  %5177 = vmatpush1.bf16.msra.mxu1 %v6273_v51  ;;  %v3325_v51 = vld [vmem:[#allocation2 + $0x30] sm:$0x30] }
 0xef0   :  { %5147 = vmatprep.subr.bf16.mxu0 %v6278_v1  ;;  %5179 = vmatprep.subr.bf16.mxu1 %v6280_v13 }
 0xef3   :  { %5149 = vmatpush1.bf16.msra.mxu0 %v6282_v15  ;;  %5181 = vmatpush1.bf16.msra.mxu1 %v6285_v32  ;;  %v3326_v15 = vld [vmem:[#allocation2 + $0x38] sm:$0x30] }
 0xef4   :  { %5151 = vmatprep.subr.bf16.mxu0 %v6290_v56  ;;  %5183 = vmatprep.subr.bf16.mxu1 %v6292_v24 }
 0xef7   :  { %5153 = vmatpush1.bf16.msra.mxu0 %v6294_v55  ;;  %5185 = vmatpush1.bf16.msra.mxu1 %v6297_v18 }
 0xef8   :  { %5155 = vmatprep.subr.bf16.mxu0 %v6301_v11  ;;  %5187 = vmatprep.subr.bf16.mxu1 %v6304_v29 }
 0xefb   :  { %5157 = vmatpush1.bf16.msra.mxu0 %v6306_v36  ;;  %5189 = vmatpush1.bf16.msra.mxu1 %v6309_v45 }
 0xefc   :  { %5159 = vmatprep.subr.bf16.mxu0 %v6314_v40  ;;  %5191 = vmatprep.subr.bf16.mxu1 %v6316_v58  ;;  %v3508_v40 = vrot.slane %v6584_v4, 6  ;;  %v3721_v4 = vld [vmem:[#allocation11 + $0x70] sm:$0xff] }
 0xefd   :  { %v5216_v5 = vpack.c.bf16 %v3722_v8, %v3721_v4 }
 0xeff   :  { %5161 = vmatpush1.bf16.msra.mxu0 %v6318_v2  ;;  %5193 = vmatpush1.bf16.msra.mxu1 %v6321_v16 }
 0xf00   :  { %5194 = vmatprep.subr.bf16.mxu0 %v5669_v54  ;;  %5218 = vmatprep.subr.bf16.mxu1 %v5669_v54 }
 0xfb5   :  { %v3396_v50 = vpop.f32.mrb[36].mxu0  ;;  %v3467_v61 = vpop.f32.mrb[36].mxu1 }
 0xfb6   :  { %v3476_v47 = vrot.slane %v3396_v50, 4  ;;  %v3398_v62 = vpop.f32.mrb[37].mxu0  ;;  %v3469_v21 = vpop.f32.mrb[37].mxu1  ;;  %v3478_v39 = vrot.slane %v3467_v61, 4  ;;  %v3806_v50 = vld [vmem:[#allocation12 + $0x10] sm:$0xff]  ;;  %v5219_v61 = vpack.c.bf16 %v3805_v63, %v3804_v6  ;;  %v5671_v63 = vmov 0  }
 0xfb7   :  { %v3477_v25 = vrot.slane %v3398_v62, 4  ;;  %v3479_v1 = vrot.slane %v3469_v21, 4  ;;  %v3809_v21 = vld [vmem:[#allocation12 + $0x28] sm:$0xff]  ;;  %5260 = vset.pattern.permute.xlu1 %v5671_v63  ;;  %5261 = vset.pattern.permute.xlu0 %v5671_v63 }
 0xfb8   :  { %v3484_v27 = vadd.f32 %v3476_v47, %v3323_v20  ;;  %v3486_v13 = vadd.f32 %v3478_v39, %v3325_v51  ;;  %v3807_v47 = vld [vmem:[#allocation12 + $0x18] sm:$0xff]  ;;  %v3814_v39 = vld [vmem:[#allocation12 + $0x50] sm:$0xff] }
 0xfb9   :  { %v3485_v37 = vadd.f32 %v3477_v25, %v3324_v28  ;;  %v3487_v32 = vadd.f32 %v3479_v1, %v3326_v15  ;;  %v5222_v62 = vpack.c.bf16 %v3807_v47, %v3806_v50  ;;  %v3810_v25 = vld [vmem:[#allocation12 + $0x30] sm:$0xff]  ;;  %v3815_v51 = vld [vmem:[#allocation12 + $0x58] sm:$0xff]  ;;  %v3817_v15 = vld [vmem:[#allocation12 + $0x68] sm:$0xff] }
 0xfba   :  { %v3986_v22 = vmul.f32 -1.442695, %v3484_v27  ;;  %v3988_v56 = vmul.f32 -1.442695, %v3486_v13  ;;  %v3811_v27 = vld [vmem:[#allocation12 + $0x38] sm:$0xff]  ;;  %v5234_v1 = vpack.c.bf16 %v3815_v51, %v3814_v39  ;;  %v3816_v13 = vld [vmem:[#allocation12 + $0x60] sm:$0xff] }
 0xfbb   :  { %v3987_v35 = vmul.f32 -1.442695, %v3485_v37  ;;  %v5228_v28 = vpack.c.bf16 %v3811_v27, %v3810_v25  ;;  %v3812_v37 = vld [vmem:[#allocation12 + $0x40] sm:$0xff]  ;;  %v3993_v50 = vld [vmem:[%s6661_s10] ss:$0 sm:$0xff] }
 0xfbc   :  { %5486 = vpow2.f32 %v3986_v22  ;;  %v3813_v22 = vld [vmem:[#allocation12 + $0x48] sm:$0xff] }
 0xfbd   :  { %5488 = vpow2.f32 %v3987_v35  ;;  %v5231_v35 = vpack.c.bf16 %v3813_v22, %v3812_v37 }
 0xfbe   :  { %5490 = vtanh.f32 %v3487_v32  ;;  %v5237_v32 = vpack.c.bf16 %v3817_v15, %v3816_v13 }
 0xfbf   :  { %5492 = vpow2.f32 %v3988_v56 }
 0xfc6   :  { %v5487_v24 = vpop.eup %5486 }
 0xfc7   :  { %v3497_v55 = vadd.f32 1.0, %v5487_v24  ;;  %v5489_v18 = vpop.eup %5488 }
 0xfc8   :  { %v3498_v11 = vadd.f32 1.0, %v5489_v18  ;;  %v5491_v29 = vpop.eup %5490 }
 0xfc9   :  { %5494 = vrcp.f32 %v3497_v55  ;;  %v5493_v36 = vpop.eup %5492 }
 0xfca   :  { %5496 = vrcp.f32 %v3498_v11  ;;  %v3499_v16 = vadd.f32 1.0, %v5493_v36 }
 0xfcc   :  { %5498 = vrcp.f32 %v3499_v16 }
 0xfd3   :  { %v5495_v45 = vpop.eup %5494 }
 0xfd4   :  { %v3511_v58 = vmul.f32 %v5495_v45, %v5491_v29  ;;  %v5497_v2 = vpop.eup %5496  ;;  %v3515_v29 = vld [vmem:[#allocation2 + $0x20] sm:$0xc0] }
 0xfd5   :  { %v3510_v14 = vmul.f32 %v5497_v2, %v3508_v40  ;;  %v3516_v40 = vld [vmem:[#allocation2 + $0x28] sm:$0xc0] }
 0xfd6   :  { %v5499_v17 = vpop.eup %5498 }
 0xfd7   :  { %v6620_v9 = vadd.f32 %v3511_v58, %v3510_v14 }
 0xfd9   :  { %5500 = vtanh.f32 %v6620_v9 }
 0xfe3   :  { %v5501_v42 = vpop.eup %5500 }
 0xfe4   :  { %v3514_v43 = vmul.f32 %v5501_v42, %v5499_v17  ;;  %v3517_v17 = vld [vmem:[#allocation2 + $0x30] sm:$0xc0] }
 0xfe6   :  { %v3520_v26 = vrot.slane %v3514_v43, 4 }
 0xfe8   :  { %3587 = vmatmul.mubr.f32.vlgmr.msra.gmra.mrb[38].mxu0 %v3520_v26  ;;  %3658 = vmatmul.mubr.f32.vlgmr.msra.gmra.mrb[38].mxu1 %v3520_v26  ;;  %v3518_v26 = vld [vmem:[#allocation2 + $0x38] sm:$0xc0] }
 0xfe9   :  { %5196 = vmatpush3.bf16.msra.mxu0 %v5195_v44  ;;  %4060 = vmatprep.mubr.msk.f32.mxu0 %vm5670_vm1, %v5668_v0 }
 0xfea   :  { %5197 = vmatprep.subr.bf16.mxu0 %v5669_v54  ;;  %4095 = vmatprep.mubr.msk.f32.mxu1 %vm5670_vm1, %v5668_v0  ;;  %v3808_v0 = vld [vmem:[#allocation12 + $0x20] sm:$0xff] }
 0xfeb   :  { %5220 = vmatpush3.bf16.msra.mxu1 %v5219_v61  ;;  %v5225_v20 = vpack.c.bf16 %v3809_v21, %v3808_v0 }
 0xfec   :  { %5221 = vmatprep.subr.bf16.mxu1 %v5669_v54 }
 0xfed   :  { %5199 = vmatpush3.bf16.msra.mxu0 %v5198_v33 }
 0xfee   :  { %5200 = vmatprep.subr.bf16.mxu0 %v5669_v54 }
 0xfef   :  { %5223 = vmatpush3.bf16.msra.mxu1 %v5222_v62 }
 0xff0   :  { %5224 = vmatprep.subr.bf16.mxu1 %v5669_v54 }
 0xff1   :  { %5202 = vmatpush3.bf16.msra.mxu0 %v5201_v46  ;;  %v3700_v46 = vrot.slane %v6620_v9, 6  ;;  %v3992_v9 = vld [vmem:[%s6659_s8] ss:$0 sm:$0xff] }
 0xff2   :  { %5203 = vmatprep.subr.bf16.mxu0 %v5669_v54 }
 0xff3   :  { %5226 = vmatpush3.bf16.msra.mxu1 %v5225_v20 }
 0xff4   :  { %5227 = vmatprep.subr.bf16.mxu1 %v5669_v54 }
 0xff5   :  { %5205 = vmatpush3.bf16.msra.mxu0 %v5204_v19 }
 0xff6   :  { %5206 = vmatprep.subr.bf16.mxu0 %v5669_v54 }
 0xff7   :  { %5229 = vmatpush3.bf16.msra.mxu1 %v5228_v28 }
 0xff8   :  { %5230 = vmatprep.subr.bf16.mxu1 %v5669_v54 }
 0xff9   :  { %5208 = vmatpush3.bf16.msra.mxu0 %v5207_v34 }
 0xffa   :  { %5209 = vmatprep.subr.bf16.mxu0 %v5669_v54 }
 0xffb   :  { %5232 = vmatpush3.bf16.msra.mxu1 %v5231_v35 }
 0xffc   :  { %5233 = vmatprep.subr.bf16.mxu1 %v5669_v54 }
 0xffd   :  { %5211 = vmatpush3.bf16.msra.mxu0 %v5210_v48 }
 0xffe   :  { %5212 = vmatprep.subr.bf16.mxu0 %v5669_v54 }
 0xfff   :  { %5235 = vmatpush3.bf16.msra.mxu1 %v5234_v1 }
0x1000   :  { %5236 = vmatprep.subr.bf16.mxu1 %v5669_v54 }
0x1001   :  { %5214 = vmatpush3.bf16.msra.mxu0 %v5213_v52  ;;  %v5240_v52 = vpack.c.bf16 %v3819_v12, %v3818_v60 }
0x1002   :  { %5215 = vmatprep.subr.bf16.mxu0 %v5669_v54 }
0x1003   :  { %5238 = vmatpush3.bf16.msra.mxu1 %v5237_v32 }
0x1004   :  { %5239 = vmatprep.subr.bf16.mxu1 %v5669_v54 }
0x1005   :  { %5217 = vmatpush3.bf16.msra.mxu0 %v5216_v5 }
0x1007   :  { %5241 = vmatpush3.bf16.msra.mxu1 %v5240_v52 }
0x10bb   :  { %v3588_v56 = vpop.f32.mrb[38].mxu0  ;;  %v3659_v24 = vpop.f32.mrb[38].mxu1 }
0x10bc   :  { %v3668_v55 = vrot.slane %v3588_v56, 2  ;;  %v3590_v18 = vpop.f32.mrb[39].mxu0  ;;  %v3661_v11 = vpop.f32.mrb[39].mxu1  ;;  %v3670_v14 = vrot.slane %v3659_v24, 2 }
0x10bd   :  { %v3669_v36 = vrot.slane %v3590_v18, 2  ;;  %v3671_v42 = vrot.slane %v3661_v11, 2 }
0x10be   :  { %v3676_v45 = vadd.f32 %v3668_v55, %v3515_v29  ;;  %v3678_v43 = vadd.f32 %v3670_v14, %v3517_v17 }
0x10bf   :  { %v3677_v58 = vadd.f32 %v3669_v36, %v3516_v40  ;;  %v3679_v30 = vadd.f32 %v3671_v42, %v3518_v26 }
0x10c0   :  { %v3989_v2 = vmul.f32 -1.442695, %v3676_v45  ;;  %v3991_v31 = vmul.f32 -1.442695, %v3678_v43 }
0x10c1   :  { %v3990_v16 = vmul.f32 -1.442695, %v3677_v58 }
0x10c2   :  { %5502 = vpow2.f32 %v3989_v2 }
0x10c3   :  { %5504 = vpow2.f32 %v3990_v16 }
0x10c4   :  { %5506 = vtanh.f32 %v3679_v30 }
0x10c5   :  { %5508 = vpow2.f32 %v3991_v31 }
0x10cc   :  { %v5503_v44 = vpop.eup %5502 }
0x10cd   :  { %v3689_v54 = vadd.f32 1.0, %v5503_v44  ;;  %v5505_v3 = vpop.eup %5504 }
0x10ce   :  { %v3690_v7 = vadd.f32 1.0, %v5505_v3  ;;  %v5507_v33 = vpop.eup %5506 }
0x10cf   :  { %5510 = vrcp.f32 %v3689_v54  ;;  %v5509_v23 = vpop.eup %5508 }
0x10d0   :  { %5512 = vrcp.f32 %v3690_v7  ;;  %v3691_v19 = vadd.f32 1.0, %v5509_v23 }
0x10d2   :  { %5514 = vrcp.f32 %v3691_v19 }
0x10d9   :  { %v5511_v49 = vpop.eup %5510 }
0x10da   :  { %v3703_v57 = vmul.f32 %v5511_v49, %v5507_v33  ;;  %v5513_v59 = vpop.eup %5512 }
0x10db   :  { %v3702_v53 = vmul.f32 %v5513_v59, %v3700_v46 }
0x10dc   :  { %v5515_v34 = vpop.eup %5514 }
0x10dd   :  { %v3704_v10 = vadd.f32 %v3703_v57, %v3702_v53 }
0x10df   :  { %5516 = vtanh.f32 %v3704_v10 }
0x10e9   :  { %v5517_v38 = vpop.eup %5516 }
0x10ea   :  { %v3706_v41 = vmul.f32 %v5517_v38, %v5515_v34 }
0x10ec   :  { %v3731_v48 = vrot.slane %v3706_v41, 6 }
0x10ee   :  { %4061 = vmatmul.mubr.f32.vlgmr.msra.gmra.mrb[40].mxu0 %v3731_v48 }
0x11c1   :  { %v3799_v4 = vpop.f32.mrb[40].mxu0 }
0x11c2   :  { %v3800_v8 = vadd.f32 %v3992_v9, %v3799_v4  ;;  %v4062_v5 = vpop.f32.mrb[41].mxu0 }
0x11c4   :  { %v3803_v6 = vmax.f32 %v3800_v8, 0.0 }
0x11c6   :  { %4096 = vmatmul.mubr.f32.vlgmr.msra.gmra.mrb[40].mxu1 %v3803_v6 }
0x1299   :  { %v3893_v61 = vpop.f32.mrb[40].mxu1 }
0x129a   :  { %v3894_v47 = vadd.f32 %v3993_v50, %v3893_v61  ;;  %v4097_v62 = vpop.f32.mrb[41].mxu1 }
0x129c   :  { %3925 = vperm.xlu1 %5260, %v3894_v47   ;;  %v3898_v0 = vsel %vm3897_vm2, %v3894_v47, 0.0  ;;  %v3909_v21 = vsel %vm3908_vm3, %v3894_v47, 0.0 }
0x129d   :  { %3899 = vadd.xlane.f32.xlu0 %v3898_v0 }
0x12a1   :  { %3910 = vadd.xlane.f32.xlu0 %v3909_v21 }
0x131b   :  { %v3926_v24 = vpop.permute.xlu1 %3925 }
0x131c   :  { %v3928_v55 = vadd.f32 %v3926_v24, %v3894_v47 }
0x132a   :  { %v3900_v20 = vpop.xlane.xlu0 %3899 }
0x132b   :  { %v3901_v25 = vrot.slane %v3900_v20, 4 }
0x132d   :  { %v3902_v27 = vadd.f32 %v3901_v25, %v3900_v20 }
0x132e   :  { %v3911_v28 = vpop.xlane.xlu0 %3910 }
0x132f   :  { %v3903_v37 = vrot.slane %v3902_v27, 2  ;;  %v3912_v22 = vrot.slane %v3911_v28, 4 }
0x1331   :  { %v3913_v35 = vadd.f32 %v3912_v22, %v3911_v28  ;;  %v3904_v39 = vadd.f32 %v3903_v37, %v3902_v27 }
0x1333   :  { %v3914_v51 = vrot.slane %v3913_v35, 2  ;;  %v3905_v1 = vrot.slane %v3904_v39, 1 }
0x1335   :  { %v3915_v13 = vadd.f32 %v3914_v51, %v3913_v35  ;;  %v3906_v15 = vadd.f32 %v3905_v1, %v3904_v39 }
0x1337   :  { %5242 = vpush %v3906_v15  ;;  %v3916_v32 = vrot.slane %v3915_v13, 1 }
0x1339   :  { %v3917_v56 = vadd.f32 %v3916_v32, %v3915_v13 }
0x133b   :  { %5244 = vpush %v3917_v56 }
0x1368   :  { %s5243_s8 = spop %5242 }
0x136c   :  { %s5245_s10 = spop %5244 }
0x136d   :  { %s3919_s4 = ssub.f32 %s5243_s8, %s5245_s10 }
0x136f   :  { %s3922_s29 = smul.f32 0.125, %s3919_s4 }
0x1371   :  { %v3929_v18 = vstv %s3922_s29 }
0x1372   :  { %v3930_v11 = vsub.f32 %v3928_v55, %v3929_v18 }
0x1374   :  { %3931 = vst [vmem:[%s6662_s11] sm:$0x3] %v3930_v11 }
0x1375   :  { %3936 = vsyncpa [#allocation5], 1 }
0x1376   :  { %3937 = vsyncpa [#allocation7], 1 }
0x1377   :  { %3938 = vsyncpa [#allocation10], 1 }
0x1378   :  { %3939 = vsyncpa [#allocation13], 1 }

</bundles_post_ra>
